<compile_context>
chip_gen: v6e
topology: v6e:2x2x1
jax: 0.10.0
libtpu: 0.0.40
codegen_flags: <defaults>
</compile_context>

<pallas_src>
import functools
import math

import jax
import jax.numpy as jnp
from jax.experimental import pallas as pl
from jax.experimental.pallas import tpu as pltpu


def mha_kernel(xq_ref, xk_ref, xv_ref, mask_ref,
               wq_ref, wk_ref, wv_ref, wo_ref,
               bq_ref, bk_ref, bv_ref, bo_ref,
               out_ref, attn_ref, *, num_heads):
    """One grid step processes G graphs (batch rows) at once."""
    G, N, _ = mask_ref.shape            # mask block: (G, N, N)
    H = num_heads
    C = wo_ref.shape[1]                 # d_model
    dk = C // H
    scale = 1.0 / math.sqrt(dk)

    # Q/K/V projections: bf16 operands (host-cast), f32 accumulation + bias.
    def project(x_ref, w_ref, b_ref):
        return jnp.dot(x_ref[...], w_ref[...],
                       preferred_element_type=jnp.float32) + b_ref[...]

    q = project(xq_ref, wq_ref, bq_ref)       # (G*N, C) f32
    k = project(xk_ref, wk_ref, bk_ref)
    v = project(xv_ref, wv_ref, bv_ref)

    mask = mask_ref[...]                      # (G, N, N) additive, f32

    out_acc = jnp.zeros((G * N, C), jnp.float32)

    for h in range(H):                        # small static unroll (H heads)
        cols = slice(h * dk, (h + 1) * dk)
        # Lane slice + free major-dim split only; no head-major transpose
        # or concat of the activations.
        qh = q[:, cols].reshape(G, N, dk)
        kh = k[:, cols].reshape(G, N, dk)
        vh = v[:, cols].reshape(G, N, dk)

        # Scaled dot-product attention, batched over the G graphs.
        # Mask is added with its natural (G,N,N) shape (== mask.unsqueeze(1)
        # broadcast over heads in the reference) -- no materialized broadcast.
        s = jnp.einsum('gnd,gmd->gnm', qh, kh,
                       preferred_element_type=jnp.float32) * scale + mask
        m = jnp.max(s, axis=-1, keepdims=True)
        e = jnp.exp(s - m)
        p = e / jnp.sum(e, axis=-1, keepdims=True)   # exact softmax (exposed output)

        # TODO(synk): nn.Dropout(p=0.1) on p_attn is the eval-mode identity here.
        attn_ref[:, h, :, :] = p

        ctx = jnp.einsum('gnm,gmd->gnd', p, vh,
                         preferred_element_type=jnp.float32)      # (G, N, dk)

        # Output projection accumulated against head-sliced Wo rows instead of
        # re-concatenating the per-head contexts along lanes.
        out_acc = out_acc + jnp.dot(
            ctx.reshape(G * N, dk).astype(jnp.bfloat16), wo_ref[cols, :],
            preferred_element_type=jnp.float32)

    out_ref[...] = out_acc + bo_ref[...]      # lane-dense (G*N, C) store


def _default_num_blocks():
    """2 grid steps (one per TensorCore) on v7x, 1 on single-TC v5e/v6e."""
    try:
        kind = jax.devices()[0].device_kind.lower()
    except Exception:
        return 1
    return 2 if "v7" in kind else 1


def masked_multi_head_attention(query, key, value, mask, params, num_heads,
                                num_blocks=None, operand_dtype=jnp.bfloat16):
    """query/key/value: (B, N, C); mask: (B, N, N) additive.

    Returns (output (B, N, C), attn (B, H, N, N)) -- same as the PyTorch module.
    """
    B, N, C = query.shape
    H = num_heads
    assert C % H == 0

    if num_blocks is None:
        num_blocks = _default_num_blocks()
    num_blocks = max(1, min(num_blocks, B))
    if B % num_blocks != 0:
        num_blocks = 1
    G = B // num_blocks

    # Host-side packing: flatten rows and cast matmul operands to bf16
    # (f32 accumulation happens inside the kernel).  Mask/biases stay f32.
    cd = operand_dtype
    xq = query.reshape(B * N, C).astype(cd)
    xk = key.reshape(B * N, C).astype(cd)
    xv = value.reshape(B * N, C).astype(cd)
    wq = params["wq"].astype(cd)
    wk = params["wk"].astype(cd)
    wv = params["wv"].astype(cd)
    wo = params["wo"].astype(cd)
    bq = params["bq"].astype(jnp.float32)
    bk = params["bk"].astype(jnp.float32)
    bv = params["bv"].astype(jnp.float32)
    bo = params["bo"].astype(jnp.float32)
    mask = mask.astype(jnp.float32)

    kern = functools.partial(mha_kernel, num_heads=H)

    out_flat, attn = pl.pallas_call(
        kern,
        grid=(num_blocks,),
        in_specs=[
            pl.BlockSpec((G * N, C), lambda i: (i, 0)),          # xq
            pl.BlockSpec((G * N, C), lambda i: (i, 0)),          # xk
            pl.BlockSpec((G * N, C), lambda i: (i, 0)),          # xv
            pl.BlockSpec((G, N, N), lambda i: (i, 0, 0)),        # additive mask
            pl.BlockSpec((C, C), lambda i: (0, 0)),              # Wq
            pl.BlockSpec((C, C), lambda i: (0, 0)),              # Wk
            pl.BlockSpec((C, C), lambda i: (0, 0)),              # Wv
            pl.BlockSpec((C, C), lambda i: (0, 0)),              # Wo
            pl.BlockSpec((1, C), lambda i: (0, 0)),              # bq
            pl.BlockSpec((1, C), lambda i: (0, 0)),              # bk
            pl.BlockSpec((1, C), lambda i: (0, 0)),              # bv
            pl.BlockSpec((1, C), lambda i: (0, 0)),              # bo
        ],
        out_specs=[
            pl.BlockSpec((G * N, C), lambda i: (i, 0)),          # output rows
            pl.BlockSpec((G, H, N, N), lambda i: (i, 0, 0, 0)),  # attention probs
        ],
        out_shape=[
            jax.ShapeDtypeStruct((B * N, C), jnp.float32),
            jax.ShapeDtypeStruct((B, H, N, N), jnp.float32),
        ],
        compiler_params=pltpu.CompilerParams(dimension_semantics=("parallel",)),
    )(xq, xk, xv, mask, wq, wk, wv, wo, bq, bk, bv, bo)

    return out_flat.reshape(B, N, C), attn


def reference_mha(query, key, value, mask, params, num_heads):
    """Pure-JAX f32 reference matching the PyTorch module (eval mode)."""
    B, N, C = query.shape
    H = num_heads
    dk = C // H

    def proj(x, w, b):
        return (x @ w + b).reshape(B, N, H, dk).transpose(0, 2, 1, 3)

    q = proj(query, params["wq"], params["bq"])
    k = proj(key, params["wk"], params["bk"])
    v = proj(value, params["wv"], params["bv"])
    scores = jnp.einsum('bhnd,bhmd->bhnm', q, k) / math.sqrt(dk) + mask[:, None]
    p = jax.nn.softmax(scores, axis=-1)
    x = jnp.einsum('bhnm,bhmd->bhnd', p, v).transpose(0, 2, 1, 3).reshape(B, N, C)
    return x @ params["wo"] + params["bo"], p


def init_params(key, d_model, dtype=jnp.float32):
    """Deterministic synthetic parameters for the 4 Linear(d_model, d_model)."""
    ks = jax.random.split(key, 4)

    def lin(k, fan_in, fan_out):
        kw, kb = jax.random.split(k)
        w = jax.random.normal(kw, (fan_in, fan_out), dtype) / math.sqrt(fan_in)
        b = 0.01 * jax.random.normal(kb, (1, fan_out), dtype)
        return w, b

    p = {}
    p["wq"], p["bq"] = lin(ks[0], d_model, d_model)
    p["wk"], p["bk"] = lin(ks[1], d_model, d_model)
    p["wv"], p["bv"] = lin(ks[2], d_model, d_model)
    p["wo"], p["bo"] = lin(ks[3], d_model, d_model)
    return p


if __name__ == "__main__":
    # Small but lane-friendly shapes: batch=8, seq=16, d_model=128, heads=4.
    B, N, D_MODEL, H = 8, 16, 128, 4

    root = jax.random.PRNGKey(0)
    kq, kk, kv, km, kp = jax.random.split(root, 5)

    query = jax.random.normal(kq, (B, N, D_MODEL), jnp.float32)
    key_t = jax.random.normal(kk, (B, N, D_MODEL), jnp.float32)
    value = jax.random.normal(kv, (B, N, D_MODEL), jnp.float32)
    visible = jax.random.bernoulli(km, 0.8, (B, N, N))
    mask = jnp.where(visible, 0.0, -1e9).astype(jnp.float32)   # additive mask

    params = init_params(kp, D_MODEL)

    out, attn = masked_multi_head_attention(query, key_t, value, mask, params, H)
    jax.block_until_ready((out, attn))

    out_ref, attn_ref = reference_mha(query, key_t, value, mask, params, H)

    assert out.shape == (B, N, D_MODEL)
    assert attn.shape == (B, H, N, N)
    assert bool(jnp.allclose(out, out_ref, atol=3e-2, rtol=3e-2)), \
        ("out max err", float(jnp.max(jnp.abs(out - out_ref))))
    assert bool(jnp.allclose(attn, attn_ref, atol=3e-2, rtol=3e-2)), \
        ("attn max err", float(jnp.max(jnp.abs(attn - attn_ref))))
    print("KERNEL_OK")
</pallas_src>

<mosaic_0001>
module attributes {stable_mosaic.version = 11 : i64} {
  func.func @mha_kernel(%arg0: i32, %arg1: memref<128x128xbf16, #tpu.memory_space<vmem>>, %arg2: memref<128x128xbf16, #tpu.memory_space<vmem>>, %arg3: memref<128x128xbf16, #tpu.memory_space<vmem>>, %arg4: memref<8x16x16xf32, #tpu.memory_space<vmem>>, %arg5: memref<128x128xbf16, #tpu.memory_space<vmem>>, %arg6: memref<128x128xbf16, #tpu.memory_space<vmem>>, %arg7: memref<128x128xbf16, #tpu.memory_space<vmem>>, %arg8: memref<128x128xbf16, #tpu.memory_space<vmem>>, %arg9: memref<1x128xf32, #tpu.memory_space<vmem>>, %arg10: memref<1x128xf32, #tpu.memory_space<vmem>>, %arg11: memref<1x128xf32, #tpu.memory_space<vmem>>, %arg12: memref<1x128xf32, #tpu.memory_space<vmem>>, %arg13: memref<128x128xf32, #tpu.memory_space<vmem>>, %arg14: memref<8x4x16x16xf32, #tpu.memory_space<vmem>>) attributes {dimension_semantics = [#tpu.dimension_semantics<parallel>], iteration_bounds = array<i64: 1>, scalar_prefetch = 0 : i64, scratch_operands = 0 : i64, tpu.core_type = #tpu.core_type<tc>, window_params = [{transform_indices = @transform_0, window_bounds = array<i64: 128, 128>}, {transform_indices = @transform_1, window_bounds = array<i64: 128, 128>}, {transform_indices = @transform_2, window_bounds = array<i64: 128, 128>}, {transform_indices = @transform_3, window_bounds = array<i64: 8, 16, 16>}, {pipeline_mode = #tpu.pipeline_mode<synchronous>, transform_indices = @transform_4, window_bounds = array<i64: 128, 128>}, {pipeline_mode = #tpu.pipeline_mode<synchronous>, transform_indices = @transform_5, window_bounds = array<i64: 128, 128>}, {pipeline_mode = #tpu.pipeline_mode<synchronous>, transform_indices = @transform_6, window_bounds = array<i64: 128, 128>}, {pipeline_mode = #tpu.pipeline_mode<synchronous>, transform_indices = @transform_7, window_bounds = array<i64: 128, 128>}, {pipeline_mode = #tpu.pipeline_mode<synchronous>, transform_indices = @transform_8, window_bounds = array<i64: 1, 128>}, {pipeline_mode = #tpu.pipeline_mode<synchronous>, transform_indices = @transform_9, window_bounds = array<i64: 1, 128>}, {pipeline_mode = #tpu.pipeline_mode<synchronous>, transform_indices = @transform_10, window_bounds = array<i64: 1, 128>}, {pipeline_mode = #tpu.pipeline_mode<synchronous>, transform_indices = @transform_11, window_bounds = array<i64: 1, 128>}, {transform_indices = @transform_12, window_bounds = array<i64: 128, 128>}, {transform_indices = @transform_13, window_bounds = array<i64: 8, 4, 16, 16>}]} {
    %c0 = arith.constant 0 : index
    %c0_0 = arith.constant 0 : index
    %0 = vector.load %arg1[%c0, %c0_0] : memref<128x128xbf16, #tpu.memory_space<vmem>>, vector<128x128xbf16>
    %c0_1 = arith.constant 0 : index
    %c0_2 = arith.constant 0 : index
    %1 = vector.load %arg5[%c0_1, %c0_2] : memref<128x128xbf16, #tpu.memory_space<vmem>>, vector<128x128xbf16>
    %cst = arith.constant dense<0.000000e+00> : vector<128x128xf32>
    %2 = tpu.matmul %0, %1, %cst {dimension_numbers = #tpu.dot_dimension_numbers<[1], [0], [0], [1], [0, 0, 1, 1], [], []>} : vector<128x128xbf16>, vector<128x128xbf16>, vector<128x128xf32> -> vector<128x128xf32>
    %c0_3 = arith.constant 0 : index
    %c0_4 = arith.constant 0 : index
    %3 = vector.load %arg9[%c0_3, %c0_4] : memref<1x128xf32, #tpu.memory_space<vmem>>, vector<1x128xf32>
    %4 = vector.broadcast %3 : vector<1x128xf32> to vector<128x128xf32>
    %5 = arith.addf %2, %4 : vector<128x128xf32>
    %c0_5 = arith.constant 0 : index
    %c0_6 = arith.constant 0 : index
    %6 = vector.load %arg2[%c0_5, %c0_6] : memref<128x128xbf16, #tpu.memory_space<vmem>>, vector<128x128xbf16>
    %c0_7 = arith.constant 0 : index
    %c0_8 = arith.constant 0 : index
    %7 = vector.load %arg6[%c0_7, %c0_8] : memref<128x128xbf16, #tpu.memory_space<vmem>>, vector<128x128xbf16>
    %cst_9 = arith.constant dense<0.000000e+00> : vector<128x128xf32>
    %8 = tpu.matmul %6, %7, %cst_9 {dimension_numbers = #tpu.dot_dimension_numbers<[1], [0], [0], [1], [0, 0, 1, 1], [], []>} : vector<128x128xbf16>, vector<128x128xbf16>, vector<128x128xf32> -> vector<128x128xf32>
    %c0_10 = arith.constant 0 : index
    %c0_11 = arith.constant 0 : index
    %9 = vector.load %arg10[%c0_10, %c0_11] : memref<1x128xf32, #tpu.memory_space<vmem>>, vector<1x128xf32>
    %10 = vector.broadcast %9 : vector<1x128xf32> to vector<128x128xf32>
    %11 = arith.addf %8, %10 : vector<128x128xf32>
    %c0_12 = arith.constant 0 : index
    %c0_13 = arith.constant 0 : index
    %12 = vector.load %arg3[%c0_12, %c0_13] : memref<128x128xbf16, #tpu.memory_space<vmem>>, vector<128x128xbf16>
    %c0_14 = arith.constant 0 : index
    %c0_15 = arith.constant 0 : index
    %13 = vector.load %arg7[%c0_14, %c0_15] : memref<128x128xbf16, #tpu.memory_space<vmem>>, vector<128x128xbf16>
    %cst_16 = arith.constant dense<0.000000e+00> : vector<128x128xf32>
    %14 = tpu.matmul %12, %13, %cst_16 {dimension_numbers = #tpu.dot_dimension_numbers<[1], [0], [0], [1], [0, 0, 1, 1], [], []>} : vector<128x128xbf16>, vector<128x128xbf16>, vector<128x128xf32> -> vector<128x128xf32>
    %c0_17 = arith.constant 0 : index
    %c0_18 = arith.constant 0 : index
    %15 = vector.load %arg11[%c0_17, %c0_18] : memref<1x128xf32, #tpu.memory_space<vmem>>, vector<1x128xf32>
    %16 = vector.broadcast %15 : vector<1x128xf32> to vector<128x128xf32>
    %17 = arith.addf %14, %16 : vector<128x128xf32>
    %c0_19 = arith.constant 0 : index
    %c0_20 = arith.constant 0 : index
    %c0_21 = arith.constant 0 : index
    %18 = vector.load %arg4[%c0_19, %c0_20, %c0_21] : memref<8x16x16xf32, #tpu.memory_space<vmem>>, vector<8x16x16xf32>
    %cst_22 = arith.constant 0.000000e+00 : f32
    %19 = vector.broadcast %cst_22 : f32 to vector<128x128xf32>
    %20 = vector.extract_strided_slice %5 {offsets = [0, 0], sizes = [128, 32], strides = [1, 1]} : vector<128x128xf32> to vector<128x32xf32>
    %21 = vector.shape_cast %20 : vector<128x32xf32> to vector<8x16x32xf32>
    %22 = vector.extract_strided_slice %11 {offsets = [0, 0], sizes = [128, 32], strides = [1, 1]} : vector<128x128xf32> to vector<128x32xf32>
    %23 = vector.shape_cast %22 : vector<128x32xf32> to vector<8x16x32xf32>
    %24 = vector.extract_strided_slice %17 {offsets = [0, 0], sizes = [128, 32], strides = [1, 1]} : vector<128x128xf32> to vector<128x32xf32>
    %25 = vector.shape_cast %24 : vector<128x32xf32> to vector<8x16x32xf32>
    "tpu.trace_start"() <{level = 10 : i32, message = "gnd,gmd->gnm"}> : () -> ()
    %cst_23 = arith.constant dense<0.000000e+00> : vector<8x16x16xf32>
    %26 = tpu.matmul %21, %23, %cst_23 {dimension_numbers = #tpu.dot_dimension_numbers<[2], [2], [1], [1], [0, 0, 0, 1, 1, 1], [0], [0]>} : vector<8x16x32xf32>, vector<8x16x32xf32>, vector<8x16x16xf32> -> vector<8x16x16xf32>
    "tpu.trace_stop"() : () -> ()
    %cst_24 = arith.constant 0.176776692 : f32
    %27 = vector.broadcast %cst_24 : f32 to vector<8x16x16xf32>
    %28 = arith.mulf %26, %27 : vector<8x16x16xf32>
    %29 = arith.addf %28, %18 : vector<8x16x16xf32>
    %cst_25 = arith.constant dense<0xFF800000> : vector<8x16xf32>
    %30 = vector.multi_reduction <maximumf>, %29, %cst_25 [2] : vector<8x16x16xf32> to vector<8x16xf32>
    %31 = vector.shape_cast %30 : vector<8x16xf32> to vector<8x16x1xf32>
    %32 = vector.broadcast %31 : vector<8x16x1xf32> to vector<8x16x16xf32>
    %33 = arith.subf %29, %32 : vector<8x16x16xf32>
    %34 = math.exp %33 : vector<8x16x16xf32>
    %cst_26 = arith.constant dense<0.000000e+00> : vector<8x16xf32>
    %35 = vector.multi_reduction <add>, %34, %cst_26 [2] : vector<8x16x16xf32> to vector<8x16xf32>
    %36 = vector.shape_cast %35 : vector<8x16xf32> to vector<8x16x1xf32>
    %37 = vector.broadcast %36 : vector<8x16x1xf32> to vector<8x16x16xf32>
    %38 = arith.divf %34, %37 : vector<8x16x16xf32>
    %c0_27 = arith.constant 0 : index
    %c0_28 = arith.constant 0 : index
    %c0_29 = arith.constant 0 : index
    %c0_30 = arith.constant 0 : index
    %39 = vector.load %arg14[%c0_27, %c0_28, %c0_29, %c0_30] : memref<8x4x16x16xf32, #tpu.memory_space<vmem>>, vector<8x1x16x16xf32>
    %40 = vector.shape_cast %39 : vector<8x1x16x16xf32> to vector<8x16x16xf32>
    %41 = vector.shape_cast %38 : vector<8x16x16xf32> to vector<8x1x16x16xf32>
    tpu.vector_store %arg14[%c0_27, %c0_28, %c0_29, %c0_30], %41 {strides = array<i32>} : memref<8x4x16x16xf32, #tpu.memory_space<vmem>>, vector<8x1x16x16xf32>,
    "tpu.trace_start"() <{level = 10 : i32, message = "gnm,gmd->gnd"}> : () -> ()
    %cst_31 = arith.constant dense<0.000000e+00> : vector<8x16x32xf32>
    %42 = tpu.matmul %38, %25, %cst_31 {dimension_numbers = #tpu.dot_dimension_numbers<[2], [1], [1], [2], [0, 0, 0, 1, 1, 2], [0], [0]>} : vector<8x16x16xf32>, vector<8x16x32xf32>, vector<8x16x32xf32> -> vector<8x16x32xf32>
    "tpu.trace_stop"() : () -> ()
    %43 = vector.shape_cast %42 : vector<8x16x32xf32> to vector<128x32xf32>
    %44 = arith.truncf %43 : vector<128x32xf32> to vector<128x32xbf16>
    %c0_32 = arith.constant 0 : index
    %c0_33 = arith.constant 0 : index
    %45 = vector.load %arg8[%c0_32, %c0_33] : memref<128x128xbf16, #tpu.memory_space<vmem>>, vector<32x128xbf16>
    %cst_34 = arith.constant dense<0.000000e+00> : vector<128x128xf32>
    %46 = tpu.matmul %44, %45, %cst_34 {dimension_numbers = #tpu.dot_dimension_numbers<[1], [0], [0], [1], [0, 0, 1, 1], [], []>} : vector<128x32xbf16>, vector<32x128xbf16>, vector<128x128xf32> -> vector<128x128xf32>
    %47 = arith.addf %19, %46 : vector<128x128xf32>
    %48 = vector.extract_strided_slice %5 {offsets = [0, 32], sizes = [128, 32], strides = [1, 1]} : vector<128x128xf32> to vector<128x32xf32>
    %49 = vector.shape_cast %48 : vector<128x32xf32> to vector<8x16x32xf32>
    %50 = vector.extract_strided_slice %11 {offsets = [0, 32], sizes = [128, 32], strides = [1, 1]} : vector<128x128xf32> to vector<128x32xf32>
    %51 = vector.shape_cast %50 : vector<128x32xf32> to vector<8x16x32xf32>
    %52 = vector.extract_strided_slice %17 {offsets = [0, 32], sizes = [128, 32], strides = [1, 1]} : vector<128x128xf32> to vector<128x32xf32>
    %53 = vector.shape_cast %52 : vector<128x32xf32> to vector<8x16x32xf32>
    "tpu.trace_start"() <{level = 10 : i32, message = "gnd,gmd->gnm"}> : () -> ()
    %cst_35 = arith.constant dense<0.000000e+00> : vector<8x16x16xf32>
    %54 = tpu.matmul %49, %51, %cst_35 {dimension_numbers = #tpu.dot_dimension_numbers<[2], [2], [1], [1], [0, 0, 0, 1, 1, 1], [0], [0]>} : vector<8x16x32xf32>, vector<8x16x32xf32>, vector<8x16x16xf32> -> vector<8x16x16xf32>
    "tpu.trace_stop"() : () -> ()
    %cst_36 = arith.constant 0.176776692 : f32
    %55 = vector.broadcast %cst_36 : f32 to vector<8x16x16xf32>
    %56 = arith.mulf %54, %55 : vector<8x16x16xf32>
    %57 = arith.addf %56, %18 : vector<8x16x16xf32>
    %cst_37 = arith.constant dense<0xFF800000> : vector<8x16xf32>
    %58 = vector.multi_reduction <maximumf>, %57, %cst_37 [2] : vector<8x16x16xf32> to vector<8x16xf32>
    %59 = vector.shape_cast %58 : vector<8x16xf32> to vector<8x16x1xf32>
    %60 = vector.broadcast %59 : vector<8x16x1xf32> to vector<8x16x16xf32>
    %61 = arith.subf %57, %60 : vector<8x16x16xf32>
    %62 = math.exp %61 : vector<8x16x16xf32>
    %cst_38 = arith.constant dense<0.000000e+00> : vector<8x16xf32>
    %63 = vector.multi_reduction <add>, %62, %cst_38 [2] : vector<8x16x16xf32> to vector<8x16xf32>
    %64 = vector.shape_cast %63 : vector<8x16xf32> to vector<8x16x1xf32>
    %65 = vector.broadcast %64 : vector<8x16x1xf32> to vector<8x16x16xf32>
    %66 = arith.divf %62, %65 : vector<8x16x16xf32>
    %c0_39 = arith.constant 0 : index
    %c1 = arith.constant 1 : index
    %c0_40 = arith.constant 0 : index
    %c0_41 = arith.constant 0 : index
    %67 = vector.load %arg14[%c0_39, %c1, %c0_40, %c0_41] : memref<8x4x16x16xf32, #tpu.memory_space<vmem>>, vector<8x1x16x16xf32>
    %68 = vector.shape_cast %67 : vector<8x1x16x16xf32> to vector<8x16x16xf32>
    %69 = vector.shape_cast %66 : vector<8x16x16xf32> to vector<8x1x16x16xf32>
    tpu.vector_store %arg14[%c0_39, %c1, %c0_40, %c0_41], %69 {strides = array<i32>} : memref<8x4x16x16xf32, #tpu.memory_space<vmem>>, vector<8x1x16x16xf32>,
    "tpu.trace_start"() <{level = 10 : i32, message = "gnm,gmd->gnd"}> : () -> ()
    %cst_42 = arith.constant dense<0.000000e+00> : vector<8x16x32xf32>
    %70 = tpu.matmul %66, %53, %cst_42 {dimension_numbers = #tpu.dot_dimension_numbers<[2], [1], [1], [2], [0, 0, 0, 1, 1, 2], [0], [0]>} : vector<8x16x16xf32>, vector<8x16x32xf32>, vector<8x16x32xf32> -> vector<8x16x32xf32>
    "tpu.trace_stop"() : () -> ()
    %71 = vector.shape_cast %70 : vector<8x16x32xf32> to vector<128x32xf32>
    %72 = arith.truncf %71 : vector<128x32xf32> to vector<128x32xbf16>
    %c32 = arith.constant 32 : index
    %c0_43 = arith.constant 0 : index
    %73 = vector.load %arg8[%c32, %c0_43] : memref<128x128xbf16, #tpu.memory_space<vmem>>, vector<32x128xbf16>
    %cst_44 = arith.constant dense<0.000000e+00> : vector<128x128xf32>
    %74 = tpu.matmul %72, %73, %cst_44 {dimension_numbers = #tpu.dot_dimension_numbers<[1], [0], [0], [1], [0, 0, 1, 1], [], []>} : vector<128x32xbf16>, vector<32x128xbf16>, vector<128x128xf32> -> vector<128x128xf32>
    %75 = arith.addf %47, %74 : vector<128x128xf32>
    %76 = vector.extract_strided_slice %5 {offsets = [0, 64], sizes = [128, 32], strides = [1, 1]} : vector<128x128xf32> to vector<128x32xf32>
    %77 = vector.shape_cast %76 : vector<128x32xf32> to vector<8x16x32xf32>
    %78 = vector.extract_strided_slice %11 {offsets = [0, 64], sizes = [128, 32], strides = [1, 1]} : vector<128x128xf32> to vector<128x32xf32>
    %79 = vector.shape_cast %78 : vector<128x32xf32> to vector<8x16x32xf32>
    %80 = vector.extract_strided_slice %17 {offsets = [0, 64], sizes = [128, 32], strides = [1, 1]} : vector<128x128xf32> to vector<128x32xf32>
    %81 = vector.shape_cast %80 : vector<128x32xf32> to vector<8x16x32xf32>
    "tpu.trace_start"() <{level = 10 : i32, message = "gnd,gmd->gnm"}> : () -> ()
    %cst_45 = arith.constant dense<0.000000e+00> : vector<8x16x16xf32>
    %82 = tpu.matmul %77, %79, %cst_45 {dimension_numbers = #tpu.dot_dimension_numbers<[2], [2], [1], [1], [0, 0, 0, 1, 1, 1], [0], [0]>} : vector<8x16x32xf32>, vector<8x16x32xf32>, vector<8x16x16xf32> -> vector<8x16x16xf32>
    "tpu.trace_stop"() : () -> ()
    %cst_46 = arith.constant 0.176776692 : f32
    %83 = vector.broadcast %cst_46 : f32 to vector<8x16x16xf32>
    %84 = arith.mulf %82, %83 : vector<8x16x16xf32>
    %85 = arith.addf %84, %18 : vector<8x16x16xf32>
    %cst_47 = arith.constant dense<0xFF800000> : vector<8x16xf32>
    %86 = vector.multi_reduction <maximumf>, %85, %cst_47 [2] : vector<8x16x16xf32> to vector<8x16xf32>
    %87 = vector.shape_cast %86 : vector<8x16xf32> to vector<8x16x1xf32>
    %88 = vector.broadcast %87 : vector<8x16x1xf32> to vector<8x16x16xf32>
    %89 = arith.subf %85, %88 : vector<8x16x16xf32>
    %90 = math.exp %89 : vector<8x16x16xf32>
    %cst_48 = arith.constant dense<0.000000e+00> : vector<8x16xf32>
    %91 = vector.multi_reduction <add>, %90, %cst_48 [2] : vector<8x16x16xf32> to vector<8x16xf32>
    %92 = vector.shape_cast %91 : vector<8x16xf32> to vector<8x16x1xf32>
    %93 = vector.broadcast %92 : vector<8x16x1xf32> to vector<8x16x16xf32>
    %94 = arith.divf %90, %93 : vector<8x16x16xf32>
    %c0_49 = arith.constant 0 : index
    %c2 = arith.constant 2 : index
    %c0_50 = arith.constant 0 : index
    %c0_51 = arith.constant 0 : index
    %95 = vector.load %arg14[%c0_49, %c2, %c0_50, %c0_51] : memref<8x4x16x16xf32, #tpu.memory_space<vmem>>, vector<8x1x16x16xf32>
    %96 = vector.shape_cast %95 : vector<8x1x16x16xf32> to vector<8x16x16xf32>
    %97 = vector.shape_cast %94 : vector<8x16x16xf32> to vector<8x1x16x16xf32>
    tpu.vector_store %arg14[%c0_49, %c2, %c0_50, %c0_51], %97 {strides = array<i32>} : memref<8x4x16x16xf32, #tpu.memory_space<vmem>>, vector<8x1x16x16xf32>,
    "tpu.trace_start"() <{level = 10 : i32, message = "gnm,gmd->gnd"}> : () -> ()
    %cst_52 = arith.constant dense<0.000000e+00> : vector<8x16x32xf32>
    %98 = tpu.matmul %94, %81, %cst_52 {dimension_numbers = #tpu.dot_dimension_numbers<[2], [1], [1], [2], [0, 0, 0, 1, 1, 2], [0], [0]>} : vector<8x16x16xf32>, vector<8x16x32xf32>, vector<8x16x32xf32> -> vector<8x16x32xf32>
    "tpu.trace_stop"() : () -> ()
    %99 = vector.shape_cast %98 : vector<8x16x32xf32> to vector<128x32xf32>
    %100 = arith.truncf %99 : vector<128x32xf32> to vector<128x32xbf16>
    %c64 = arith.constant 64 : index
    %c0_53 = arith.constant 0 : index
    %101 = vector.load %arg8[%c64, %c0_53] : memref<128x128xbf16, #tpu.memory_space<vmem>>, vector<32x128xbf16>
    %cst_54 = arith.constant dense<0.000000e+00> : vector<128x128xf32>
    %102 = tpu.matmul %100, %101, %cst_54 {dimension_numbers = #tpu.dot_dimension_numbers<[1], [0], [0], [1], [0, 0, 1, 1], [], []>} : vector<128x32xbf16>, vector<32x128xbf16>, vector<128x128xf32> -> vector<128x128xf32>
    %103 = arith.addf %75, %102 : vector<128x128xf32>
    %104 = vector.extract_strided_slice %5 {offsets = [0, 96], sizes = [128, 32], strides = [1, 1]} : vector<128x128xf32> to vector<128x32xf32>
    %105 = vector.shape_cast %104 : vector<128x32xf32> to vector<8x16x32xf32>
    %106 = vector.extract_strided_slice %11 {offsets = [0, 96], sizes = [128, 32], strides = [1, 1]} : vector<128x128xf32> to vector<128x32xf32>
    %107 = vector.shape_cast %106 : vector<128x32xf32> to vector<8x16x32xf32>
    %108 = vector.extract_strided_slice %17 {offsets = [0, 96], sizes = [128, 32], strides = [1, 1]} : vector<128x128xf32> to vector<128x32xf32>
    %109 = vector.shape_cast %108 : vector<128x32xf32> to vector<8x16x32xf32>
    "tpu.trace_start"() <{level = 10 : i32, message = "gnd,gmd->gnm"}> : () -> ()
    %cst_55 = arith.constant dense<0.000000e+00> : vector<8x16x16xf32>
    %110 = tpu.matmul %105, %107, %cst_55 {dimension_numbers = #tpu.dot_dimension_numbers<[2], [2], [1], [1], [0, 0, 0, 1, 1, 1], [0], [0]>} : vector<8x16x32xf32>, vector<8x16x32xf32>, vector<8x16x16xf32> -> vector<8x16x16xf32>
    "tpu.trace_stop"() : () -> ()
    %cst_56 = arith.constant 0.176776692 : f32
    %111 = vector.broadcast %cst_56 : f32 to vector<8x16x16xf32>
    %112 = arith.mulf %110, %111 : vector<8x16x16xf32>
    %113 = arith.addf %112, %18 : vector<8x16x16xf32>
    %cst_57 = arith.constant dense<0xFF800000> : vector<8x16xf32>
    %114 = vector.multi_reduction <maximumf>, %113, %cst_57 [2] : vector<8x16x16xf32> to vector<8x16xf32>
    %115 = vector.shape_cast %114 : vector<8x16xf32> to vector<8x16x1xf32>
    %116 = vector.broadcast %115 : vector<8x16x1xf32> to vector<8x16x16xf32>
    %117 = arith.subf %113, %116 : vector<8x16x16xf32>
    %118 = math.exp %117 : vector<8x16x16xf32>
    %cst_58 = arith.constant dense<0.000000e+00> : vector<8x16xf32>
    %119 = vector.multi_reduction <add>, %118, %cst_58 [2] : vector<8x16x16xf32> to vector<8x16xf32>
    %120 = vector.shape_cast %119 : vector<8x16xf32> to vector<8x16x1xf32>
    %121 = vector.broadcast %120 : vector<8x16x1xf32> to vector<8x16x16xf32>
    %122 = arith.divf %118, %121 : vector<8x16x16xf32>
    %c0_59 = arith.constant 0 : index
    %c3 = arith.constant 3 : index
    %c0_60 = arith.constant 0 : index
    %c0_61 = arith.constant 0 : index
    %123 = vector.load %arg14[%c0_59, %c3, %c0_60, %c0_61] : memref<8x4x16x16xf32, #tpu.memory_space<vmem>>, vector<8x1x16x16xf32>
    %124 = vector.shape_cast %123 : vector<8x1x16x16xf32> to vector<8x16x16xf32>
    %125 = vector.shape_cast %122 : vector<8x16x16xf32> to vector<8x1x16x16xf32>
    tpu.vector_store %arg14[%c0_59, %c3, %c0_60, %c0_61], %125 {strides = array<i32>} : memref<8x4x16x16xf32, #tpu.memory_space<vmem>>, vector<8x1x16x16xf32>,
    "tpu.trace_start"() <{level = 10 : i32, message = "gnm,gmd->gnd"}> : () -> ()
    %cst_62 = arith.constant dense<0.000000e+00> : vector<8x16x32xf32>
    %126 = tpu.matmul %122, %109, %cst_62 {dimension_numbers = #tpu.dot_dimension_numbers<[2], [1], [1], [2], [0, 0, 0, 1, 1, 2], [0], [0]>} : vector<8x16x16xf32>, vector<8x16x32xf32>, vector<8x16x32xf32> -> vector<8x16x32xf32>
    "tpu.trace_stop"() : () -> ()
    %127 = vector.shape_cast %126 : vector<8x16x32xf32> to vector<128x32xf32>
    %128 = arith.truncf %127 : vector<128x32xf32> to vector<128x32xbf16>
    %c96 = arith.constant 96 : index
    %c0_63 = arith.constant 0 : index
    %129 = vector.load %arg8[%c96, %c0_63] : memref<128x128xbf16, #tpu.memory_space<vmem>>, vector<32x128xbf16>
    %cst_64 = arith.constant dense<0.000000e+00> : vector<128x128xf32>
    %130 = tpu.matmul %128, %129, %cst_64 {dimension_numbers = #tpu.dot_dimension_numbers<[1], [0], [0], [1], [0, 0, 1, 1], [], []>} : vector<128x32xbf16>, vector<32x128xbf16>, vector<128x128xf32> -> vector<128x128xf32>
    %131 = arith.addf %103, %130 : vector<128x128xf32>
    %c0_65 = arith.constant 0 : index
    %c0_66 = arith.constant 0 : index
    %132 = vector.load %arg12[%c0_65, %c0_66] : memref<1x128xf32, #tpu.memory_space<vmem>>, vector<1x128xf32>
    %133 = vector.broadcast %132 : vector<1x128xf32> to vector<128x128xf32>
    %134 = arith.addf %131, %133 : vector<128x128xf32>
    %c0_67 = arith.constant 0 : index
    %c0_68 = arith.constant 0 : index
    %135 = vector.load %arg13[%c0_67, %c0_68] : memref<128x128xf32, #tpu.memory_space<vmem>>, vector<128x128xf32>
    tpu.vector_store %arg13[%c0_67, %c0_68], %134 {strides = array<i32>} : memref<128x128xf32, #tpu.memory_space<vmem>>, vector<128x128xf32>,
    return
  }
  func.func @transform_0(%arg0: i32) -> (i32, i32) {
    %c0_i32 = arith.constant 0 : i32
    %c0_i32_0 = arith.constant 0 : i32
    return %arg0, %c0_i32 : i32, i32
  }
  func.func @transform_1(%arg0: i32) -> (i32, i32) {
    %c0_i32 = arith.constant 0 : i32
    %c0_i32_0 = arith.constant 0 : i32
    return %arg0, %c0_i32 : i32, i32
  }
  func.func @transform_2(%arg0: i32) -> (i32, i32) {
    %c0_i32 = arith.constant 0 : i32
    %c0_i32_0 = arith.constant 0 : i32
    return %arg0, %c0_i32 : i32, i32
  }
  func.func @transform_3(%arg0: i32) -> (i32, i32, i32) {
    %c0_i32 = arith.constant 0 : i32
    %c0_i32_0 = arith.constant 0 : i32
    %c0_i32_1 = arith.constant 0 : i32
    return %arg0, %c0_i32, %c0_i32_0 : i32, i32, i32
  }
  func.func @transform_4(%arg0: i32) -> (i32, i32) {
    %c0_i32 = arith.constant 0 : i32
    %c0_i32_0 = arith.constant 0 : i32
    %c0_i32_1 = arith.constant 0 : i32
    return %c0_i32, %c0_i32_0 : i32, i32
  }
  func.func @transform_5(%arg0: i32) -> (i32, i32) {
    %c0_i32 = arith.constant 0 : i32
    %c0_i32_0 = arith.constant 0 : i32
    %c0_i32_1 = arith.constant 0 : i32
    return %c0_i32, %c0_i32_0 : i32, i32
  }
  func.func @transform_6(%arg0: i32) -> (i32, i32) {
    %c0_i32 = arith.constant 0 : i32
    %c0_i32_0 = arith.constant 0 : i32
    %c0_i32_1 = arith.constant 0 : i32
    return %c0_i32, %c0_i32_0 : i32, i32
  }
  func.func @transform_7(%arg0: i32) -> (i32, i32) {
    %c0_i32 = arith.constant 0 : i32
    %c0_i32_0 = arith.constant 0 : i32
    %c0_i32_1 = arith.constant 0 : i32
    return %c0_i32, %c0_i32_0 : i32, i32
  }
  func.func @transform_8(%arg0: i32) -> (i32, i32) {
    %c0_i32 = arith.constant 0 : i32
    %c0_i32_0 = arith.constant 0 : i32
    %c0_i32_1 = arith.constant 0 : i32
    return %c0_i32, %c0_i32_0 : i32, i32
  }
  func.func @transform_9(%arg0: i32) -> (i32, i32) {
    %c0_i32 = arith.constant 0 : i32
    %c0_i32_0 = arith.constant 0 : i32
    %c0_i32_1 = arith.constant 0 : i32
    return %c0_i32, %c0_i32_0 : i32, i32
  }
  func.func @transform_10(%arg0: i32) -> (i32, i32) {
    %c0_i32 = arith.constant 0 : i32
    %c0_i32_0 = arith.constant 0 : i32
    %c0_i32_1 = arith.constant 0 : i32
    return %c0_i32, %c0_i32_0 : i32, i32
  }
  func.func @transform_11(%arg0: i32) -> (i32, i32) {
    %c0_i32 = arith.constant 0 : i32
    %c0_i32_0 = arith.constant 0 : i32
    %c0_i32_1 = arith.constant 0 : i32
    return %c0_i32, %c0_i32_0 : i32, i32
  }
  func.func @transform_12(%arg0: i32) -> (i32, i32) {
    %c0_i32 = arith.constant 0 : i32
    %c0_i32_0 = arith.constant 0 : i32
    return %arg0, %c0_i32 : i32, i32
  }
  func.func @transform_13(%arg0: i32) -> (i32, i32, i32, i32) {
    %c0_i32 = arith.constant 0 : i32
    %c0_i32_0 = arith.constant 0 : i32
    %c0_i32_1 = arith.constant 0 : i32
    %c0_i32_2 = arith.constant 0 : i32
    return %arg0, %c0_i32, %c0_i32_0, %c0_i32_1 : i32, i32, i32, i32
  }
}

</mosaic_0001>

<bundles_post_ra>
// kernel: tpu_custom_call.1
= control target key start
LH: loop header
LB: loop body
LE: loop exit
PB: predicated region body
PF: predicated region fallthrough
CT: control target
= control target key end

     0   :  { %19 = vsyncpa [#allocation3], 0  ;;  %s12139_s0 = inlined_call_operand.hbm [shape: bf16[128,128], index: 0, kind: input, shape index: {}]   ;;  %s12140_s1 = inlined_call_operand.hbm [shape: bf16[128,128], index: 1, kind: input, shape index: {}]   ;;  %s12141_s2 = inlined_call_operand.hbm [shape: bf16[128,128], index: 2, kind: input, shape index: {}]   ;;  %s12142_s3 = inlined_call_operand.hbm [shape: f32[8,16,16], index: 3, kind: input, shape index: {}]   ;;  %s12143_s4 = inlined_call_operand.hbm [shape: bf16[128,128], index: 4, kind: input, shape index: {}]   ;;  %s12144_s5 = inlined_call_operand.hbm [shape: bf16[128,128], index: 5, kind: input, shape index: {}]   ;;  %s12145_s6 = inlined_call_operand.hbm [shape: bf16[128,128], index: 6, kind: input, shape index: {}]   ;;  %s12146_s7 = inlined_call_operand.hbm [shape: bf16[128,128], index: 7, kind: input, shape index: {}]   ;;  %s12147_s8 = inlined_call_operand.vmem [shape: f32[1,128], index: 8, kind: input, shape index: {}]   ;;  %s12148_s9 = inlined_call_operand.vmem [shape: f32[1,128], index: 9, kind: input, shape index: {}]   ;;  %s12149_s10 = inlined_call_operand.vmem [shape: f32[1,128], index: 10, kind: input, shape index: {}]   ;;  %s12150_s11 = inlined_call_operand.vmem [shape: f32[1,128], index: 11, kind: input, shape index: {}]   ;;  %s12151_s12 = inlined_call_operand.hbm [shape: f32[128,128], index: 12, kind: output, shape index: {0}]   ;;  %s12152_s13 = inlined_call_operand.hbm [shape: f32[8,4,16,16], index: 13, kind: output, shape index: {1}]  }
   0x1   :  { %20 = vsyncpa [#allocation6], 0 }
   0x2   :  { %21 = vsyncpa [#allocation9], 0 }
   0x3   :  { %22 = vsyncpa [#allocation12], 0 }
   0x4   :  { %23 = vsyncpa [#allocation15], 0 }
   0x5   :  { %24 = vsyncpa [#allocation4], 0 }
   0x6   :  { %25 = vsyncpa [#allocation18], 0  ;;  %s9924_s25 = smov [#allocation5]   ;;  %s9925_s27 = smov [#allocation8]  }
   0x7   :  { %s43_s26 = sshll.u32 %s9924_s25, 4  ;;  %s67_s28 = sshll.u32 %s9925_s27, 4  ;;  %s44_s26 = int_to_ptr.vmem [resolvable:$true] %s43_s26  ;;  %s68_s28 = int_to_ptr.vmem [resolvable:$true] %s67_s28 }
   0x8   :  { %s9718_s29 = scalar_lea.vmem %s44_s26, 1024  ;;  %p9723_p1 = scmp.lt.s32.totalorder %s44_s26, %s44_s26 }
   0x9   :  { %p9719_p0 = scmp.ne.s32.totalorder %s44_s26, %s9718_s29  ;;  %p9724_p2 = scmp.lt.s32.totalorder %s9718_s29, %s9718_s29 }
   0xb   :  { %p9725_p3 = por %p9724_p2, %p9723_p1 }
   0xd   :  { %p9726_p4 = pnand %p9725_p3, %p9719_p0 }
   0xf   :  { %9729 = shalt.err (!%p9726_p4)
}
  0x10   :  { %s9926_s30 = smov 64   ;;  %s9927_s14 = smov 4  }
  0x11   :  { %49 = dma.hbm_to_vmem [thread:$0]  %s12140_s1, 1024, %s44_s26, [#allocation6], %s9926_s30, %s9926_s30, %s9927_s14  }
  0x12   :  { %s9738_s17 = scalar_lea.vmem %s68_s28, 2048  ;;  %p9743_p6 = scmp.lt.s32.totalorder %s68_s28, %s68_s28 }
  0x13   :  { %p9739_p5 = scmp.ne.s32.totalorder %s68_s28, %s9738_s17  ;;  %p9744_p7 = scmp.lt.s32.totalorder %s9738_s17, %s9738_s17 }
  0x15   :  { %p9745_p8 = por %p9744_p7, %p9743_p6 }
  0x17   :  { %p9746_p9 = pnand %p9745_p8, %p9739_p5 }
  0x19   :  { %9749 = shalt.err (!%p9746_p9)
}
  0x1a   :  { %s9928_s18 = smov 128   ;;  %s9929_s19 = smov 8  }
  0x1b   :  { %73 = dma.hbm_to_vmem [thread:$0]  %s12142_s3, 2048, %s68_s28, [#allocation9], %s9928_s18, %s9928_s18, %s9929_s19  }
  0x1c   :  { %s9930_s22 = smov [#allocation11]   ;;  %s9931_s24 = smov [#allocation2]  }
  0x1d   :  { %s91_s23 = sshll.u32 %s9930_s22, 4  ;;  %s31_s1 = sshll.u32 %s9931_s24, 4  ;;  %s92_s23 = int_to_ptr.vmem [resolvable:$true] %s91_s23  ;;  %s32_s1 = int_to_ptr.vmem [resolvable:$true] %s31_s1 }
  0x1e   :  { %s9758_s25 = scalar_lea.vmem %s92_s23, 1024  ;;  %p9763_p11 = scmp.lt.s32.totalorder %s92_s23, %s92_s23 }
  0x1f   :  { %p9759_p10 = scmp.ne.s32.totalorder %s92_s23, %s9758_s25  ;;  %p9764_p12 = scmp.lt.s32.totalorder %s9758_s25, %s9758_s25 }
  0x21   :  { %p9765_p13 = por %p9764_p12, %p9763_p11 }
  0x23   :  { %p9766_p0 = pnand %p9765_p13, %p9759_p10 }
  0x25   :  { %9769 = shalt.err (!%p9766_p0)
}
  0x26   :  { %97 = dma.hbm_to_vmem [thread:$0]  %s12144_s5, 1024, %s92_s23, [#allocation12], %s9926_s30, %s9926_s30, %s9927_s14  }
  0x27   :  { %s9778_s3 = scalar_lea.vmem %s32_s1, 1024  ;;  %p9783_p2 = scmp.lt.s32.totalorder %s32_s1, %s32_s1 }
  0x28   :  { %p9779_p1 = scmp.ne.s32.totalorder %s32_s1, %s9778_s3  ;;  %p9784_p3 = scmp.lt.s32.totalorder %s9778_s3, %s9778_s3 }
  0x2a   :  { %p9785_p4 = por %p9784_p3, %p9783_p2 }
  0x2c   :  { %p9786_p5 = pnand %p9785_p4, %p9779_p1 }
  0x2e   :  { %9789 = shalt.err (!%p9786_p5)
}
  0x2f   :  { %37 = dma.hbm_to_vmem [thread:$0]  %s12139_s0, 1024, %s32_s1, [#allocation3], %s9926_s30, %s9926_s30, %s9927_s14  }
  0x30   :  { %s9932_s15 = smov [#allocation7]   ;;  %s9933_s17 = smov [#allocation10]  }
  0x31   :  { %s55_s16 = sshll.u32 %s9932_s15, 4  ;;  %s79_s20 = sshll.u32 %s9933_s17, 4  ;;  %s56_s16 = int_to_ptr.vmem [resolvable:$true] %s55_s16  ;;  %s80_s20 = int_to_ptr.vmem [resolvable:$true] %s79_s20 }
  0x32   :  { %s9798_s5 = scalar_lea.vmem %s56_s16, 1024  ;;  %p9803_p7 = scmp.lt.s32.totalorder %s56_s16, %s56_s16 }
  0x33   :  { %p9799_p6 = scmp.ne.s32.totalorder %s56_s16, %s9798_s5  ;;  %p9804_p8 = scmp.lt.s32.totalorder %s9798_s5, %s9798_s5 }
  0x35   :  { %p9805_p9 = por %p9804_p8, %p9803_p7 }
  0x37   :  { %p9806_p10 = pnand %p9805_p9, %p9799_p6 }
  0x39   :  { %9809 = shalt.err (!%p9806_p10)
}
  0x3a   :  { %61 = dma.hbm_to_vmem [thread:$0]  %s12141_s2, 1024, %s56_s16, [#allocation6], %s9926_s30, %s9926_s30, %s9927_s14  }
  0x3b   :  { %s9818_s0 = scalar_lea.vmem %s80_s20, 1024  ;;  %p9823_p12 = scmp.lt.s32.totalorder %s80_s20, %s80_s20 }
  0x3c   :  { %p9819_p11 = scmp.ne.s32.totalorder %s80_s20, %s9818_s0  ;;  %p9824_p13 = scmp.lt.s32.totalorder %s9818_s0, %s9818_s0 }
  0x3e   :  { %p9825_p0 = por %p9824_p13, %p9823_p12 }
  0x40   :  { %p9826_p1 = pnand %p9825_p0, %p9819_p11 }
  0x42   :  { %9829 = shalt.err (!%p9826_p1)
}
  0x43   :  { %85 = dma.hbm_to_vmem [thread:$0]  %s12143_s4, 1024, %s80_s20, [#allocation9], %s9926_s30, %s9926_s30, %s9927_s14  }
  0x44   :  { %s9934_s1 = smov [#allocation13]   ;;  %s9935_s26 = smov [#allocation14]  }
  0x45   :  { %s103_s25 = sshll.u32 %s9934_s1, 4  ;;  %s115_s27 = sshll.u32 %s9935_s26, 4  ;;  %s104_s25 = int_to_ptr.vmem [resolvable:$true] %s103_s25  ;;  %s116_s27 = int_to_ptr.vmem [resolvable:$true] %s115_s27 }
  0x46   :  { %s9838_s2 = scalar_lea.vmem %s104_s25, 1024  ;;  %p9843_p3 = scmp.lt.s32.totalorder %s104_s25, %s104_s25 }
  0x47   :  { %p9839_p2 = scmp.ne.s32.totalorder %s104_s25, %s9838_s2  ;;  %p9844_p4 = scmp.lt.s32.totalorder %s9838_s2, %s9838_s2 }
  0x49   :  { %p9845_p5 = por %p9844_p4, %p9843_p3 }
  0x4b   :  { %p9846_p6 = pnand %p9845_p5, %p9839_p2 }
  0x4d   :  { %9849 = shalt.err (!%p9846_p6)
}
  0x4e   :  { %109 = dma.hbm_to_vmem [thread:$0]  %s12145_s6, 1024, %s104_s25, [#allocation12], %s9926_s30, %s9926_s30, %s9927_s14  }
  0x4f   :  { %s9858_s4 = scalar_lea.vmem %s116_s27, 1024  ;;  %p9863_p8 = scmp.lt.s32.totalorder %s116_s27, %s116_s27 }
  0x50   :  { %p9859_p7 = scmp.ne.s32.totalorder %s116_s27, %s9858_s4  ;;  %p9864_p9 = scmp.lt.s32.totalorder %s9858_s4, %s9858_s4 }
  0x52   :  { %p9865_p10 = por %p9864_p9, %p9863_p8 }
  0x54   :  { %p9866_p11 = pnand %p9865_p10, %p9859_p7 }
  0x56   :  { %9869 = shalt.err (!%p9866_p11)
}
  0x57   :  { %121 = dma.hbm_to_vmem [thread:$0]  %s12146_s7, 1024, %s116_s27, [#allocation15], %s9926_s30, %s9926_s30, %s9927_s14  }
  0x58   :  { %9910 = dma.done.wait [#allocation3], 1024  }
  0x59   :  { %9911 = vsyncadd [#allocation3], 4294966272 }
  0x5a   :  { %9912 = dma.done.wait [#allocation6], 2048  }
  0x5b   :  { %9913 = vsyncadd [#allocation6], 4294965248 }
  0x5c   :  { %9914 = dma.done.wait [#allocation9], 3072  }
  0x5d   :  { %9915 = vsyncadd [#allocation9], 4294964224 }
  0x5e   :  { %9916 = dma.done.wait [#allocation12], 2048  }
  0x5f   :  { %9917 = vsyncadd [#allocation12], 4294965248 }
  0x60   :  { %9918 = dma.done.wait [#allocation15], 1024  }
  0x61   :  { %9919 = vsyncadd [#allocation15], 4294966272  ;;  %v9372_v0 = vld [vmem:[#allocation10 + $0x38] sm:$0xff]   ;;  %v9374_v2 = vld [vmem:[#allocation10 + $0x30] sm:$0xff]   ;;  %s9936_s17 = smov 96   ;;  %vm867_vm0 = vcmask 261120  }
  0x62   :  { %v9373_v1 = vld [vmem:[#allocation11 + $0x38] sm:$0xff]   ;;  %8716 = vmatprep.subr.bf16.mxu0 %v9372_v0  ;;  %v9375_v3 = vld [vmem:[#allocation11 + $0x30] sm:$0xff]   ;;  %v9376_v4 = vld [vmem:[#allocation10 + $0x28] sm:$0xff]   ;;  %vm1596_vm1 = vcmask 130048  }
  0x63   :  { %8748 = vmatprep.subr.bf16.mxu1 %v9373_v1  ;;  %8717 = vmatpush3.bf16.msra.mxu0 %v9372_v0  ;;  %v9377_v5 = vld [vmem:[#allocation11 + $0x28] sm:$0xff]   ;;  %v9378_v6 = vld [vmem:[#allocation10 + $0x20] sm:$0xff]   ;;  %v9380_v8 = vld [vmem:[#allocation10 + $0x18] sm:$0xff]  }
  0x64   :  { %8749 = vmatpush3.bf16.msra.mxu1 %v9373_v1  ;;  %8718 = vmatprep.subr.bf16.mxu0 %v9374_v2  ;;  %v9379_v7 = vld [vmem:[#allocation11 + $0x20] sm:$0xff]   ;;  %v9381_v9 = vld [vmem:[#allocation11 + $0x18] sm:$0xff]   ;;  %v9382_v10 = vld [vmem:[#allocation10 + $0x10] sm:$0xff]  }
  0x65   :  { %8750 = vmatprep.subr.bf16.mxu1 %v9375_v3  ;;  %v9383_v11 = vld [vmem:[#allocation11 + $0x10] sm:$0xff]   ;;  %v9388_v12 = vld [vmem:[#allocation2] sm:$0xff]   ;;  %v9384_v14 = vld [vmem:[#allocation10 + $0x8] sm:$0xff]  }
  0x66   :  { %v9389_v13 = vld [vmem:[#allocation5] sm:$0xff]   ;;  %8732 = vmatprep.mubr.bf16.mxu0 %v9388_v12  ;;  %v9385_v15 = vld [vmem:[#allocation11 + $0x8] sm:$0xff]   ;;  %v9392_v20 = vld [vmem:[#allocation5 + $0x10] sm:$0xff]  }
  0x67   :  { %8719 = vmatpush3.bf16.msra.mxu0 %v9374_v2  ;;  %8764 = vmatprep.mubr.bf16.mxu1 %v9389_v13  ;;  %v9386_v16 = vld [vmem:[#allocation10] sm:$0xff]   ;;  %v9390_v18 = vld [vmem:[#allocation2 + $0x8] sm:$0xff]   ;;  %v9395_v21 = vld [vmem:[#allocation2 + $0x10] sm:$0xff]  }
  0x68   :  { %8751 = vmatpush3.bf16.msra.mxu1 %v9375_v3  ;;  %8720 = vmatprep.subr.bf16.mxu0 %v9376_v4  ;;  %v9387_v17 = vld [vmem:[#allocation11] sm:$0xff]   ;;  %v9391_v19 = vld [vmem:[#allocation5 + $0x8] sm:$0xff]   ;;  %v9404_v22 = vld [vmem:[#allocation13 + $0x38] sm:$0xff]  }
  0x69   :  { %8752 = vmatprep.subr.bf16.mxu1 %v9377_v5  ;;  %v9405_v23 = vld [vmem:[#allocation13 + $0x30] sm:$0xff]   ;;  %v9397_v24 = vld [vmem:[#allocation2 + $0x18] sm:$0xff]   ;;  %v9406_v26 = vld [vmem:[#allocation13 + $0x28] sm:$0xff]  }
  0x6a   :  { %v9393_v25 = vld [vmem:[#allocation5 + $0x18] sm:$0xff]   ;;  %v9394_v27 = vld [vmem:[#allocation5 + $0x20] sm:$0xff]   ;;  %v9401_v31 = vld [vmem:[#allocation2 + $0x28] sm:$0xff]  }
  0x6b   :  { %8721 = vmatpush3.bf16.msra.mxu0 %v9376_v4  ;;  %v9399_v28 = vld [vmem:[#allocation2 + $0x20] sm:$0xff]   ;;  %v9408_v30 = vld [vmem:[#allocation13 + $0x18] sm:$0xff]   ;;  %v9396_v32 = vld [vmem:[#allocation5 + $0x28] sm:$0xff]  }
  0x6c   :  { %8753 = vmatpush3.bf16.msra.mxu1 %v9377_v5  ;;  %8722 = vmatprep.subr.bf16.mxu0 %v9378_v6  ;;  %v9407_v29 = vld [vmem:[#allocation13 + $0x20] sm:$0xff]   ;;  %v9402_v33 = vld [vmem:[#allocation2 + $0x30] sm:$0xff]   ;;  %v9410_v36 = vld [vmem:[#allocation13 + $0x8] sm:$0xff]  }
  0x6d   :  { %8754 = vmatprep.subr.bf16.mxu1 %v9379_v7  ;;  %v9398_v34 = vld [vmem:[#allocation5 + $0x30] sm:$0xff]   ;;  %v9403_v37 = vld [vmem:[#allocation2 + $0x38] sm:$0xff]   ;;  %v9411_v39 = vld [vmem:[#allocation13] sm:$0xff]  }
  0x6e   :  { %v9409_v35 = vld [vmem:[#allocation13 + $0x10] sm:$0xff]   ;;  %v9400_v38 = vld [vmem:[#allocation5 + $0x38] sm:$0xff]   ;;  %v9412_v40 = vld [vmem:[#allocation7 + $0x20] sm:$0xff]  }
  0x6f   :  { %8723 = vmatpush3.bf16.msra.mxu0 %v9378_v6  ;;  %v9413_v41 = vld [vmem:[#allocation7 + $0x28] sm:$0xff]   ;;  %v9414_v42 = vld [vmem:[#allocation7 + $0x30] sm:$0xff]   ;;  %v9415_v43 = vld [vmem:[#allocation7 + $0x38] sm:$0xff]  }
  0x70   :  { %8755 = vmatpush3.bf16.msra.mxu1 %v9379_v7  ;;  %8724 = vmatprep.subr.bf16.mxu0 %v9380_v8  ;;  %v9416_v44 = vld [vmem:[#allocation7] sm:$0xff]   ;;  %v9417_v45 = vld [vmem:[#allocation7 + $0x8] sm:$0xff]   ;;  %v9418_v46 = vld [vmem:[#allocation7 + $0x10] sm:$0xff]  }
  0x71   :  { %8756 = vmatprep.subr.bf16.mxu1 %v9381_v9  ;;  %v9419_v47 = vld [vmem:[#allocation7 + $0x18] sm:$0xff]   ;;  %v10061_v48 = vld [vmem:[%s12147_s8] ss:$0 sm:$0xff] }
  0x72   :  { %v10066_v49 = vld [vmem:[%s12148_s9] ss:$0 sm:$0xff] }
  0x73   :  { %8725 = vmatpush3.bf16.msra.mxu0 %v9380_v8 }
  0x74   :  { %8757 = vmatpush3.bf16.msra.mxu1 %v9381_v9  ;;  %8726 = vmatprep.subr.bf16.mxu0 %v9382_v10 }
  0x75   :  { %8758 = vmatprep.subr.bf16.mxu1 %v9383_v11 }
  0x77   :  { %8727 = vmatpush3.bf16.msra.mxu0 %v9382_v10 }
  0x78   :  { %8759 = vmatpush3.bf16.msra.mxu1 %v9383_v11  ;;  %8728 = vmatprep.subr.bf16.mxu0 %v9384_v14 }
  0x79   :  { %8760 = vmatprep.subr.bf16.mxu1 %v9385_v15 }
  0x7b   :  { %8729 = vmatpush3.bf16.msra.mxu0 %v9384_v14 }
  0x7c   :  { %8761 = vmatpush3.bf16.msra.mxu1 %v9385_v15  ;;  %8730 = vmatprep.subr.bf16.mxu0 %v9386_v16 }
  0x7d   :  { %8762 = vmatprep.subr.bf16.mxu1 %v9387_v17 }
  0x7f   :  { %8731 = vmatpush3.bf16.msra.mxu0 %v9386_v16 }
  0x80   :  { %8763 = vmatpush3.bf16.msra.mxu1 %v9387_v17  ;;  %8780 = vmatprep.subr.bf16.mxu0 %v9404_v22 }
  0x81   :  { %9340 = vmatprep.subr.bf16.mxu1 %v9404_v22 }
  0x82   :  { %8733 = vmatmul.mubr.bf16.vlgmr.msra.gmra.mxu0 %v9390_v18 }
  0x83   :  { %8765 = vmatmul.mubr.bf16.vlgmr.msra.gmra.mxu1 %v9391_v19  ;;  %8736 = vmatprep.mubr.bf16.mxu0 %v9395_v21 }
  0x84   :  { %8768 = vmatprep.mubr.bf16.mxu1 %v9392_v20  ;;  %9348 = vmatpush3.bf16.msra.mxu1 %v9404_v22 }
  0x85   :  { %9341 = vmatprep.subr.bf16.mxu1 %v9405_v23  ;;  %8781 = vmatpush3.bf16.msra.mxu0 %v9404_v22 }
  0x86   :  { %8782 = vmatprep.subr.bf16.mxu0 %v9405_v23 }
  0x88   :  { %9349 = vmatpush3.bf16.msra.mxu1 %v9405_v23 }
  0x89   :  { %9342 = vmatprep.subr.bf16.mxu1 %v9406_v26  ;;  %8783 = vmatpush3.bf16.msra.mxu0 %v9405_v23 }
  0x8a   :  { %8737 = vmatmul.mubr.bf16.gmra.mxu0 %v9397_v24  ;;  %8784 = vmatprep.subr.bf16.mxu0 %v9406_v26 }
  0x8b   :  { %8769 = vmatmul.mubr.bf16.gmra.mxu1 %v9393_v25  ;;  %8740 = vmatprep.mubr.bf16.mxu0 %v9399_v28 }
  0x8c   :  { %8772 = vmatprep.mubr.bf16.mxu1 %v9394_v27  ;;  %9350 = vmatpush3.bf16.msra.mxu1 %v9406_v26 }
  0x8d   :  { %9343 = vmatprep.subr.bf16.mxu1 %v9407_v29  ;;  %8785 = vmatpush3.bf16.msra.mxu0 %v9406_v26 }
  0x8e   :  { %8786 = vmatprep.subr.bf16.mxu0 %v9407_v29 }
  0x90   :  { %9351 = vmatpush3.bf16.msra.mxu1 %v9407_v29 }
  0x91   :  { %9344 = vmatprep.subr.bf16.mxu1 %v9408_v30  ;;  %8787 = vmatpush3.bf16.msra.mxu0 %v9407_v29 }
  0x92   :  { %8741 = vmatmul.mubr.bf16.gmra.mxu0 %v9401_v31  ;;  %8788 = vmatprep.subr.bf16.mxu0 %v9408_v30 }
  0x93   :  { %8773 = vmatmul.mubr.bf16.gmra.mxu1 %v9396_v32  ;;  %8744 = vmatprep.mubr.bf16.mxu0 %v9402_v33 }
  0x94   :  { %8776 = vmatprep.mubr.bf16.mxu1 %v9398_v34  ;;  %9352 = vmatpush3.bf16.msra.mxu1 %v9408_v30 }
  0x95   :  { %9345 = vmatprep.subr.bf16.mxu1 %v9409_v35  ;;  %8789 = vmatpush3.bf16.msra.mxu0 %v9408_v30 }
  0x96   :  { %8790 = vmatprep.subr.bf16.mxu0 %v9409_v35 }
  0x98   :  { %9353 = vmatpush3.bf16.msra.mxu1 %v9409_v35 }
  0x99   :  { %9346 = vmatprep.subr.bf16.mxu1 %v9410_v36  ;;  %8791 = vmatpush3.bf16.msra.mxu0 %v9409_v35 }
  0x9a   :  { %8745 = vmatmul.mubr.bf16.gmra.mxu0 %v9403_v37  ;;  %8792 = vmatprep.subr.bf16.mxu0 %v9410_v36 }
  0x9b   :  { %8777 = vmatmul.mubr.bf16.gmra.mxu1 %v9400_v38  ;;  %8796 = vmatprep.mubr.bf16.mxu0 %v9416_v44 }
  0x9c   :  { %9354 = vmatpush3.bf16.msra.mxu1 %v9410_v36  ;;  %8804 = vmatprep.mubr.bf16.mxu1 %v9412_v40 }
  0x9d   :  { %9347 = vmatprep.subr.bf16.mxu1 %v9411_v39  ;;  %8793 = vmatpush3.bf16.msra.mxu0 %v9410_v36 }
  0x9e   :  { %8794 = vmatprep.subr.bf16.mxu0 %v9411_v39 }
  0xa0   :  { %9355 = vmatpush3.bf16.msra.mxu1 %v9411_v39 }
  0xa1   :  { %8795 = vmatpush3.bf16.msra.mxu0 %v9411_v39 }
  0xa3   :  { %8805 = vmatmul.mubr.bf16.vlgmr.msra.gmra.mxu1 %v9413_v41 }
  0xa4   :  { %8808 = vmatprep.mubr.bf16.mxu1 %v9414_v42  ;;  %8797 = vmatmul.mubr.bf16.vlgmr.msra.gmra.mxu0 %v9417_v45 }
  0xa5   :  { %8800 = vmatprep.mubr.bf16.mxu0 %v9418_v46 }
  0xab   :  { %8809 = vmatmul.mubr.bf16.gmra.mxu1 %v9415_v43 }
  0xac   :  { %8801 = vmatmul.mubr.bf16.gmra.mxu0 %v9419_v47 }
 0x142   :  { %v8734_v50 = vpop.f32.mrf.mxu0 }
 0x143   :  { %v10069_v51 = vadd.f32 %v8734_v50, %v10061_v48  ;;  %v8766_v52 = vpop.f32.mrf.mxu1 }
 0x144   :  { %v10072_v53 = vadd.f32 %v8766_v52, %v10066_v49  ;;  %v324_v54 = vpop.f32.mrf.mxu0 }
 0x145   :  { %12252 = vst [vmem:[#allocation26_spill] sm:$0xff] %v10069_v51  ;;  %v556_v55 = vpop.f32.mrf.mxu1  ;;  %2540 = vrot.lane.b32.xlu0 %v10069_v51, %s9936_s17  ;;  %v10077_v56 = vadd.f32 %v10061_v48, %v324_v54 }
 0x146   :  { %12253 = vst [vmem:[#allocation27_spill] sm:$0xff] %v10072_v53  ;;  %2544 = vrot.lane.b32.xlu1 %v10072_v53, %s9936_s17  ;;  %v8735_v57 = vpop.f32.mrf.mxu0  ;;  %v10084_v59 = vadd.f32 %v10066_v49, %v556_v55 }
 0x147   :  { %12254 = vst [vmem:[#allocation28_spill] sm:$0xff] %v10077_v56  ;;  %v8767_v58 = vpop.f32.mrf.mxu1  ;;  %8816 = vmatprep.mubr.msk.f32.mxu1 %vm867_vm0, %v10077_v56  ;;  %v10089_v62 = vadd.f32 %v8735_v57, %v10061_v48 }
 0x148   :  { %12255 = vst [vmem:[#allocation29_spill] sm:$0xff] %v10084_v59  ;;  %v327_v60 = vpop.f32.mrf.mxu0  ;;  %v10097_v2 = vadd.f32 %v8767_v58, %v10066_v49 }
 0x149   :  { %v559_v61 = vpop.f32.mrf.mxu1  ;;  %2449 = vrot.lane.b32.xlu0 %v10077_v56, %s9936_s17  ;;  %12256 = vst [vmem:[#allocation30_spill] sm:$0xff] %v10089_v62  ;;  %v10112_v7 = vadd.f32 %v10061_v48, %v327_v60  ;;  %v10378_v56 = vld [vmem:[#allocation8 + $0x20] sm:$0xff] }
 0x14a   :  { %v10092_v63 = vadd.f32 %v10066_v49, %v559_v61  ;;  %2453 = vrot.lane.b32.xlu1 %v10084_v59, %s9936_s17  ;;  %v8738_v0 = vpop.f32.mrf.mxu0  ;;  %12258 = vst [vmem:[#allocation32_spill] sm:$0xff] %v10097_v2  ;;  %12297 = vst [vmem:[#allocation71_spill] sm:$0xff] %v10378_v56 }
 0x14b   :  { %v8770_v1 = vpop.f32.mrf.mxu1  ;;  %12259 = vst [vmem:[#allocation33_spill] sm:$0xff] %v10112_v7  ;;  %v10190_v33 = vadd.f32 %v8738_v0, %v10061_v48 }
 0x14c   :  { %12257 = vst [vmem:[#allocation31_spill] sm:$0xff] %v10092_v63  ;;  %8812 = vmatprep.subr.msk.mxu1 %vm867_vm0, %v10092_v63  ;;  %v340_v3 = vpop.f32.mrf.mxu0  ;;  %v10196_v35 = vadd.f32 %v8770_v1, %v10066_v49 }
 0x14d   :  { %v572_v4 = vpop.f32.mrf.mxu1  ;;  %8813 = vmatpush3.xpose.msk.msra.mxu1 %vm867_vm0, %v10092_v63  ;;  %2542 = vrot.lane.b32.xlu0 %v10089_v62, %s9936_s17  ;;  %v10165_v25 = vadd.f32 %v10061_v48, %v340_v3  ;;  %12267 = vst [vmem:[#allocation41_spill] sm:$0xff] %v10190_v33 }
 0x14e   :  { %2546 = vrot.lane.b32.xlu1 %v10097_v2, %s9936_s17  ;;  %8814 = vmatprep.subr.msk.mxu1 %vm867_vm0, %v10084_v59  ;;  %v10109_v5 = vpop.f32.mrf.mxu0  ;;  %v10155_v23 = vadd.f32 %v10066_v49, %v572_v4  ;;  %12269 = vst [vmem:[#allocation43_spill] sm:$0xff] %v10196_v35 }
 0x14f   :  { %v8771_v6 = vpop.f32.mrf.mxu1  ;;  %12264 = vst [vmem:[#allocation38_spill] sm:$0xff] %v10165_v25  ;;  %v10229_v41 = vadd.f32 %v10109_v5, %v10061_v48 }
 0x150   :  { %v343_v8 = vpop.f32.mrf.mxu0  ;;  %v10125_v12 = vadd.f32 %v8771_v6, %v10066_v49  ;;  %12263 = vst [vmem:[#allocation37_spill] sm:$0xff] %v10155_v23 }
 0x151   :  { %v575_v9 = vpop.f32.mrf.mxu1  ;;  %8815 = vmatpush3.xpose.msk.msra.mxu1 %vm867_vm0, %v10084_v59  ;;  %2455 = vrot.lane.b32.xlu0 %v10092_v63, %s9936_s17  ;;  %v10182_v31 = vadd.f32 %v10061_v48, %v343_v8  ;;  %12272 = vst [vmem:[#allocation46_spill] sm:$0xff] %v10229_v41 }
 0x152   :  { %8819 = vmatprep.subr.msk.mxu1 %vm867_vm0, %v10097_v2  ;;  %2451 = vrot.lane.b32.xlu1 %v10112_v7, %s9936_s17  ;;  %v8742_v10 = vpop.f32.mrf.mxu0  ;;  %12260 = vst [vmem:[#allocation34_spill] sm:$0xff] %v10125_v12  ;;  %v10143_v18 = vadd.f32 %v10066_v49, %v575_v9 }
 0x153   :  { %v10122_v11 = vpop.f32.mrf.mxu1  ;;  %12265 = vst [vmem:[#allocation39_spill] sm:$0xff] %v10182_v31  ;;  %v10234_v42 = vadd.f32 %v8742_v10, %v10061_v48 }
 0x154   :  { %8817 = vmatmul.mubr.msk.f32.vlgmr.msra.gmra.mxu1 %vm867_vm0, %v10112_v7  ;;  %v356_v13 = vpop.f32.mrf.mxu0  ;;  %12261 = vst [vmem:[#allocation35_spill] sm:$0xff] %v10143_v18  ;;  %v10240_v43 = vadd.f32 %v10122_v11, %v10066_v49 }
 0x155   :  { %v588_v14 = vpop.f32.mrf.mxu1  ;;  %8820 = vmatpush3.xpose.msk.msra.mxu1 %vm867_vm0, %v10097_v2  ;;  %8823 = vmatprep.mubr.msk.f32.mxu1 %vm867_vm0, %v10069_v51  ;;  %v10134_v15 = vadd.f32 %v10061_v48, %v356_v13 }
 0x156   :  { %2728 = vrot.lane.b32.xlu1 %v10125_v12, %s9936_s17  ;;  %8821 = vmatprep.subr.msk.mxu1 %vm867_vm0, %v10072_v53  ;;  %v8743_v16 = vpop.f32.mrf.mxu0  ;;  %v10158_v24 = vadd.f32 %v10066_v49, %v588_v14 }
 0x157   :  { %v8775_v17 = vpop.f32.mrf.mxu1  ;;  %8844 = vmatprep.mubr.msk.f32.mxu0 %vm867_vm0, %v10134_v15  ;;  %v10261_v46 = vadd.f32 %v8743_v16, %v10061_v48 }
 0x158   :  { %v359_v20 = vpop.f32.mrf.mxu0  ;;  %v10221_v39 = vadd.f32 %v8775_v17, %v10066_v49 }
 0x159   :  { %v591_v19 = vpop.f32.mrf.mxu1  ;;  %8822 = vmatpush3.xpose.msk.msra.mxu1 %vm867_vm0, %v10072_v53  ;;  %v10199_v36 = vadd.f32 %v10061_v48, %v359_v20  ;;  %v10400_v53 = vld [vmem:[#allocation8 + $0x38] sm:$0xff] }
 0x15a   :  { %v10148_v21 = vadd.f32 %v10066_v49, %v591_v19  ;;  %2637 = vrot.lane.b32.xlu1 %v10143_v18, %s9936_s17  ;;  %8826 = vmatprep.subr.msk.mxu1 %vm867_vm0, %v10143_v18  ;;  %v8746_v27 = vpop.f32.mrf.mxu0  ;;  %12300 = vst [vmem:[#allocation74_spill] sm:$0xff] %v10400_v53 }
 0x15b   :  { %v8778_v22 = vpop.f32.mrf.mxu1  ;;  %12270 = vst [vmem:[#allocation44_spill] sm:$0xff] %v10199_v36  ;;  %v10266_v47 = vadd.f32 %v8746_v27, %v10061_v48 }
 0x15c   :  { %12262 = vst [vmem:[#allocation36_spill] sm:$0xff] %v10148_v21  ;;  %8824 = vmatmul.mubr.msk.f32.vlgmr.msra.gmra.mxu1 %vm867_vm0, %v10089_v62  ;;  %8840 = vmatprep.subr.msk.mxu0 %vm867_vm0, %v10148_v21  ;;  %v372_v30 = vpop.f32.mrf.mxu0  ;;  %v10269_v50 = vadd.f32 %v8778_v22, %v10066_v49 }
 0x15d   :  { %v604_v26 = vpop.f32.mrf.mxu1  ;;  %8827 = vmatpush3.xpose.msk.msra.mxu1 %vm867_vm0, %v10143_v18  ;;  %8841 = vmatpush3.xpose.msk.msra.mxu0 %vm867_vm0, %v10148_v21  ;;  %v10193_v34 = vadd.f32 %v10061_v48, %v372_v30  ;;  %12275 = vst [vmem:[#allocation49_spill] sm:$0xff] %v10266_v47 }
 0x15e   :  { %8828 = vmatprep.subr.msk.mxu1 %vm867_vm0, %v10155_v23  ;;  %8842 = vmatprep.subr.msk.mxu0 %vm867_vm0, %v10158_v24  ;;  %v8747_v37 = vpop.f32.mrf.mxu0  ;;  %v10210_v38 = vadd.f32 %v10066_v49, %v604_v26  ;;  %12276 = vst [vmem:[#allocation50_spill] sm:$0xff] %v10269_v50 }
 0x15f   :  { %v8779_v28 = vpop.f32.mrf.mxu1  ;;  %8830 = vmatprep.mubr.msk.f32.mxu1 %vm867_vm0, %v10165_v25  ;;  %12268 = vst [vmem:[#allocation42_spill] sm:$0xff] %v10193_v34  ;;  %v10282_v52 = vadd.f32 %v8747_v37, %v10061_v48 }
 0x160   :  { %12271 = vst [vmem:[#allocation45_spill] sm:$0xff] %v10210_v38  ;;  %v375_v40 = vpop.f32.mrf.mxu0  ;;  %v10256_v45 = vadd.f32 %v8779_v28, %v10066_v49 }
 0x161   :  { %v607_v29 = vpop.f32.mrf.mxu1  ;;  %8829 = vmatpush3.xpose.msk.msra.mxu1 %vm867_vm0, %v10155_v23  ;;  %8843 = vmatpush3.xpose.msk.msra.mxu0 %vm867_vm0, %v10158_v24  ;;  %v10243_v44 = vadd.f32 %v10061_v48, %v375_v40  ;;  %12277 = vst [vmem:[#allocation51_spill] sm:$0xff] %v10282_v52 }
 0x162   :  { %v10185_v32 = vadd.f32 %v10066_v49, %v607_v29  ;;  %8833 = vmatprep.subr.msk.mxu1 %vm867_vm0, %v10125_v12  ;;  %12274 = vst [vmem:[#allocation48_spill] sm:$0xff] %v10256_v45  ;;  %v10289_v49 = vld [vmem:[%s12149_s10] ss:$0 sm:$0xff]  ;;  %s9937_s10 = smov 32  }
 0x163   :  { %12273 = vst [vmem:[#allocation47_spill] sm:$0xff] %v10243_v44  ;;  %v8806_v54 = vpop.f32.mrf.mxu1 }
 0x164   :  { %12266 = vst [vmem:[#allocation40_spill] sm:$0xff] %v10185_v32  ;;  %8831 = vmatmul.mubr.msk.f32.vlgmr.msra.gmra.mxu1 %vm867_vm0, %v10182_v31  ;;  %8854 = vmatprep.subr.msk.mxu0 %vm867_vm0, %v10185_v32  ;;  %v10292_v55 = vadd.f32 %v8806_v54, %v10289_v49  ;;  %v8798_v9 = vpop.f32.mrf.mxu0 }
 0x165   :  { %8834 = vmatpush3.xpose.msk.msra.mxu1 %vm867_vm0, %v10125_v12  ;;  %8837 = vmatprep.mubr.msk.f32.mxu1 %vm867_vm0, %v10190_v33  ;;  %v820_v57 = vpop.f32.mrf.mxu1  ;;  %v10313_v13 = vadd.f32 %v8798_v9, %v10289_v49  ;;  %v10385_v12 = vld [vmem:[#allocation8 + $0x40] sm:$0xff] }
 0x166   :  { %8845 = vmatmul.mubr.msk.f32.vlgmr.msra.gmra.mxu0 %vm867_vm0, %v10199_v36  ;;  %8835 = vmatprep.subr.msk.mxu1 %vm867_vm0, %v10196_v35  ;;  %12278 = vst [vmem:[#allocation52_spill] sm:$0xff] %v10292_v55  ;;  %v10295_v58 = vadd.f32 %v10289_v49, %v820_v57  ;;  %v788_v10 = vpop.f32.mrf.mxu0  ;;  %v10348_v57 = vld [vmem:[#allocation8 + $0x8] sm:$0xff]  ;;  %12299 = vst [vmem:[#allocation73_spill] sm:$0xff] %v10385_v12 }
 0x167   :  { %8855 = vmatpush3.xpose.msk.msra.mxu0 %vm867_vm0, %v10185_v32  ;;  %8858 = vmatprep.mubr.msk.f32.mxu0 %vm867_vm0, %v10193_v34  ;;  %v8807_v60 = vpop.f32.mrf.mxu1  ;;  %12284 = vst [vmem:[#allocation58_spill] sm:$0xff] %v10313_v13  ;;  %v10319_v17 = vadd.f32 %v10289_v49, %v788_v10  ;;  %12292 = vst [vmem:[#allocation66_spill] sm:$0xff] %v10348_v57 }
 0x168   :  { %8856 = vmatprep.subr.msk.mxu0 %vm867_vm0, %v10210_v38  ;;  %12279 = vst [vmem:[#allocation53_spill] sm:$0xff] %v10295_v58  ;;  %v10298_v48 = vadd.f32 %v8807_v60, %v10289_v49  ;;  %v8799_v11 = vpop.f32.mrf.mxu0 }
 0x169   :  { %8836 = vmatpush3.xpose.msk.msra.mxu1 %vm867_vm0, %v10196_v35  ;;  %v823_v61 = vpop.f32.mrf.mxu1  ;;  %v10316_v14 = vadd.f32 %v8799_v11, %v10289_v49  ;;  %12286 = vst [vmem:[#allocation60_spill] sm:$0xff] %v10319_v17 }
 0x16a   :  { %8847 = vmatprep.subr.msk.mxu1 %vm867_vm0, %v10221_v39  ;;  %12280 = vst [vmem:[#allocation54_spill] sm:$0xff] %v10298_v48  ;;  %v10301_v0 = vadd.f32 %v10289_v49, %v823_v61  ;;  %v791_v16 = vpop.f32.mrf.mxu0 }
 0x16b   :  { %8857 = vmatpush3.xpose.msk.msra.mxu0 %vm867_vm0, %v10210_v38  ;;  %v8810_v1 = vpop.f32.mrf.mxu1  ;;  %12285 = vst [vmem:[#allocation59_spill] sm:$0xff] %v10316_v14  ;;  %v10322_v19 = vadd.f32 %v10289_v49, %v791_v16  ;;  %v10360_v16 = vld [vmem:[#allocation8 + $0x18] sm:$0xff] }
 0x16c   :  { %8838 = vmatmul.mubr.msk.f32.vlgmr.msra.gmra.mxu1 %vm867_vm0, %v10229_v41  ;;  %12281 = vst [vmem:[#allocation55_spill] sm:$0xff] %v10301_v0  ;;  %v10304_v3 = vadd.f32 %v8810_v1, %v10289_v49  ;;  %v8802_v20 = vpop.f32.mrf.mxu0  ;;  %v10350_v1 = vld [vmem:[#allocation8] sm:$0xff]  ;;  %12294 = vst [vmem:[#allocation68_spill] sm:$0xff] %v10360_v16 }
 0x16d   :  { %8848 = vmatpush3.xpose.msk.msra.mxu1 %vm867_vm0, %v10221_v39  ;;  %8851 = vmatprep.mubr.msk.f32.mxu1 %vm867_vm0, %v10234_v42  ;;  %v836_v4 = vpop.f32.mrf.mxu1  ;;  %12287 = vst [vmem:[#allocation61_spill] sm:$0xff] %v10322_v19  ;;  %v10333_v26 = vadd.f32 %v8802_v20, %v10289_v49  ;;  %12293 = vst [vmem:[#allocation67_spill] sm:$0xff] %v10350_v1 }
 0x16e   :  { %8849 = vmatprep.subr.msk.mxu1 %vm867_vm0, %v10240_v43  ;;  %8859 = vmatmul.mubr.msk.f32.vlgmr.msra.gmra.mxu0 %vm867_vm0, %v10243_v44  ;;  %12282 = vst [vmem:[#allocation56_spill] sm:$0xff] %v10304_v3  ;;  %v10307_v5 = vadd.f32 %v10289_v49, %v836_v4  ;;  %v804_v22 = vpop.f32.mrf.mxu0  ;;  %v10448_v3 = vld [vmem:[#allocation8 + $0x70] sm:$0xff] }
 0x16f   :  { %v8811_v6 = vpop.f32.mrf.mxu1  ;;  %8868 = vmatprep.subr.mxu0 %v10322_v19  ;;  %12288 = vst [vmem:[#allocation62_spill] sm:$0xff] %v10333_v26  ;;  %v10336_v27 = vadd.f32 %v10289_v49, %v804_v22  ;;  %12307 = vst [vmem:[#allocation81_spill] sm:$0xff] %v10448_v3 }
 0x170   :  { %v10310_v8 = vadd.f32 %v8811_v6, %v10289_v49  ;;  %8869 = vmatpush3.msra.mxu0 %v10322_v19  ;;  %v8803_v28 = vpop.f32.mrf.mxu0 }
 0x171   :  { %8850 = vmatpush3.xpose.msk.msra.mxu1 %vm867_vm0, %v10240_v43  ;;  %8870 = vmatprep.subr.mxu0 %v10319_v17  ;;  %12289 = vst [vmem:[#allocation63_spill] sm:$0xff] %v10336_v27  ;;  %v10339_v29 = vadd.f32 %v8803_v28, %v10289_v49  ;;  %v10346_v40 = vpop.f32.mrf.mxu1 }
 0x172   :  { %8861 = vmatprep.subr.msk.mxu1 %vm867_vm0, %v10256_v45  ;;  %12283 = vst [vmem:[#allocation57_spill] sm:$0xff] %v10310_v8  ;;  %8871 = vmatpush3.msra.mxu0 %v10319_v17  ;;  %v807_v30 = vpop.f32.mrf.mxu0 }
 0x173   :  { %12290 = vst [vmem:[#allocation64_spill] sm:$0xff] %v10339_v29  ;;  %v10342_v37 = vadd.f32 %v10289_v49, %v807_v30  ;;  %v10364_v30 = vld [vmem:[#allocation8 + $0x10] sm:$0xff] }
 0x174   :  { %8852 = vmatmul.mubr.msk.f32.vlgmr.msra.gmra.mxu1 %vm867_vm0, %v10261_v46  ;;  %12295 = vst [vmem:[#allocation69_spill] sm:$0xff] %v10364_v30 }
 0x175   :  { %8862 = vmatpush3.xpose.msk.msra.mxu1 %vm867_vm0, %v10256_v45  ;;  %8865 = vmatprep.mubr.msk.f32.mxu1 %vm867_vm0, %v10266_v47  ;;  %12291 = vst [vmem:[#allocation65_spill] sm:$0xff] %v10342_v37 }
 0x176   :  { %8863 = vmatprep.subr.msk.mxu1 %vm867_vm0, %v10269_v50  ;;  %8882 = vmatprep.subr.mxu0 %v10342_v37 }
 0x179   :  { %8864 = vmatpush3.xpose.msk.msra.mxu1 %vm867_vm0, %v10269_v50 }
 0x17a   :  { %8875 = vmatprep.subr.mxu1 %v10316_v14 }
 0x17c   :  { %8866 = vmatmul.mubr.msk.f32.vlgmr.msra.gmra.mxu1 %vm867_vm0, %v10282_v52 }
 0x17d   :  { %8876 = vmatpush3.msra.mxu1 %v10316_v14 }
 0x17e   :  { %8877 = vmatprep.subr.mxu1 %v10313_v13 }
 0x17f   :  { %8878 = vmatpush3.msra.mxu1 %v10313_v13 }
 0x180   :  { %8889 = vmatprep.subr.mxu1 %v10339_v29 }
 0x214   :  { %v8818_v54 = vpop.f32.mrf.mxu1 }
 0x215   :  { %v1565_v60 = vmul.f32 0.17677669, %v8818_v54 }
 0x216   :  { %v946_v61 = vpop.f32.mrf.mxu1 }
 0x217   :  { %v1564_v4 = vmul.f32 0.17677669, %v946_v61  ;;  %v10353_v6 = vadd.f32 %v1565_v60, %v10348_v57 }
 0x219   :  { %v1600_v9 = vsel %vm1596_vm1, %v10353_v6, -inf  ;;  %v10358_v10 = vadd.f32 %v1564_v4, %v10350_v1 }
 0x21a   :  { %1601 = vmax.xlane.f32.xlu0 %v1600_v9 }
 0x21b   :  { %v1597_v22 = vsel %vm1596_vm1, %v10358_v10, -inf }
 0x21c   :  { %v8825_v11 = vpop.f32.mrf.mxu1 }
 0x21d   :  { %v1567_v20 = vmul.f32 0.17677669, %v8825_v11  ;;  %v10374_v11 = vld [vmem:[#allocation8 + $0x28] sm:$0xff] }
 0x21e   :  { %1598 = vmax.xlane.f32.xlu0 %v1597_v22  ;;  %v1033_v28 = vpop.f32.mrf.mxu1  ;;  %12296 = vst [vmem:[#allocation70_spill] sm:$0xff] %v10374_v11 }
 0x21f   :  { %v1566_v54 = vmul.f32 0.17677669, %v1033_v28  ;;  %v10367_v60 = vadd.f32 %v1567_v20, %v10360_v16  ;;  %v10380_v20 = vld [vmem:[#allocation8 + $0x48] sm:$0xff] }
 0x220   :  { %12298 = vst [vmem:[#allocation72_spill] sm:$0xff] %v10380_v20 }
 0x221   :  { %v1606_v61 = vsel %vm1596_vm1, %v10367_v60, -inf  ;;  %v10372_v4 = vadd.f32 %v1566_v54, %v10364_v30 }
 0x222   :  { %1607 = vmax.xlane.f32.xlu1 %v1606_v61 }
 0x223   :  { %v1603_v22 = vsel %vm1596_vm1, %v10372_v4, -inf }
 0x224   :  { %v8832_v9 = vpop.f32.mrf.mxu1 }
 0x225   :  { %v1569_v62 = vmul.f32 0.17677669, %v8832_v9 }
 0x226   :  { %1604 = vmax.xlane.f32.xlu1 %v1603_v22  ;;  %v1120_v51 = vpop.f32.mrf.mxu1  ;;  %v8846_v28 = vpop.f32.mrf.mxu0 }
 0x227   :  { %v1568_v59 = vmul.f32 0.17677669, %v1120_v51  ;;  %v1573_v63 = vmul.f32 0.17677669, %v8846_v28  ;;  %v10383_v54 = vadd.f32 %v1569_v62, %v10374_v11 }
 0x228   :  { %v1294_v61 = vpop.f32.mrf.mxu0 }
 0x229   :  { %v1572_v18 = vmul.f32 0.17677669, %v1294_v61  ;;  %v1612_v9 = vsel %vm1596_vm1, %v10383_v54, -inf  ;;  %v10390_v22 = vadd.f32 %v1568_v59, %v10378_v56  ;;  %v10393_v7 = vadd.f32 %v1573_v63, %v10380_v20  ;;  %v10404_v63 = vld [vmem:[#allocation8 + $0x30] sm:$0xff] }
 0x22a   :  { %1613 = vmax.xlane.f32.xlu1 %v1612_v9  ;;  %12301 = vst [vmem:[#allocation75_spill] sm:$0xff] %v10404_v63  ;;  %v10406_v9 = vld [vmem:[#allocation8 + $0x68] sm:$0xff] }
 0x22b   :  { %v1609_v51 = vsel %vm1596_vm1, %v10390_v22, -inf  ;;  %v10398_v62 = vadd.f32 %v1572_v18, %v10385_v12  ;;  %v1624_v2 = vsel %vm1596_vm1, %v10393_v7, -inf  ;;  %12302 = vst [vmem:[#allocation76_spill] sm:$0xff] %v10406_v9  ;;  %v10413_v12 = vld [vmem:[#allocation8 + $0x60] sm:$0xff] }
 0x22c   :  { %1610 = vmax.xlane.f32.xlu0 %v1609_v51  ;;  %v8839_v28 = vpop.f32.mrf.mxu1  ;;  %12303 = vst [vmem:[#allocation77_spill] sm:$0xff] %v10413_v12 }
 0x22d   :  { %v1571_v61 = vmul.f32 0.17677669, %v8839_v28  ;;  %v1621_v18 = vsel %vm1596_vm1, %v10398_v62, -inf }
 0x22e   :  { %1625 = vmax.xlane.f32.xlu1 %v1624_v2  ;;  %v1207_v59 = vpop.f32.mrf.mxu1  ;;  %v8860_v30 = vpop.f32.mrf.mxu0 }
 0x22f   :  { %v1570_v20 = vmul.f32 0.17677669, %v1207_v59  ;;  %v1577_v16 = vmul.f32 0.17677669, %v8860_v30  ;;  %v10411_v51 = vadd.f32 %v1571_v61, %v10400_v53  ;;  %v10428_v53 = vld [vmem:[#allocation8 + $0x58] sm:$0xff] }
 0x230   :  { %1622 = vmax.xlane.f32.xlu0 %v1621_v18  ;;  %v1468_v28 = vpop.f32.mrf.mxu0  ;;  %12304 = vst [vmem:[#allocation78_spill] sm:$0xff] %v10428_v53 }
 0x231   :  { %v1576_v56 = vmul.f32 0.17677669, %v1468_v28  ;;  %v1618_v2 = vsel %vm1596_vm1, %v10411_v51, -inf  ;;  %v10418_v11 = vadd.f32 %v1570_v20, %v10404_v63  ;;  %v10421_v59 = vadd.f32 %v1577_v16, %v10406_v9  ;;  %v10432_v63 = vld [vmem:[#allocation8 + $0x50] sm:$0xff] }
 0x232   :  { %1619 = vmax.xlane.f32.xlu1 %v1618_v2  ;;  %12305 = vst [vmem:[#allocation79_spill] sm:$0xff] %v10432_v63 }
 0x233   :  { %v1615_v30 = vsel %vm1596_vm1, %v10418_v11, -inf  ;;  %v10426_v61 = vadd.f32 %v1576_v56, %v10413_v12  ;;  %v1636_v1 = vsel %vm1596_vm1, %v10421_v59, -inf }
 0x234   :  { %1616 = vmax.xlane.f32.xlu0 %v1615_v30  ;;  %v8853_v18 = vpop.f32.mrf.mxu1 }
 0x235   :  { %v1575_v28 = vmul.f32 0.17677669, %v8853_v18  ;;  %v1633_v2 = vsel %vm1596_vm1, %v10426_v61, -inf }
 0x236   :  { %1637 = vmax.xlane.f32.xlu1 %v1636_v1  ;;  %v1381_v20 = vpop.f32.mrf.mxu1 }
 0x237   :  { %v1574_v16 = vmul.f32 0.17677669, %v1381_v20  ;;  %v10437_v9 = vadd.f32 %v1575_v28, %v10428_v53  ;;  %v10446_v20 = vld [vmem:[#allocation8 + $0x78] sm:$0xff] }
 0x238   :  { %1634 = vmax.xlane.f32.xlu0 %v1633_v2  ;;  %12306 = vst [vmem:[#allocation80_spill] sm:$0xff] %v10446_v20 }
 0x239   :  { %v1630_v56 = vsel %vm1596_vm1, %v10437_v9, -inf  ;;  %v10442_v30 = vadd.f32 %v1574_v16, %v10432_v63 }
 0x23a   :  { %1631 = vmax.xlane.f32.xlu1 %v1630_v56 }
 0x23b   :  { %v1627_v1 = vsel %vm1596_vm1, %v10442_v30, -inf }
 0x23c   :  { %1628 = vmax.xlane.f32.xlu0 %v1627_v1  ;;  %v8867_v18 = vpop.f32.mrf.mxu1 }
 0x23d   :  { %v1579_v12 = vmul.f32 0.17677669, %v8867_v18 }
 0x23e   :  { %v1555_v57 = vpop.f32.mrf.mxu1 }
 0x23f   :  { %v1578_v28 = vmul.f32 0.17677669, %v1555_v57  ;;  %v10451_v2 = vadd.f32 %v1579_v12, %v10446_v20  ;;  %v10472_v12 = vpop.permute.xlu1 %2544  ;;  %v10474_v57 = vpop.permute.xlu0 %2540 }
 0x240   :  { %12308 = vst [vmem:[#allocation82_spill] sm:$0xff] %v10472_v12  ;;  %12309 = vst [vmem:[#allocation83_spill] sm:$0xff] %v10474_v57 }
 0x241   :  { %v1642_v16 = vsel %vm1596_vm1, %v10451_v2, -inf  ;;  %v10456_v56 = vadd.f32 %v1578_v28, %v10448_v3 }
 0x242   :  { %1643 = vmax.xlane.f32.xlu1 %v1642_v16 }
 0x243   :  { %v1639_v1 = vsel %vm1596_vm1, %v10456_v56, -inf  ;;  %v10476_v18 = vpop.permute.xlu1 %2453  ;;  %v10478_v28 = vpop.permute.xlu0 %2449 }
 0x244   :  { %1640 = vmax.xlane.f32.xlu0 %v1639_v1  ;;  %12310 = vst [vmem:[#allocation84_spill] sm:$0xff] %v10476_v18 }
 0x247   :  { %v10480_v16 = vpop.permute.xlu1 %2546  ;;  %v10482_v1 = vpop.permute.xlu0 %2542 }
 0x248   :  { %12311 = vst [vmem:[#allocation85_spill] sm:$0xff] %v10480_v16  ;;  %12312 = vst [vmem:[#allocation86_spill] sm:$0xff] %v10482_v1 }
 0x253   :  { %2726 = vrot.lane.b32.xlu1 %v10196_v35, %s9936_s17 }
 0x257   :  { %2633 = vrot.lane.b32.xlu1 %v10182_v31, %s9936_s17 }
 0x25a   :  { %2635 = vrot.lane.b32.xlu0 %v10155_v23, %s9936_s17  ;;  %v10484_v23 = vpop.permute.xlu1 %2451 }
 0x25b   :  { %2819 = vrot.lane.b32.xlu1 %v10148_v21, %s9936_s17  ;;  %12313 = vst [vmem:[#allocation87_spill] sm:$0xff] %v10484_v23  ;;  %v10486_v21 = vpop.permute.xlu0 %2455 }
 0x25e   :  { %2631 = vrot.lane.b32.xlu0 %v10165_v25, %s9936_s17  ;;  %v10488_v25 = vpop.permute.xlu1 %2728 }
 0x25f   :  { %12314 = vst [vmem:[#allocation88_spill] sm:$0xff] %v10488_v25 }
 0x262   :  { %2722 = vrot.lane.b32.xlu0 %v10190_v33, %s9936_s17  ;;  %v10491_v3 = vpop.permute.xlu1 %2637 }
 0x2a3   :  { %v1602_v31 = vpop.xlane.xlu0 %1601 }
 0x2a4   :  { %v1646_v33 = vsub.f32 %v10353_v6, %v1602_v31 }
 0x2a6   :  { %v1663_v35 = vmul.f32 1.442695, %v1646_v33 }
 0x2a7   :  { %v1599_v20 = vpop.xlane.xlu0 %1598 }
 0x2a8   :  { %9428 = vpow2.f32 %v1663_v35  ;;  %v1645_v63 = vsub.f32 %v10358_v10, %v1599_v20 }
 0x2aa   :  { %v1661_v53 = vmul.f32 1.442695, %v1645_v63 }
 0x2ab   :  { %v1608_v57 = vpop.xlane.xlu1 %1607 }
 0x2ac   :  { %9430 = vpow2.f32 %v1661_v53  ;;  %v1648_v1 = vsub.f32 %v10367_v60, %v1608_v57 }
 0x2ae   :  { %v1667_v12 = vmul.f32 1.442695, %v1648_v1 }
 0x2af   :  { %v1605_v16 = vpop.xlane.xlu1 %1604 }
 0x2b0   :  { %9432 = vpow2.f32 %v1667_v12  ;;  %v1647_v25 = vsub.f32 %v10372_v4, %v1605_v16 }
 0x2b2   :  { %v1665_v23 = vmul.f32 1.442695, %v1647_v25 }
 0x2b3   :  { %v1614_v18 = vpop.xlane.xlu1 %1613 }
 0x2b4   :  { %9434 = vpow2.f32 %v1665_v23  ;;  %v1650_v31 = vsub.f32 %v10383_v54, %v1614_v18 }
 0x2b5   :  { %v10497_v33 = vpop.eup %9428  ;;  %v1611_v35 = vpop.xlane.xlu0 %1610 }
 0x2b6   :  { %v1671_v6 = vmul.f32 1.442695, %v1650_v31  ;;  %v1649_v10 = vsub.f32 %v10390_v22, %v1611_v35  ;;  %v1696_v53 = vsel %vm1596_vm1, %v10497_v33, 0.0 }
 0x2b7   :  { %v1626_v60 = vpop.xlane.xlu1 %1625  ;;  %1697 = vadd.xlane.f32.xlu1 %v1696_v53 }
 0x2b8   :  { %9436 = vpow2.f32 %v1671_v6  ;;  %v1669_v63 = vmul.f32 1.442695, %v1649_v10  ;;  %v1654_v4 = vsub.f32 %v10393_v7, %v1626_v60 }
 0x2b9   :  { %v10503_v25 = vpop.eup %9430  ;;  %v1623_v23 = vpop.xlane.xlu0 %1622 }
 0x2ba   :  { %9438 = vpow2.f32 %v1669_v63  ;;  %v1679_v54 = vmul.f32 1.442695, %v1654_v4  ;;  %v1653_v20 = vsub.f32 %v10398_v62, %v1623_v23  ;;  %v1693_v12 = vsel %vm1596_vm1, %v10503_v25, 0.0 }
 0x2bb   :  { %v1620_v22 = vpop.xlane.xlu1 %1619  ;;  %1694 = vadd.xlane.f32.xlu0 %v1693_v12 }
 0x2bc   :  { %9440 = vpow2.f32 %v1679_v54  ;;  %v1677_v57 = vmul.f32 1.442695, %v1653_v20  ;;  %v1652_v18 = vsub.f32 %v10411_v51, %v1620_v22 }
 0x2bd   :  { %v10509_v16 = vpop.eup %9432  ;;  %v1617_v1 = vpop.xlane.xlu0 %1616 }
 0x2be   :  { %9442 = vpow2.f32 %v1677_v57  ;;  %v1675_v7 = vmul.f32 1.442695, %v1652_v18  ;;  %v1651_v31 = vsub.f32 %v10418_v11, %v1617_v1  ;;  %v1702_v35 = vsel %vm1596_vm1, %v10509_v16, 0.0 }
 0x2bf   :  { %v1638_v62 = vpop.xlane.xlu1 %1637  ;;  %1703 = vadd.xlane.f32.xlu1 %v1702_v35 }
 0x2c0   :  { %9444 = vpow2.f32 %v1675_v7  ;;  %v1673_v6 = vmul.f32 1.442695, %v1651_v31  ;;  %v1658_v10 = vsub.f32 %v10421_v59, %v1638_v62 }
 0x2c1   :  { %v10515_v53 = vpop.eup %9434  ;;  %v1635_v60 = vpop.xlane.xlu0 %1634 }
 0x2c2   :  { %9446 = vpow2.f32 %v1673_v6  ;;  %v1687_v51 = vmul.f32 1.442695, %v1658_v10  ;;  %v1657_v63 = vsub.f32 %v10426_v61, %v1635_v60  ;;  %v1699_v4 = vsel %vm1596_vm1, %v10515_v53, 0.0 }
 0x2c3   :  { %v1632_v11 = vpop.xlane.xlu1 %1631  ;;  %1700 = vadd.xlane.f32.xlu0 %v1699_v4 }
 0x2c4   :  { %9448 = vpow2.f32 %v1687_v51  ;;  %v1685_v23 = vmul.f32 1.442695, %v1657_v63  ;;  %v1656_v54 = vsub.f32 %v10437_v9, %v1632_v11 }
 0x2c5   :  { %v10521_v20 = vpop.eup %9436  ;;  %v1629_v12 = vpop.xlane.xlu0 %1628 }
 0x2c6   :  { %9450 = vpow2.f32 %v1685_v23  ;;  %v1683_v59 = vmul.f32 1.442695, %v1656_v54  ;;  %v1655_v22 = vsub.f32 %v10442_v30, %v1629_v12  ;;  %v1708_v57 = vsel %vm1596_vm1, %v10521_v20, 0.0 }
 0x2c7   :  { %v10526_v61 = vpop.eup %9438  ;;  %1709 = vadd.xlane.f32.xlu1 %v1708_v57 }
 0x2c8   :  { %9452 = vpow2.f32 %v1683_v59  ;;  %v1681_v18 = vmul.f32 1.442695, %v1655_v22  ;;  %v1705_v1 = vsel %vm1596_vm1, %v10526_v61, 0.0 }
 0x2c9   :  { %v10530_v7 = vpop.eup %9440  ;;  %1706 = vadd.xlane.f32.xlu0 %v1705_v1 }
 0x2ca   :  { %9454 = vpow2.f32 %v1681_v18  ;;  %v1720_v9 = vsel %vm1596_vm1, %v10530_v7, 0.0 }
 0x2cb   :  { %v10534_v31 = vpop.eup %9442  ;;  %1721 = vadd.xlane.f32.xlu1 %v1720_v9  ;;  %v1644_v30 = vpop.xlane.xlu1 %1643 }
 0x2cc   :  { %v1660_v35 = vsub.f32 %v10451_v2, %v1644_v30  ;;  %v1717_v62 = vsel %vm1596_vm1, %v10534_v31, 0.0 }
 0x2cd   :  { %v10539_v6 = vpop.eup %9444  ;;  %1718 = vadd.xlane.f32.xlu0 %v1717_v62  ;;  %v1641_v10 = vpop.xlane.xlu0 %1640 }
 0x2ce   :  { %v1691_v60 = vmul.f32 1.442695, %v1660_v35  ;;  %v1659_v51 = vsub.f32 %v10456_v56, %v1641_v10  ;;  %v1714_v63 = vsel %vm1596_vm1, %v10539_v6, 0.0 }
 0x2cf   :  { %v10544_v4 = vpop.eup %9446  ;;  %1715 = vadd.xlane.f32.xlu1 %v1714_v63  ;;  %v10622_v62 = vpop.permute.xlu1 %2726 }
 0x2d0   :  { %9456 = vpow2.f32 %v1691_v60  ;;  %v1689_v11 = vmul.f32 1.442695, %v1659_v51  ;;  %v1711_v2 = vsel %vm1596_vm1, %v10544_v4, 0.0 }
 0x2d1   :  { %v10548_v23 = vpop.eup %9448  ;;  %1712 = vadd.xlane.f32.xlu0 %v1711_v2  ;;  %v10624_v10 = vpop.permute.xlu0 %2635 }
 0x2d2   :  { %9458 = vpow2.f32 %v1689_v11  ;;  %v1732_v54 = vsel %vm1596_vm1, %v10548_v23, 0.0 }
 0x2d3   :  { %v10552_v12 = vpop.eup %9450  ;;  %1733 = vadd.xlane.f32.xlu1 %v1732_v54  ;;  %v10626_v60 = vpop.permute.xlu1 %2633 }
 0x2d4   :  { %v1729_v56 = vsel %vm1596_vm1, %v10552_v12, 0.0 }
 0x2d5   :  { %v10556_v59 = vpop.eup %9452  ;;  %1730 = vadd.xlane.f32.xlu0 %v1729_v56  ;;  %v10628_v51 = vpop.permute.xlu0 %2631 }
 0x2d6   :  { %v1726_v22 = vsel %vm1596_vm1, %v10556_v59, 0.0 }
 0x2d7   :  { %v10560_v57 = vpop.eup %9454  ;;  %1727 = vadd.xlane.f32.xlu1 %v1726_v22  ;;  %v10630_v63 = vpop.permute.xlu1 %2819 }
 0x2d8   :  { %v1723_v18 = vsel %vm1596_vm1, %v10560_v57, 0.0 }
 0x2d9   :  { %1724 = vadd.xlane.f32.xlu0 %v1723_v18  ;;  %v10632_v11 = vpop.permute.xlu0 %2722 }
 0x2dd   :  { %v10564_v1 = vpop.eup %9456 }
 0x2de   :  { %v1738_v9 = vsel %vm1596_vm1, %v10564_v1, 0.0 }
 0x2df   :  { %v10568_v30 = vpop.eup %9458  ;;  %1739 = vadd.xlane.f32.xlu1 %v1738_v9 }
 0x2e0   :  { %v1735_v35 = vsel %vm1596_vm1, %v10568_v30, 0.0 }
 0x2e1   :  { %1736 = vadd.xlane.f32.xlu0 %v1735_v35 }
 0x2f0   :  { %2910 = vrot.lane.b32.xlu1 %v10221_v39, %s9936_s17 }
 0x2f4   :  { %2908 = vrot.lane.b32.xlu1 %v10240_v43, %s9936_s17 }
 0x2f7   :  { %2724 = vrot.lane.b32.xlu0 %v10229_v41, %s9936_s17 }
 0x2f8   :  { %2815 = vrot.lane.b32.xlu1 %v10199_v36, %s9936_s17 }
 0x2fb   :  { %2817 = vrot.lane.b32.xlu0 %v10158_v24, %s9936_s17 }
 0x2fc   :  { %3001 = vrot.lane.b32.xlu1 %v10185_v32, %s9936_s17 }
 0x2ff   :  { %2813 = vrot.lane.b32.xlu0 %v10134_v15, %s9936_s17 }
 0x300   :  { %3092 = vrot.lane.b32.xlu1 %v10256_v45, %s9936_s17 }
 0x303   :  { %2904 = vrot.lane.b32.xlu0 %v10234_v42, %s9936_s17 }
 0x304   :  { %3090 = vrot.lane.b32.xlu1 %v10269_v50, %s9936_s17 }
 0x307   :  { %2906 = vrot.lane.b32.xlu0 %v10261_v46, %s9936_s17 }
 0x308   :  { %2997 = vrot.lane.b32.xlu1 %v10243_v44, %s9936_s17 }
 0x30b   :  { %2999 = vrot.lane.b32.xlu0 %v10210_v38, %s9936_s17 }
 0x30c   :  { %3088 = vrot.lane.b32.xlu1 %v10282_v52, %s9936_s17 }
 0x30f   :  { %2995 = vrot.lane.b32.xlu0 %v10193_v34, %s9936_s17 }
 0x310   :  { %3406 = vrot.lane.b32.xlu1 %v10322_v19, %s9936_s17 }
 0x313   :  { %3086 = vrot.lane.b32.xlu0 %v10266_v47, %s9936_s17 }
 0x314   :  { %3404 = vrot.lane.b32.xlu1 %v10319_v17, %s9936_s17 }
 0x317   :  { %3495 = vrot.lane.b32.xlu0 %v10316_v14, %s9936_s17 }
 0x318   :  { %3493 = vrot.lane.b32.xlu1 %v10313_v13, %s9936_s17 }
 0x31b   :  { %3582 = vrot.lane.b32.xlu0 %v10336_v27, %s9936_s17 }
 0x31c   :  { %3584 = vrot.lane.b32.xlu1 %v10342_v37, %s9936_s17 }
 0x31f   :  { %3762 = vrot.lane.b32.xlu0 %v10301_v0, %s9936_s17 }
 0x320   :  { %3673 = vrot.lane.b32.xlu1 %v10339_v29, %s9936_s17 }
 0x324   :  { %3671 = vrot.lane.b32.xlu1 %v10333_v26, %s9936_s17 }
 0x340   :  { %v1698_v2 = vpop.xlane.xlu1 %1697 }
 0x341   :  { %9460 = vrcp.f32 %v1698_v2 }
 0x344   :  { %v1695_v54 = vpop.xlane.xlu0 %1694 }
 0x345   :  { %9462 = vrcp.f32 %v1695_v54 }
 0x348   :  { %v1704_v56 = vpop.xlane.xlu1 %1703 }
 0x349   :  { %9464 = vrcp.f32 %v1704_v56 }
 0x34c   :  { %v1701_v22 = vpop.xlane.xlu0 %1700 }
 0x34d   :  { %9466 = vrcp.f32 %v1701_v22 }
 0x34e   :  { %v9461_v18 = vpop.eup %9460 }
 0x34f   :  { %v1744_v9 = vmul.f32 %v9461_v18, %v10497_v33 }
 0x350   :  { %v1710_v35 = vpop.xlane.xlu1 %1709 }
 0x351   :  { %9468 = vrcp.f32 %v1710_v35  ;;  %1774 = vst.msk [vmem:[#allocation17 + $0x8] sm:$0xff] %vm1596_vm1, %v1744_v9 }
 0x352   :  { %v9463_v14 = vpop.eup %9462  ;;  %v1707_v47 = vpop.xlane.xlu0 %1706 }
 0x353   :  { %9470 = vrcp.f32 %v1707_v47  ;;  %v1742_v34 = vmul.f32 %v9463_v14, %v10503_v25 }
 0x354   :  { %v1722_v38 = vpop.xlane.xlu1 %1721 }
 0x355   :  { %9472 = vrcp.f32 %v1722_v38  ;;  %1773 = vst.msk [vmem:[#allocation17] sm:$0xff] %vm1596_vm1, %v1742_v34  ;;  %8872 = vmatprep.mubr.msk.f32.mxu0 %vm1596_vm1, %v1742_v34 }
 0x356   :  { %v9465_v2 = vpop.eup %9464  ;;  %8873 = vmatmul.mubr.msk.f32.vlgmr.msra.gmra.mxu0 %vm1596_vm1, %v1744_v9  ;;  %v1719_v54 = vpop.xlane.xlu0 %1718 }
 0x357   :  { %8883 = vmatpush3.msra.mxu0 %v10342_v37  ;;  %9474 = vrcp.f32 %v1719_v54  ;;  %v1748_v33 = vmul.f32 %v9465_v2, %v10509_v16 }
 0x358   :  { %8884 = vmatprep.subr.mxu0 %v10336_v27  ;;  %v1716_v47 = vpop.xlane.xlu1 %1715 }
 0x359   :  { %9476 = vrcp.f32 %v1716_v47  ;;  %8885 = vmatpush3.msra.mxu0 %v10336_v27  ;;  %1776 = vst.msk [vmem:[#allocation17 + $0x48] sm:$0xff] %vm1596_vm1, %v1748_v33  ;;  %v10666_v47 = vadd.f32 %v10289_v49, %v10346_v40 }
 0x35a   :  { %v9467_v38 = vpop.eup %9466  ;;  %8896 = vmatprep.subr.mxu0 %v10301_v0  ;;  %v1713_v34 = vpop.xlane.xlu0 %1712 }
 0x35b   :  { %9478 = vrcp.f32 %v1713_v34  ;;  %v1746_v14 = vmul.f32 %v9467_v38, %v10515_v53  ;;  %12315 = vst [vmem:[#allocation89_spill] sm:$0xff] %v10666_v47 }
 0x35c   :  { %v1734_v25 = vpop.xlane.xlu1 %1733 }
 0x35d   :  { %9480 = vrcp.f32 %v1734_v25  ;;  %1775 = vst.msk [vmem:[#allocation17 + $0x40] sm:$0xff] %vm1596_vm1, %v1746_v14  ;;  %8879 = vmatprep.mubr.msk.f32.mxu1 %vm1596_vm1, %v1746_v14 }
 0x35e   :  { %v9469_v16 = vpop.eup %9468  ;;  %8880 = vmatmul.mubr.msk.f32.vlgmr.msra.gmra.mxu1 %vm1596_vm1, %v1748_v33  ;;  %v1731_v56 = vpop.xlane.xlu0 %1730 }
 0x35f   :  { %8890 = vmatpush3.msra.mxu1 %v10339_v29  ;;  %9482 = vrcp.f32 %v1731_v56  ;;  %v1752_v22 = vmul.f32 %v9469_v16, %v10521_v20 }
 0x360   :  { %v9471_v18 = vpop.eup %9470  ;;  %8891 = vmatprep.subr.mxu1 %v10333_v26  ;;  %v1728_v9 = vpop.xlane.xlu1 %1727 }
 0x361   :  { %9484 = vrcp.f32 %v1728_v9  ;;  %8892 = vmatpush3.msra.mxu1 %v10333_v26  ;;  %v1750_v53 = vmul.f32 %v9471_v18, %v10526_v61  ;;  %1778 = vst.msk [vmem:[#allocation17 + $0x88] sm:$0xff] %vm1596_vm1, %v1752_v22  ;;  %v12316_v9 = vld [vmem:[#allocation84_spill] sm:$0xff] }
 0x362   :  { %v9473_v35 = vpop.eup %9472  ;;  %8903 = vmatprep.subr.mxu1 %v10298_v48  ;;  %v1725_v2 = vpop.xlane.xlu0 %1724 }
 0x363   :  { %9486 = vrcp.f32 %v1725_v2  ;;  %1777 = vst.msk [vmem:[#allocation17 + $0x80] sm:$0xff] %vm1596_vm1, %v1750_v53  ;;  %8886 = vmatprep.mubr.msk.f32.mxu0 %vm1596_vm1, %v1750_v53  ;;  %v1760_v20 = vmul.f32 %v9473_v35, %v10530_v7 }
 0x364   :  { %v9475_v54 = vpop.eup %9474  ;;  %8887 = vmatmul.mubr.msk.f32.vlgmr.msra.gmra.mxu0 %vm1596_vm1, %v1752_v22 }
 0x365   :  { %8897 = vmatpush3.msra.mxu0 %v10301_v0  ;;  %v1758_v61 = vmul.f32 %v9475_v54, %v10534_v31  ;;  %1782 = vst.msk [vmem:[#allocation17 + $0x108] sm:$0xff] %vm1596_vm1, %v1760_v20  ;;  %v12319_v54 = vld [vmem:[#allocation85_spill] sm:$0xff] }
 0x366   :  { %v9477_v33 = vpop.eup %9476  ;;  %8898 = vmatprep.subr.mxu0 %v10295_v58 }
 0x367   :  { %8899 = vmatpush3.msra.mxu0 %v10295_v58  ;;  %1781 = vst.msk [vmem:[#allocation17 + $0x100] sm:$0xff] %vm1596_vm1, %v1758_v61  ;;  %8900 = vmatprep.mubr.msk.f32.mxu0 %vm1596_vm1, %v1758_v61  ;;  %v1756_v7 = vmul.f32 %v9477_v33, %v10539_v6 }
 0x368   :  { %v9479_v38 = vpop.eup %9478  ;;  %8910 = vmatprep.subr.mxu0 %v10666_v47  ;;  %v1740_v31 = vpop.xlane.xlu1 %1739  ;;  %8901 = vmatmul.mubr.msk.f32.vlgmr.msra.gmra.mxu0 %vm1596_vm1, %v1760_v20  ;;  %v12318_v20 = vld [vmem:[#allocation87_spill] sm:$0xff] }
 0x369   :  { %9488 = vrcp.f32 %v1740_v31  ;;  %8911 = vmatpush3.msra.mxu0 %v10666_v47  ;;  %v1754_v49 = vmul.f32 %v9479_v38, %v10544_v4  ;;  %1780 = vst.msk [vmem:[#allocation17 + $0xc8] sm:$0xff] %vm1596_vm1, %v1756_v7 }
 0x36a   :  { %v9481_v40 = vpop.eup %9480  ;;  %8912 = vmatprep.subr.mxu0 %v10307_v5  ;;  %v1737_v34 = vpop.xlane.xlu0 %1736 }
 0x36b   :  { %8913 = vmatpush3.msra.mxu0 %v10307_v5  ;;  %9490 = vrcp.f32 %v1737_v34  ;;  %1779 = vst.msk [vmem:[#allocation17 + $0xc0] sm:$0xff] %vm1596_vm1, %v1754_v49  ;;  %8893 = vmatprep.mubr.msk.f32.mxu1 %vm1596_vm1, %v1754_v49  ;;  %v1768_v6 = vmul.f32 %v9481_v40, %v10548_v23  ;;  %v12323_v49 = vld [vmem:[#allocation86_spill] sm:$0xff] }
 0x36c   :  { %v9483_v14 = vpop.eup %9482  ;;  %8924 = vmatprep.subr.msk.mxu0 %vm867_vm0, %v10486_v21  ;;  %v10685_v4 = vpop.permute.xlu1 %2910  ;;  %8894 = vmatmul.mubr.msk.f32.vlgmr.msra.gmra.mxu1 %vm1596_vm1, %v1756_v7 }
 0x36d   :  { %8904 = vmatpush3.msra.mxu1 %v10298_v48  ;;  %v1766_v25 = vmul.f32 %v9483_v14, %v10552_v12  ;;  %1786 = vst.msk [vmem:[#allocation17 + $0x188] sm:$0xff] %vm1596_vm1, %v1768_v6 }
 0x36e   :  { %v9485_v16 = vpop.eup %9484  ;;  %8905 = vmatprep.subr.mxu1 %v10292_v55  ;;  %v10692_v56 = vpop.permute.xlu0 %2724 }
 0x36f   :  { %8906 = vmatpush3.msra.mxu1 %v10292_v55  ;;  %1785 = vst.msk [vmem:[#allocation17 + $0x180] sm:$0xff] %vm1596_vm1, %v1766_v25  ;;  %8914 = vmatprep.mubr.msk.f32.mxu0 %vm1596_vm1, %v1766_v25  ;;  %v1764_v23 = vmul.f32 %v9485_v16, %v10556_v59 }
 0x370   :  { %v9487_v22 = vpop.eup %9486  ;;  %8917 = vmatprep.subr.mxu1 %v10310_v8  ;;  %v10699_v18 = vpop.permute.xlu1 %2908  ;;  %8915 = vmatmul.mubr.msk.f32.vlgmr.msra.gmra.mxu0 %vm1596_vm1, %v1768_v6 }
 0x371   :  { %8925 = vmatpush3.xpose.msk.msra.mxu0 %vm867_vm0, %v10486_v21  ;;  %8928 = vmatprep.mubr.msk.f32.mxu0 %vm867_vm0, %v10478_v28  ;;  %v1762_v12 = vmul.f32 %v9487_v22, %v10560_v57  ;;  %1784 = vst.msk [vmem:[#allocation17 + $0x148] sm:$0xff] %vm1596_vm1, %v1764_v23  ;;  %v12317_v28 = vld [vmem:[#allocation56_spill] sm:$0xff] }
 0x372   :  { %8926 = vmatprep.subr.msk.mxu0 %vm867_vm0, %v12316_v9  ;;  %v2818_v59 = vpop.permute.xlu0 %2817 }
 0x373   :  { %1783 = vst.msk [vmem:[#allocation17 + $0x140] sm:$0xff] %vm1596_vm1, %v1762_v12  ;;  %8907 = vmatprep.mubr.msk.f32.mxu1 %vm1596_vm1, %v1762_v12 }
 0x374   :  { %v2816_v53 = vpop.permute.xlu1 %2815  ;;  %8908 = vmatmul.mubr.msk.f32.vlgmr.msra.gmra.mxu1 %vm1596_vm1, %v1764_v23  ;;  %v12340_v23 = vld [vmem:[#allocation69_spill] sm:$0xff] }
 0x375   :  { %8918 = vmatpush3.msra.mxu1 %v10310_v8  ;;  %8927 = vmatpush3.xpose.msk.msra.mxu0 %vm867_vm0, %v12316_v9 }
 0x376   :  { %v9489_v21 = vpop.eup %9488  ;;  %8919 = vmatprep.subr.mxu1 %v12317_v28  ;;  %8938 = vmatprep.subr.msk.mxu0 %vm867_vm0, %v10491_v3  ;;  %v2814_v57 = vpop.permute.xlu0 %2813 }
 0x377   :  { %8920 = vmatpush3.msra.mxu1 %v12317_v28  ;;  %v1772_v35 = vmul.f32 %v9489_v21, %v10564_v1 }
 0x378   :  { %v9491_v2 = vpop.eup %9490  ;;  %8929 = vmatmul.mubr.msk.f32.vlgmr.msra.gmra.mxu0 %vm867_vm0, %v12318_v20  ;;  %8931 = vmatprep.subr.msk.mxu1 %vm867_vm0, %v12319_v54  ;;  %v3002_v61 = vpop.permute.xlu1 %3001 }
 0x379   :  { %8939 = vmatpush3.xpose.msk.msra.mxu0 %vm867_vm0, %v10491_v3  ;;  %8942 = vmatprep.mubr.msk.f32.mxu0 %vm867_vm0, %v10628_v51  ;;  %v1770_v33 = vmul.f32 %v9491_v2, %v10568_v30  ;;  %1788 = vst.msk [vmem:[#allocation17 + $0x1c8] sm:$0xff] %vm1596_vm1, %v1772_v35  ;;  %v12320_v3 = vld [vmem:[#allocation82_spill] sm:$0xff]  ;;  %v12321_v30 = vld [vmem:[#allocation83_spill] sm:$0xff] }
 0x37a   :  { %8940 = vmatprep.subr.msk.mxu0 %vm867_vm0, %v10624_v10  ;;  %v2905_v1 = vpop.permute.xlu0 %2904 }
 0x37b   :  { %1787 = vst.msk [vmem:[#allocation17 + $0x1c0] sm:$0xff] %vm1596_vm1, %v1770_v33  ;;  %8921 = vmatprep.mubr.msk.f32.mxu1 %vm1596_vm1, %v1770_v33 }
 0x37c   :  { %v3093_v7 = vpop.permute.xlu1 %3092  ;;  %8922 = vmatmul.mubr.msk.f32.vlgmr.msra.gmra.mxu1 %vm1596_vm1, %v1772_v35 }
 0x37d   :  { %8932 = vmatpush3.xpose.msk.msra.mxu1 %vm867_vm0, %v12319_v54  ;;  %8941 = vmatpush3.xpose.msk.msra.mxu0 %vm867_vm0, %v10624_v10  ;;  %v12322_v10 = vld [vmem:[#allocation88_spill] sm:$0xff] }
 0x37e   :  { %8933 = vmatprep.subr.msk.mxu1 %vm867_vm0, %v12320_v3  ;;  %8935 = vmatprep.mubr.msk.f32.mxu1 %vm867_vm0, %v12321_v30  ;;  %v2907_v51 = vpop.permute.xlu0 %2906 }
 0x37f   :  { %8952 = vmatprep.subr.msk.mxu0 %vm867_vm0, %v10630_v63 }
 0x380   :  { %8943 = vmatmul.mubr.msk.f32.vlgmr.msra.gmra.mxu0 %vm867_vm0, %v10626_v60  ;;  %v3091_v38 = vpop.permute.xlu1 %3090 }
 0x381   :  { %8934 = vmatpush3.xpose.msk.msra.mxu1 %vm867_vm0, %v12320_v3  ;;  %8953 = vmatpush3.xpose.msk.msra.mxu0 %vm867_vm0, %v10630_v63 }
 0x382   :  { %8956 = vmatprep.mubr.msk.f32.mxu0 %vm867_vm0, %v2814_v57  ;;  %8945 = vmatprep.subr.msk.mxu1 %vm867_vm0, %v12322_v10  ;;  %v3000_v31 = vpop.permute.xlu0 %2999 }
 0x383   :  { %8954 = vmatprep.subr.msk.mxu0 %vm867_vm0, %v2818_v59 }
 0x384   :  { %8936 = vmatmul.mubr.msk.f32.vlgmr.msra.gmra.mxu1 %vm867_vm0, %v12323_v49  ;;  %v2998_v40 = vpop.permute.xlu1 %2997  ;;  %v12333_v49 = vld [vmem:[#allocation66_spill] sm:$0xff] }
 0x385   :  { %8946 = vmatpush3.xpose.msk.msra.mxu1 %vm867_vm0, %v12322_v10  ;;  %8949 = vmatprep.mubr.msk.f32.mxu1 %vm867_vm0, %v10632_v11 }
 0x386   :  { %8955 = vmatpush3.xpose.msk.msra.mxu0 %vm867_vm0, %v2818_v59  ;;  %8947 = vmatprep.subr.msk.mxu1 %vm867_vm0, %v10622_v62  ;;  %v2996_v60 = vpop.permute.xlu0 %2995 }
 0x387   :  { %8966 = vmatprep.subr.msk.mxu0 %vm867_vm0, %v3002_v61 }
 0x388   :  { %v3089_v63 = vpop.permute.xlu1 %3088 }
 0x389   :  { %8957 = vmatmul.mubr.msk.f32.vlgmr.msra.gmra.mxu0 %vm867_vm0, %v2816_v53  ;;  %8948 = vmatpush3.xpose.msk.msra.mxu1 %vm867_vm0, %v10622_v62 }
 0x38a   :  { %8967 = vmatpush3.xpose.msk.msra.mxu0 %vm867_vm0, %v3002_v61  ;;  %8970 = vmatprep.mubr.msk.f32.mxu0 %vm867_vm0, %v2996_v60  ;;  %v3087_v34 = vpop.permute.xlu0 %3086 }
 0x38b   :  { %8959 = vmatprep.subr.msk.mxu1 %vm867_vm0, %v10685_v4  ;;  %8968 = vmatprep.subr.msk.mxu0 %vm867_vm0, %v3000_v31 }
 0x38c   :  { %8950 = vmatmul.mubr.msk.f32.vlgmr.msra.gmra.mxu1 %vm867_vm0, %v10692_v56  ;;  %v3407_v11 = vpop.permute.xlu1 %3406 }
 0x38d   :  { %8960 = vmatpush3.xpose.msk.msra.mxu1 %vm867_vm0, %v10685_v4  ;;  %8963 = vmatprep.mubr.msk.f32.mxu1 %vm867_vm0, %v2905_v1  ;;  %v12337_v1 = vld [vmem:[#allocation70_spill] sm:$0xff] }
 0x38e   :  { %8969 = vmatpush3.xpose.msk.msra.mxu0 %vm867_vm0, %v3000_v31  ;;  %8961 = vmatprep.subr.msk.mxu1 %vm867_vm0, %v10699_v18  ;;  %v3496_v4 = vpop.permute.xlu0 %3495 }
 0x38f   :  { %8980 = vmatprep.subr.mxu0 %v3407_v11 }
 0x390   :  { %v3405_v62 = vpop.permute.xlu1 %3404 }
 0x391   :  { %8971 = vmatmul.mubr.msk.f32.vlgmr.msra.gmra.mxu0 %vm867_vm0, %v2998_v40  ;;  %8962 = vmatpush3.xpose.msk.msra.mxu1 %vm867_vm0, %v10699_v18 }
 0x392   :  { %8981 = vmatpush3.msra.mxu0 %v3407_v11  ;;  %8973 = vmatprep.subr.msk.mxu1 %vm867_vm0, %v3093_v7  ;;  %v12335_v11 = vld [vmem:[#allocation67_spill] sm:$0xff] }
 0x393   :  { %8982 = vmatprep.subr.mxu0 %v3405_v62 }
 0x394   :  { %8983 = vmatpush3.msra.mxu0 %v3405_v62  ;;  %8964 = vmatmul.mubr.msk.f32.vlgmr.msra.gmra.mxu1 %vm867_vm0, %v2907_v51  ;;  %v3494_v6 = vpop.permute.xlu1 %3493 }
 0x395   :  { %8974 = vmatpush3.xpose.msk.msra.mxu1 %vm867_vm0, %v3093_v7  ;;  %8977 = vmatprep.mubr.msk.f32.mxu1 %vm867_vm0, %v3087_v34 }
 0x396   :  { %8975 = vmatprep.subr.msk.mxu1 %vm867_vm0, %v3091_v38 }
 0x398   :  { %v10790_v14 = vpop.permute.xlu1 %3584 }
 0x399   :  { %8976 = vmatpush3.xpose.msk.msra.mxu1 %vm867_vm0, %v3091_v38  ;;  %8994 = vmatprep.subr.mxu0 %v10790_v14 }
 0x39a   :  { %8987 = vmatprep.subr.mxu1 %v3496_v4 }
 0x39c   :  { %8978 = vmatmul.mubr.msk.f32.vlgmr.msra.gmra.mxu1 %vm867_vm0, %v3089_v63  ;;  %v10795_v25 = vpop.permute.xlu1 %3673 }
 0x39d   :  { %8988 = vmatpush3.msra.mxu1 %v3496_v4 }
 0x39e   :  { %8989 = vmatprep.subr.mxu1 %v3494_v6 }
 0x39f   :  { %8990 = vmatpush3.msra.mxu1 %v3494_v6 }
 0x3a0   :  { %9001 = vmatprep.subr.mxu1 %v10795_v25 }
 0x416   :  { %v10798_v16 = vpop.f32.mrf.mxu0 }
 0x418   :  { %v10800_v56 = vpop.f32.mrf.mxu0 }
 0x41e   :  { %v10804_v22 = vpop.f32.mrf.mxu1 }
 0x420   :  { %v10806_v18 = vpop.f32.mrf.mxu1 }
 0x424   :  { %v10810_v9 = vpop.f32.mrf.mxu0 }
 0x426   :  { %v10812_v59 = vpop.f32.mrf.mxu0 }
 0x427   :  { %12324 = vst [vmem:[#allocation84_spill] sm:$0xff] %v10812_v59 }
 0x428   :  { %v10816_v21 = vpop.f32.mrf.mxu0 }
 0x429   :  { %12325 = vst [vmem:[#allocation56_spill] sm:$0xff] %v10816_v21 }
 0x42a   :  { %v10818_v57 = vpop.f32.mrf.mxu0 }
 0x42b   :  { %12326 = vst [vmem:[#allocation87_spill] sm:$0xff] %v10818_v57  ;;  %v12346_v57 = vld [vmem:[#allocation78_spill] sm:$0xff] }
 0x42c   :  { %v10822_v2 = vpop.f32.mrf.mxu1 }
 0x42d   :  { %12327 = vst [vmem:[#allocation85_spill] sm:$0xff] %v10822_v2 }
 0x42e   :  { %v10824_v20 = vpop.f32.mrf.mxu1 }
 0x42f   :  { %12328 = vst [vmem:[#allocation82_spill] sm:$0xff] %v10824_v20 }
 0x430   :  { %v10828_v61 = vpop.f32.mrf.mxu0 }
 0x431   :  { %12329 = vst [vmem:[#allocation83_spill] sm:$0xff] %v10828_v61 }
 0x432   :  { %v10830_v33 = vpop.f32.mrf.mxu0 }
 0x433   :  { %12330 = vst [vmem:[#allocation88_spill] sm:$0xff] %v10830_v33 }
 0x434   :  { %v10834_v7 = vpop.f32.mrf.mxu1 }
 0x435   :  { %12331 = vst [vmem:[#allocation86_spill] sm:$0xff] %v10834_v7 }
 0x436   :  { %v10836_v3 = vpop.f32.mrf.mxu1 }
 0x437   :  { %12332 = vst [vmem:[#allocation90_spill] sm:$0xff] %v10836_v3 }
 0x438   :  { %v8930_v51 = vpop.f32.mrf.mxu0 }
 0x439   :  { %v3178_v38 = vmul.f32 0.17677669, %v8930_v51 }
 0x43a   :  { %v2531_v10 = vpop.f32.mrf.mxu0 }
 0x43b   :  { %v3177_v31 = vmul.f32 0.17677669, %v2531_v10  ;;  %v10841_v40 = vadd.f32 %v3178_v38, %v12333_v49 }
 0x43c   :  { %v10843_v60 = vpop.f32.mrf.mxu1 }
 0x43d   :  { %12334 = vst [vmem:[#allocation66_spill] sm:$0xff] %v10843_v60  ;;  %v3212_v63 = vsel %vm1596_vm1, %v10841_v40, -inf  ;;  %v10848_v62 = vadd.f32 %v3177_v31, %v12335_v11  ;;  %v12338_v11 = vld [vmem:[#allocation71_spill] sm:$0xff] }
 0x43e   :  { %3213 = vmax.xlane.f32.xlu1 %v3212_v63  ;;  %v10850_v34 = vpop.f32.mrf.mxu1 }
 0x43f   :  { %12336 = vst [vmem:[#allocation67_spill] sm:$0xff] %v10850_v34  ;;  %v3209_v4 = vsel %vm1596_vm1, %v10848_v62, -inf }
 0x440   :  { %3210 = vmax.xlane.f32.xlu0 %v3209_v4  ;;  %v8944_v51 = vpop.f32.mrf.mxu0 }
 0x441   :  { %v3182_v38 = vmul.f32 0.17677669, %v8944_v51  ;;  %v12339_v51 = vld [vmem:[#allocation68_spill] sm:$0xff] }
 0x442   :  { %v2713_v10 = vpop.f32.mrf.mxu0 }
 0x443   :  { %v3181_v49 = vmul.f32 0.17677669, %v2713_v10  ;;  %v10857_v30 = vadd.f32 %v3182_v38, %v12337_v1 }
 0x444   :  { %v8937_v35 = vpop.f32.mrf.mxu1 }
 0x445   :  { %v3180_v31 = vmul.f32 0.17677669, %v8937_v35  ;;  %v3224_v63 = vsel %vm1596_vm1, %v10857_v30, -inf  ;;  %v10862_v54 = vadd.f32 %v3181_v49, %v12338_v11 }
 0x446   :  { %3225 = vmax.xlane.f32.xlu1 %v3224_v63  ;;  %v2622_v6 = vpop.f32.mrf.mxu1 }
 0x447   :  { %v3179_v53 = vmul.f32 0.17677669, %v2622_v6  ;;  %v3221_v4 = vsel %vm1596_vm1, %v10862_v54, -inf  ;;  %v10867_v12 = vadd.f32 %v3180_v31, %v12339_v51  ;;  %v12341_v6 = vld [vmem:[#allocation72_spill] sm:$0xff] }
 0x448   :  { %3222 = vmax.xlane.f32.xlu0 %v3221_v4 }
 0x449   :  { %v8958_v1 = vpop.f32.mrf.mxu0  ;;  %v3218_v35 = vsel %vm1596_vm1, %v10867_v12, -inf  ;;  %v10872_v34 = vadd.f32 %v3179_v53, %v12340_v23  ;;  %v12343_v23 = vld [vmem:[#allocation73_spill] sm:$0xff] }
 0x44a   :  { %v3186_v38 = vmul.f32 0.17677669, %v8958_v1  ;;  %v12342_v1 = vld [vmem:[#allocation74_spill] sm:$0xff] }
 0x44b   :  { %v2895_v10 = vpop.f32.mrf.mxu0  ;;  %v3215_v51 = vsel %vm1596_vm1, %v10872_v34, -inf }
 0x44c   :  { %v3185_v49 = vmul.f32 0.17677669, %v2895_v10  ;;  %3219 = vmax.xlane.f32.xlu0 %v3218_v35  ;;  %v8951_v63 = vpop.f32.mrf.mxu1  ;;  %v10875_v11 = vadd.f32 %v3186_v38, %v12341_v6  ;;  %v12344_v6 = vld [vmem:[#allocation75_spill] sm:$0xff] }
 0x44d   :  { %v3184_v60 = vmul.f32 0.17677669, %v8951_v63 }
 0x44e   :  { %v2804_v33 = vpop.f32.mrf.mxu1  ;;  %v3236_v31 = vsel %vm1596_vm1, %v10875_v11, -inf  ;;  %v10885_v53 = vadd.f32 %v3185_v49, %v12343_v23 }
 0x44f   :  { %v3183_v4 = vmul.f32 0.17677669, %v2804_v33  ;;  %3237 = vmax.xlane.f32.xlu1 %v3236_v31  ;;  %v10882_v61 = vadd.f32 %v3184_v60, %v12342_v1  ;;  %v12345_v1 = vld [vmem:[#allocation76_spill] sm:$0xff] }
 0x450   :  { %3216 = vmax.xlane.f32.xlu0 %v3215_v51  ;;  %v3233_v33 = vsel %vm1596_vm1, %v10885_v53, -inf }
 0x451   :  { %v8972_v10 = vpop.f32.mrf.mxu0  ;;  %v3230_v38 = vsel %vm1596_vm1, %v10882_v61, -inf  ;;  %v10892_v31 = vadd.f32 %v3183_v4, %v12344_v6  ;;  %v12347_v4 = vld [vmem:[#allocation77_spill] sm:$0xff]  ;;  %v12348_v6 = vld [vmem:[#allocation79_spill] sm:$0xff] }
 0x452   :  { %v3190_v35 = vmul.f32 0.17677669, %v8972_v10 }
 0x453   :  { %3231 = vmax.xlane.f32.xlu1 %v3230_v38  ;;  %v3077_v63 = vpop.f32.mrf.mxu0  ;;  %v3227_v38 = vsel %vm1596_vm1, %v10892_v31, -inf }
 0x454   :  { %v3189_v3 = vmul.f32 0.17677669, %v3077_v63  ;;  %3234 = vmax.xlane.f32.xlu0 %v3233_v33  ;;  %v8965_v60 = vpop.f32.mrf.mxu1  ;;  %v10895_v49 = vadd.f32 %v3190_v35, %v12345_v1 }
 0x455   :  { %v3188_v51 = vmul.f32 0.17677669, %v8965_v60 }
 0x456   :  { %v2986_v23 = vpop.f32.mrf.mxu1  ;;  %v3248_v7 = vsel %vm1596_vm1, %v10895_v49, -inf  ;;  %v10905_v63 = vadd.f32 %v3189_v3, %v12347_v4  ;;  %v12350_v4 = vld [vmem:[#allocation81_spill] sm:$0xff] }
 0x457   :  { %v3187_v10 = vmul.f32 0.17677669, %v2986_v23  ;;  %3249 = vmax.xlane.f32.xlu1 %v3248_v7  ;;  %v10902_v21 = vadd.f32 %v3188_v51, %v12346_v57  ;;  %v12349_v51 = vld [vmem:[#allocation80_spill] sm:$0xff] }
 0x458   :  { %3228 = vmax.xlane.f32.xlu0 %v3227_v38  ;;  %v3245_v33 = vsel %vm1596_vm1, %v10905_v63, -inf }
 0x459   :  { %v3242_v35 = vsel %vm1596_vm1, %v10902_v21, -inf  ;;  %v10912_v60 = vadd.f32 %v3187_v10, %v12348_v6  ;;  %v10936_v6 = vpop.permute.xlu0 %3582 }
 0x45b   :  { %3243 = vmax.xlane.f32.xlu1 %v3242_v35  ;;  %v3239_v7 = vsel %vm1596_vm1, %v10912_v60, -inf }
 0x45c   :  { %3246 = vmax.xlane.f32.xlu0 %v3245_v33  ;;  %v8979_v57 = vpop.f32.mrf.mxu1 }
 0x45d   :  { %v3192_v3 = vmul.f32 0.17677669, %v8979_v57  ;;  %v10940_v57 = vpop.permute.xlu0 %3762 }
 0x45e   :  { %v3168_v1 = vpop.f32.mrf.mxu1 }
 0x45f   :  { %v10921_v23 = vadd.f32 %v3192_v3, %v12349_v51  ;;  %v3191_v38 = vmul.f32 0.17677669, %v3168_v1 }
 0x460   :  { %3240 = vmax.xlane.f32.xlu0 %v3239_v7  ;;  %v10938_v7 = vpop.permute.xlu1 %3671 }
 0x461   :  { %v3254_v10 = vsel %vm1596_vm1, %v10921_v23, -inf  ;;  %v10926_v35 = vadd.f32 %v3191_v38, %v12350_v4 }
 0x463   :  { %v3251_v33 = vsel %vm1596_vm1, %v10926_v35, -inf }
 0x46c   :  { %3851 = vrot.lane.b32.xlu1 %v10298_v48, %s9936_s17 }
 0x476   :  { %3760 = vrot.lane.b32.xlu0 %v10295_v58, %s9936_s17 }
 0x490   :  { %3255 = vmax.xlane.f32.xlu1 %v3254_v10 }
 0x495   :  { %3252 = vmax.xlane.f32.xlu0 %v3251_v33 }
 0x4a1   :  { %3849 = vrot.lane.b32.xlu1 %v10292_v55, %s9936_s17 }
 0x4a5   :  { %4029 = vrot.lane.b32.xlu1 %v10310_v8, %s9936_s17 }
 0x4ab   :  { %3940 = vrot.lane.b32.xlu0 %v10666_v47, %s9936_s17 }
 0x4c7   :  { %v3214_v3 = vpop.xlane.xlu1 %3213 }
 0x4c8   :  { %v3258_v1 = vsub.f32 %v10841_v40, %v3214_v3 }
 0x4c9   :  { %v3211_v51 = vpop.xlane.xlu0 %3210 }
 0x4ca   :  { %v3275_v38 = vmul.f32 1.442695, %v3258_v1  ;;  %v3257_v10 = vsub.f32 %v10848_v62, %v3211_v51 }
 0x4cc   :  { %9492 = vpow2.f32 %v3275_v38  ;;  %v3273_v4 = vmul.f32 1.442695, %v3257_v10 }
 0x4ce   :  { %9494 = vpow2.f32 %v3273_v4 }
 0x4cf   :  { %v3226_v33 = vpop.xlane.xlu1 %3225 }
 0x4d0   :  { %v3262_v8 = vsub.f32 %v10857_v30, %v3226_v33 }
 0x4d1   :  { %v3223_v47 = vpop.xlane.xlu0 %3222 }
 0x4d2   :  { %v3283_v58 = vmul.f32 1.442695, %v3262_v8  ;;  %v3261_v55 = vsub.f32 %v10862_v54, %v3223_v47 }
 0x4d4   :  { %9496 = vpow2.f32 %v3283_v58  ;;  %v3281_v20 = vmul.f32 1.442695, %v3261_v55 }
 0x4d5   :  { %v3220_v2 = vpop.xlane.xlu0 %3219 }
 0x4d6   :  { %9498 = vpow2.f32 %v3281_v20  ;;  %v3260_v40 = vsub.f32 %v10867_v12, %v3220_v2 }
 0x4d8   :  { %v3279_v3 = vmul.f32 1.442695, %v3260_v40  ;;  %v3238_v1 = vpop.xlane.xlu1 %3237 }
 0x4d9   :  { %v10947_v59 = vpop.eup %9492  ;;  %v3266_v62 = vsub.f32 %v10875_v11, %v3238_v1  ;;  %v3217_v51 = vpop.xlane.xlu0 %3216 }
 0x4da   :  { %9500 = vpow2.f32 %v3279_v3  ;;  %v3259_v30 = vsub.f32 %v10872_v34, %v3217_v51  ;;  %v3308_v8 = vsel %vm1596_vm1, %v10947_v59, 0.0 }
 0x4db   :  { %v10953_v47 = vpop.eup %9494  ;;  %v3291_v55 = vmul.f32 1.442695, %v3266_v62  ;;  %3309 = vadd.xlane.f32.xlu1 %v3308_v8 }
 0x4dc   :  { %v3277_v58 = vmul.f32 1.442695, %v3259_v30  ;;  %v3232_v20 = vpop.xlane.xlu1 %3231  ;;  %v3305_v12 = vsel %vm1596_vm1, %v10953_v47, 0.0 }
 0x4dd   :  { %9502 = vpow2.f32 %v3291_v55  ;;  %v3264_v2 = vsub.f32 %v10882_v61, %v3232_v20  ;;  %3306 = vadd.xlane.f32.xlu0 %v3305_v12  ;;  %v3235_v54 = vpop.xlane.xlu0 %3234 }
 0x4de   :  { %9504 = vpow2.f32 %v3277_v58  ;;  %v3265_v34 = vsub.f32 %v10885_v53, %v3235_v54 }
 0x4df   :  { %v3287_v11 = vmul.f32 1.442695, %v3264_v2 }
 0x4e0   :  { %v3289_v38 = vmul.f32 1.442695, %v3265_v34  ;;  %v3250_v10 = vpop.xlane.xlu1 %3249 }
 0x4e1   :  { %v10959_v4 = vpop.eup %9496  ;;  %9506 = vpow2.f32 %v3287_v11  ;;  %v3270_v33 = vsub.f32 %v10895_v49, %v3250_v10  ;;  %v3229_v40 = vpop.xlane.xlu0 %3228 }
 0x4e2   :  { %9508 = vpow2.f32 %v3289_v38  ;;  %v3263_v3 = vsub.f32 %v10892_v31, %v3229_v40  ;;  %v3320_v61 = vsel %vm1596_vm1, %v10959_v4, 0.0 }
 0x4e3   :  { %v10965_v1 = vpop.eup %9498  ;;  %v3299_v62 = vmul.f32 1.442695, %v3270_v33  ;;  %3321 = vadd.xlane.f32.xlu1 %v3320_v61 }
 0x4e4   :  { %v3285_v53 = vmul.f32 1.442695, %v3263_v3  ;;  %v3244_v51 = vpop.xlane.xlu1 %3243  ;;  %v3317_v30 = vsel %vm1596_vm1, %v10965_v1, 0.0 }
 0x4e5   :  { %9510 = vpow2.f32 %v3299_v62  ;;  %v3268_v8 = vsub.f32 %v10902_v21, %v3244_v51  ;;  %3318 = vadd.xlane.f32.xlu0 %v3317_v30  ;;  %v3247_v49 = vpop.xlane.xlu0 %3246 }
 0x4e6   :  { %9512 = vpow2.f32 %v3285_v53  ;;  %v3269_v31 = vsub.f32 %v10905_v63, %v3247_v49 }
 0x4e7   :  { %v10971_v55 = vpop.eup %9500  ;;  %v3295_v58 = vmul.f32 1.442695, %v3268_v8 }
 0x4e8   :  { %v3297_v20 = vmul.f32 1.442695, %v3269_v31  ;;  %v3314_v12 = vsel %vm1596_vm1, %v10971_v55, 0.0 }
 0x4e9   :  { %9514 = vpow2.f32 %v3295_v58  ;;  %3315 = vadd.xlane.f32.xlu1 %v3314_v12  ;;  %v3241_v2 = vpop.xlane.xlu0 %3240  ;;  %v12352_v12 = vld [vmem:[#allocation27_spill] sm:$0xff] }
 0x4ea   :  { %v10975_v54 = vpop.eup %9502  ;;  %9516 = vpow2.f32 %v3297_v20  ;;  %v3267_v21 = vsub.f32 %v10912_v60, %v3241_v2  ;;  %v12351_v20 = vld [vmem:[#allocation32_spill] sm:$0xff]  ;;  %v11018_v2 = vpop.permute.xlu1 %3851 }
 0x4eb   :  { %v10978_v34 = vpop.eup %9504  ;;  %v3332_v63 = vsel %vm1596_vm1, %v10975_v54, 0.0 }
 0x4ec   :  { %v3293_v11 = vmul.f32 1.442695, %v3267_v21  ;;  %v3311_v38 = vsel %vm1596_vm1, %v10978_v34, 0.0  ;;  %v12353_v21 = vld [vmem:[#allocation33_spill] sm:$0xff] }
 0x4ed   :  { %3333 = vadd.xlane.f32.xlu1 %v3332_v63  ;;  %3312 = vadd.xlane.f32.xlu0 %v3311_v38  ;;  %v11022_v63 = vpop.permute.xlu0 %3760 }
 0x4ee   :  { %v10984_v10 = vpop.eup %9506  ;;  %9518 = vpow2.f32 %v3293_v11 }
 0x4ef   :  { %v10986_v33 = vpop.eup %9508  ;;  %v3326_v40 = vsel %vm1596_vm1, %v10984_v10, 0.0 }
 0x4f0   :  { %v3329_v60 = vsel %vm1596_vm1, %v10986_v33, 0.0 }
 0x4f1   :  { %3327 = vadd.xlane.f32.xlu1 %v3326_v40  ;;  %3330 = vadd.xlane.f32.xlu0 %v3329_v60  ;;  %v12354_v40 = vld [vmem:[#allocation35_spill] sm:$0xff] }
 0x4f2   :  { %v10992_v3 = vpop.eup %9510 }
 0x4f3   :  { %v10994_v61 = vpop.eup %9512  ;;  %v3344_v62 = vsel %vm1596_vm1, %v10992_v3, 0.0 }
 0x4f4   :  { %v3323_v53 = vsel %vm1596_vm1, %v10994_v61, 0.0 }
 0x4f5   :  { %3345 = vadd.xlane.f32.xlu1 %v3344_v62  ;;  %3324 = vadd.xlane.f32.xlu0 %v3323_v53  ;;  %v12355_v62 = vld [vmem:[#allocation34_spill] sm:$0xff] }
 0x4f6   :  { %v11000_v51 = vpop.eup %9514 }
 0x4f7   :  { %v11002_v30 = vpop.eup %9516  ;;  %v3338_v8 = vsel %vm1596_vm1, %v11000_v51, 0.0 }
 0x4f8   :  { %v3341_v49 = vsel %vm1596_vm1, %v11002_v30, 0.0 }
 0x4f9   :  { %3339 = vadd.xlane.f32.xlu1 %v3338_v8  ;;  %3342 = vadd.xlane.f32.xlu0 %v3341_v49 }
 0x4fb   :  { %v11008_v31 = vpop.eup %9518 }
 0x4fc   :  { %v3335_v58 = vsel %vm1596_vm1, %v11008_v31, 0.0 }
 0x4fd   :  { %3336 = vadd.xlane.f32.xlu0 %v3335_v58  ;;  %v12356_v58 = vld [vmem:[#allocation43_spill] sm:$0xff] }
 0x50a   :  { %4027 = vrot.lane.b32.xlu1 %v12317_v28, %s9936_s17 }
 0x50e   :  { %4489 = vrot.lane.b32.xlu1 %v12351_v20, %s9926_s30 }
 0x512   :  { %4487 = vrot.lane.b32.xlu1 %v12352_v12, %s9926_s30 }
 0x516   :  { %4394 = vrot.lane.b32.xlu1 %v12353_v21, %s9926_s30  ;;  %v12357_v21 = vld [vmem:[#allocation39_spill] sm:$0xff] }
 0x519   :  { %v3256_v11 = vpop.xlane.xlu1 %3255 }
 0x51a   :  { %v3272_v38 = vsub.f32 %v10921_v23, %v3256_v11  ;;  %4580 = vrot.lane.b32.xlu1 %v12354_v40, %s9926_s30  ;;  %v12358_v23 = vld [vmem:[#allocation36_spill] sm:$0xff] }
 0x51c   :  { %v3303_v60 = vmul.f32 1.442695, %v3272_v38 }
 0x51e   :  { %9520 = vpow2.f32 %v3303_v60  ;;  %4671 = vrot.lane.b32.xlu1 %v12355_v62, %s9926_s30  ;;  %v3253_v53 = vpop.xlane.xlu0 %3252 }
 0x51f   :  { %v3271_v8 = vsub.f32 %v10926_v35, %v3253_v53  ;;  %v12359_v53 = vld [vmem:[#allocation31_spill] sm:$0xff] }
 0x521   :  { %v3301_v49 = vmul.f32 1.442695, %v3271_v8  ;;  %v12360_v8 = vld [vmem:[#allocation29_spill] sm:$0xff] }
 0x522   :  { %4669 = vrot.lane.b32.xlu1 %v12356_v58, %s9926_s30 }
 0x523   :  { %9522 = vpow2.f32 %v3301_v49  ;;  %v12361_v49 = vld [vmem:[#allocation28_spill] sm:$0xff] }
 0x526   :  { %4576 = vrot.lane.b32.xlu1 %v12357_v21, %s9926_s30 }
 0x52a   :  { %4762 = vrot.lane.b32.xlu1 %v12358_v23, %s9926_s30 }
 0x52b   :  { %v11036_v11 = vpop.eup %9520 }
 0x52c   :  { %v3350_v38 = vsel %vm1596_vm1, %v11036_v11, 0.0 }
 0x52d   :  { %3351 = vadd.xlane.f32.xlu0 %v3350_v38  ;;  %v12362_v38 = vld [vmem:[#allocation26_spill] sm:$0xff] }
 0x52e   :  { %4853 = vrot.lane.b32.xlu1 %v10221_v39, %s9926_s30 }
 0x530   :  { %v11042_v35 = vpop.eup %9522 }
 0x531   :  { %v3347_v60 = vsel %vm1596_vm1, %v11042_v35, 0.0 }
 0x532   :  { %4851 = vrot.lane.b32.xlu1 %v10240_v43, %s9926_s30  ;;  %3348 = vadd.xlane.f32.xlu0 %v3347_v60  ;;  %v11076_v60 = vpop.permute.xlu1 %3849 }
 0x536   :  { %4758 = vrot.lane.b32.xlu1 %v10199_v36, %s9926_s30 }
 0x53a   :  { %4944 = vrot.lane.b32.xlu1 %v10185_v32, %s9926_s30 }
 0x53e   :  { %5035 = vrot.lane.b32.xlu1 %v10256_v45, %s9926_s30 }
 0x542   :  { %5033 = vrot.lane.b32.xlu1 %v10269_v50, %s9926_s30  ;;  %v12365_v50 = vld [vmem:[#allocation38_spill] sm:$0xff] }
 0x546   :  { %4940 = vrot.lane.b32.xlu1 %v10243_v44, %s9926_s30 }
 0x548   :  { %3938 = vrot.lane.b32.xlu0 %v10307_v5, %s9936_s17 }
 0x54a   :  { %5031 = vrot.lane.b32.xlu1 %v10282_v52, %s9926_s30  ;;  %v12364_v52 = vld [vmem:[#allocation37_spill] sm:$0xff] }
 0x54c   :  { %4398 = vrot.lane.b32.xlu0 %v12359_v53, %s9926_s30 }
 0x54e   :  { %5347 = vrot.lane.b32.xlu1 %v10322_v19, %s9926_s30  ;;  %v12363_v19 = vld [vmem:[#allocation30_spill] sm:$0xff] }
 0x550   :  { %4396 = vrot.lane.b32.xlu0 %v12360_v8, %s9926_s30 }
 0x552   :  { %5345 = vrot.lane.b32.xlu1 %v10319_v17, %s9926_s30  ;;  %v11084_v17 = vpop.permute.xlu1 %4029 }
 0x554   :  { %4392 = vrot.lane.b32.xlu0 %v12361_v49, %s9926_s30 }
 0x556   :  { %5432 = vrot.lane.b32.xlu1 %v10313_v13, %s9926_s30  ;;  %v11088_v13 = vpop.permute.xlu0 %3940 }
 0x558   :  { %4483 = vrot.lane.b32.xlu0 %v12362_v38, %s9926_s30 }
 0x55a   :  { %5521 = vrot.lane.b32.xlu1 %v10342_v37, %s9926_s30 }
 0x55c   :  { %4485 = vrot.lane.b32.xlu0 %v12363_v19, %s9926_s30 }
 0x55e   :  { %5608 = vrot.lane.b32.xlu1 %v10339_v29, %s9926_s30  ;;  %v12366_v29 = vld [vmem:[#allocation41_spill] sm:$0xff] }
 0x560   :  { %4578 = vrot.lane.b32.xlu0 %v12364_v52, %s9926_s30 }
 0x562   :  { %5606 = vrot.lane.b32.xlu1 %v10333_v26, %s9926_s30 }
 0x564   :  { %v3310_v44 = vpop.xlane.xlu1 %3309  ;;  %4574 = vrot.lane.b32.xlu0 %v12365_v50, %s9926_s30 }
 0x565   :  { %9524 = vrcp.f32 %v3310_v44 }
 0x566   :  { %5782 = vrot.lane.b32.xlu1 %v10298_v48, %s9926_s30  ;;  %v3307_v37 = vpop.xlane.xlu0 %3306 }
 0x567   :  { %9526 = vrcp.f32 %v3307_v37 }
 0x568   :  { %4665 = vrot.lane.b32.xlu0 %v12366_v29, %s9926_s30 }
 0x56c   :  { %v3322_v45 = vpop.xlane.xlu1 %3321  ;;  %4667 = vrot.lane.b32.xlu0 %v10229_v41, %s9926_s30 }
 0x56d   :  { %9528 = vrcp.f32 %v3322_v45 }
 0x56e   :  { %v3319_v32 = vpop.xlane.xlu0 %3318 }
 0x56f   :  { %9530 = vrcp.f32 %v3319_v32 }
 0x570   :  { %4760 = vrot.lane.b32.xlu0 %v10158_v24, %s9926_s30 }
 0x572   :  { %v9525_v26 = vpop.eup %9524  ;;  %v3316_v44 = vpop.xlane.xlu1 %3315 }
 0x573   :  { %9532 = vrcp.f32 %v3316_v44  ;;  %v3356_v48 = vmul.f32 %v9525_v26, %v10947_v59 }
 0x574   :  { %v9527_v36 = vpop.eup %9526  ;;  %4756 = vrot.lane.b32.xlu0 %v10134_v15, %s9926_s30 }
 0x575   :  { %v3354_v37 = vmul.f32 %v9527_v36, %v10953_v47  ;;  %3387 = vst.msk [vmem:[#allocation17 + $0x18] sm:$0xff] %vm1596_vm1, %v3356_v48 }
 0x576   :  { %v3334_v41 = vpop.xlane.xlu1 %3333  ;;  %v3313_v45 = vpop.xlane.xlu0 %3312 }
 0x577   :  { %9534 = vrcp.f32 %v3334_v41  ;;  %3386 = vst.msk [vmem:[#allocation17 + $0x10] sm:$0xff] %vm1596_vm1, %v3354_v37  ;;  %8984 = vmatprep.mubr.msk.f32.mxu0 %vm1596_vm1, %v3354_v37 }
 0x578   :  { %9536 = vrcp.f32 %v3313_v45  ;;  %4847 = vrot.lane.b32.xlu0 %v10234_v42, %s9926_s30  ;;  %8985 = vmatmul.mubr.msk.f32.vlgmr.msra.gmra.mxu0 %vm1596_vm1, %v3356_v48 }
 0x579   :  { %8995 = vmatpush3.msra.mxu0 %v10790_v14 }
 0x57a   :  { %v9529_v32 = vpop.eup %9528  ;;  %8996 = vmatprep.subr.mxu0 %v10936_v6  ;;  %v3328_v36 = vpop.xlane.xlu1 %3327 }
 0x57b   :  { %v3331_v26 = vpop.xlane.xlu0 %3330  ;;  %9538 = vrcp.f32 %v3328_v36  ;;  %8997 = vmatpush3.msra.mxu0 %v10936_v6  ;;  %v3364_v41 = vmul.f32 %v9529_v32, %v10959_v4  ;;  %v12367_v4 = vld [vmem:[#allocation45_spill] sm:$0xff]  ;;  %v12368_v32 = vld [vmem:[#allocation42_spill] sm:$0xff] }
 0x57c   :  { %v9531_v59 = vpop.eup %9530  ;;  %9540 = vrcp.f32 %v3331_v26  ;;  %9008 = vmatprep.subr.mxu0 %v10940_v57  ;;  %4849 = vrot.lane.b32.xlu0 %v10261_v46, %s9926_s30 }
 0x57d   :  { %v3362_v48 = vmul.f32 %v9531_v59, %v10965_v1  ;;  %3391 = vst.msk [vmem:[#allocation17 + $0x98] sm:$0xff] %vm1596_vm1, %v3364_v41 }
 0x57e   :  { %v3346_v14 = vpop.xlane.xlu1 %3345 }
 0x57f   :  { %v3325_v47 = vpop.xlane.xlu0 %3324  ;;  %9542 = vrcp.f32 %v3346_v14  ;;  %3390 = vst.msk [vmem:[#allocation17 + $0x90] sm:$0xff] %vm1596_vm1, %v3362_v48  ;;  %8998 = vmatprep.mubr.msk.f32.mxu0 %vm1596_vm1, %v3362_v48 }
 0x580   :  { %v9533_v6 = vpop.eup %9532  ;;  %9544 = vrcp.f32 %v3325_v47  ;;  %4942 = vrot.lane.b32.xlu0 %v12367_v4, %s9926_s30  ;;  %8999 = vmatmul.mubr.msk.f32.vlgmr.msra.gmra.mxu0 %vm1596_vm1, %v3364_v41 }
 0x581   :  { %9009 = vmatpush3.msra.mxu0 %v10940_v57  ;;  %v3360_v1 = vmul.f32 %v9533_v6, %v10971_v55 }
 0x582   :  { %9010 = vmatprep.subr.mxu0 %v11022_v63  ;;  %v3340_v44 = vpop.xlane.xlu1 %3339 }
 0x583   :  { %v3343_v37 = vpop.xlane.xlu0 %3342  ;;  %9546 = vrcp.f32 %v3340_v44  ;;  %9011 = vmatpush3.msra.mxu0 %v11022_v63  ;;  %3389 = vst.msk [vmem:[#allocation17 + $0x58] sm:$0xff] %vm1596_vm1, %v3360_v1  ;;  %v12369_v63 = vld [vmem:[#allocation49_spill] sm:$0xff] }
 0x584   :  { %v9535_v45 = vpop.eup %9534  ;;  %9548 = vrcp.f32 %v3343_v37  ;;  %9022 = vmatprep.subr.mxu0 %v11088_v13  ;;  %4938 = vrot.lane.b32.xlu0 %v12368_v32, %s9926_s30 }
 0x585   :  { %v9537_v36 = vpop.eup %9536  ;;  %v3372_v57 = vmul.f32 %v9535_v45, %v10975_v54 }
 0x586   :  { %v3358_v26 = vmul.f32 %v9537_v36, %v10978_v34  ;;  %v4028_v6 = vpop.permute.xlu1 %4027 }
 0x587   :  { %v3337_v55 = vpop.xlane.xlu0 %3336  ;;  %3395 = vst.msk [vmem:[#allocation17 + $0x118] sm:$0xff] %vm1596_vm1, %v3372_v57 }
 0x588   :  { %9550 = vrcp.f32 %v3337_v55  ;;  %v9539_v41 = vpop.eup %9538  ;;  %3388 = vst.msk [vmem:[#allocation17 + $0x50] sm:$0xff] %vm1596_vm1, %v3358_v26  ;;  %8991 = vmatprep.mubr.msk.f32.mxu1 %vm1596_vm1, %v3358_v26  ;;  %5029 = vrot.lane.b32.xlu0 %v12369_v63, %s9926_s30  ;;  %v9420_v55 = vld [vmem:[#allocation14 + $0x18] sm:$0xff]   ;;  %v9421_v26 = vld [vmem:[#allocation14 + $0x10] sm:$0xff]  }
 0x589   :  { %v9541_v59 = vpop.eup %9540  ;;  %8992 = vmatmul.mubr.msk.f32.vlgmr.msra.gmra.mxu1 %vm1596_vm1, %v3360_v1  ;;  %v3368_v48 = vmul.f32 %v9539_v41, %v10984_v10  ;;  %v12370_v10 = vld [vmem:[#allocation59_spill] sm:$0xff] }
 0x58a   :  { %9002 = vmatpush3.msra.mxu1 %v10795_v25  ;;  %v3370_v54 = vmul.f32 %v9541_v59, %v10986_v33 }
 0x58b   :  { %9003 = vmatprep.subr.mxu1 %v10938_v7  ;;  %3393 = vst.msk [vmem:[#allocation17 + $0xd8] sm:$0xff] %vm1596_vm1, %v3368_v48 }
 0x58c   :  { %v9543_v34 = vpop.eup %9542  ;;  %9004 = vmatpush3.msra.mxu1 %v10938_v7  ;;  %3394 = vst.msk [vmem:[#allocation17 + $0x110] sm:$0xff] %vm1596_vm1, %v3370_v54  ;;  %9012 = vmatprep.mubr.msk.f32.mxu0 %vm1596_vm1, %v3370_v54 }
 0x58d   :  { %v9545_v14 = vpop.eup %9544  ;;  %9015 = vmatprep.subr.mxu1 %v11018_v2  ;;  %5434 = vrot.lane.b32.xlu0 %v12370_v10, %s9926_s30  ;;  %v3380_v25 = vmul.f32 %v9543_v34, %v10992_v3 }
 0x58e   :  { %9013 = vmatmul.mubr.msk.f32.vlgmr.msra.gmra.mxu0 %vm1596_vm1, %v3372_v57  ;;  %v3366_v33 = vmul.f32 %v9545_v14, %v10994_v61 }
 0x58f   :  { %9023 = vmatpush3.msra.mxu0 %v11088_v13  ;;  %3399 = vst.msk [vmem:[#allocation17 + $0x198] sm:$0xff] %vm1596_vm1, %v3380_v25 }
 0x590   :  { %v9547_v7 = vpop.eup %9546  ;;  %3392 = vst.msk [vmem:[#allocation17 + $0xd0] sm:$0xff] %vm1596_vm1, %v3366_v33  ;;  %9005 = vmatprep.mubr.msk.f32.mxu1 %vm1596_vm1, %v3366_v33 }
 0x591   :  { %v9549_v47 = vpop.eup %9548  ;;  %5519 = vrot.lane.b32.xlu0 %v10336_v27, %s9926_s30  ;;  %9006 = vmatmul.mubr.msk.f32.vlgmr.msra.gmra.mxu1 %vm1596_vm1, %v3368_v48  ;;  %v3376_v3 = vmul.f32 %v9547_v7, %v11000_v51  ;;  %v9688_v27 = vld [vmem:[#allocation8 + $0x58] sm:$0xff] }
 0x592   :  { %9016 = vmatpush3.msra.mxu1 %v11018_v2  ;;  %v3378_v13 = vmul.f32 %v9549_v47, %v11002_v30  ;;  %v4490_v30 = vpop.permute.xlu1 %4489  ;;  %v9422_v2 = vld [vmem:[#allocation14 + $0x8] sm:$0xff]   ;;  %v9423_v47 = vld [vmem:[#allocation14] sm:$0xff]  }
 0x593   :  { %9017 = vmatprep.subr.mxu1 %v11076_v60  ;;  %3397 = vst.msk [vmem:[#allocation17 + $0x158] sm:$0xff] %vm1596_vm1, %v3376_v3 }
 0x594   :  { %9018 = vmatpush3.msra.mxu1 %v11076_v60  ;;  %3398 = vst.msk [vmem:[#allocation17 + $0x190] sm:$0xff] %vm1596_vm1, %v3378_v13  ;;  %9026 = vmatprep.mubr.msk.f32.mxu0 %vm1596_vm1, %v3378_v13 }
 0x595   :  { %v9551_v61 = vpop.eup %9550  ;;  %9029 = vmatprep.subr.mxu1 %v11084_v17  ;;  %5695 = vrot.lane.b32.xlu0 %v10301_v0, %s9926_s30 }
 0x596   :  { %v3374_v51 = vmul.f32 %v9551_v61, %v11008_v31  ;;  %v4488_v60 = vpop.permute.xlu1 %4487  ;;  %v12372_v61 = vpack.c.bf16 %v10804_v22, %v10806_v18  ;;  %v12375_v18 = vld [vmem:[#allocation85_spill] sm:$0xff] }
 0x598   :  { %3396 = vst.msk [vmem:[#allocation17 + $0x150] sm:$0xff] %vm1596_vm1, %v3374_v51  ;;  %9019 = vmatprep.mubr.msk.f32.mxu1 %vm1596_vm1, %v3374_v51  ;;  %v12373_v51 = vld [vmem:[#allocation84_spill] sm:$0xff] }
 0x599   :  { %9020 = vmatmul.mubr.msk.f32.vlgmr.msra.gmra.mxu1 %vm1596_vm1, %v3376_v3  ;;  %v12371_v3 = vpack.c.bf16 %v10798_v16, %v10800_v56 }
 0x59a   :  { %9030 = vmatpush3.msra.mxu1 %v11084_v17  ;;  %v11179_v1 = vpop.permute.xlu1 %4394 }
 0x59b   :  { %9031 = vmatprep.subr.mxu1 %v4028_v6 }
 0x59c   :  { %9032 = vmatpush3.msra.mxu1 %v4028_v6 }
 0x59d   :  { %9056 = vmatprep.subr.bf16.mxu1 %v9422_v2 }
 0x59e   :  { %v11181_v44 = vpop.permute.xlu1 %4580 }
 0x5a2   :  { %v11183_v37 = vpop.permute.xlu1 %4671 }
 0x5a6   :  { %v11185_v31 = vpop.permute.xlu1 %4669 }
 0x5aa   :  { %v11187_v57 = vpop.permute.xlu1 %4576 }
 0x5ae   :  { %v11189_v41 = vpop.permute.xlu1 %4762 }
 0x5b2   :  { %v4854_v14 = vpop.permute.xlu1 %4853 }
 0x5b6   :  { %v3352_v45 = vpop.xlane.xlu0 %3351 }
 0x5b7   :  { %9552 = vrcp.f32 %v3352_v45  ;;  %v12376_v45 = vld [vmem:[#allocation82_spill] sm:$0xff] }
 0x5bb   :  { %v3349_v36 = vpop.xlane.xlu0 %3348 }
 0x5bc   :  { %9554 = vrcp.f32 %v3349_v36  ;;  %v12378_v36 = vld [vmem:[#allocation56_spill] sm:$0xff] }
 0x5bf   :  { %v3939_v17 = vpop.permute.xlu0 %3938 }
 0x5c0   :  { %9024 = vmatprep.subr.mxu0 %v3939_v17 }
 0x5c1   :  { %9025 = vmatpush3.msra.mxu0 %v3939_v17 }
 0x5c2   :  { %9027 = vmatmul.mubr.msk.f32.vlgmr.msra.gmra.mxu0 %vm1596_vm1, %v3380_v25  ;;  %9036 = vmatprep.subr.bf16.mxu0 %v9420_v55 }
 0x5c3   :  { %9037 = vmatpush3.bf16.msra.mxu0 %v9420_v55  ;;  %v11192_v59 = vpop.permute.xlu0 %4398 }
 0x5c4   :  { %v9553_v48 = vpop.eup %9552  ;;  %9038 = vmatprep.subr.bf16.mxu0 %v9421_v26 }
 0x5c5   :  { %v3384_v54 = vmul.f32 %v9553_v48, %v11036_v11  ;;  %v4852_v11 = vpop.permute.xlu1 %4851 }
 0x5c7   :  { %9039 = vmatpush3.bf16.msra.mxu0 %v9421_v26  ;;  %v11195_v34 = vpop.permute.xlu0 %4396  ;;  %3401 = vst.msk [vmem:[#allocation17 + $0x1d8] sm:$0xff] %vm1596_vm1, %v3384_v54 }
 0x5c8   :  { %9076 = vmatprep.subr.msk.mxu0 %vm867_vm0, %v11192_v59 }
 0x5c9   :  { %v9555_v33 = vpop.eup %9554  ;;  %v11211_v13 = vpop.permute.xlu1 %4758 }
 0x5ca   :  { %v3382_v25 = vmul.f32 %v9555_v33, %v11042_v35 }
 0x5cb   :  { %v11201_v7 = vpop.permute.xlu0 %4392 }
 0x5cc   :  { %3400 = vst.msk [vmem:[#allocation17 + $0x1d0] sm:$0xff] %vm1596_vm1, %v3382_v25  ;;  %9033 = vmatprep.mubr.msk.f32.mxu1 %vm1596_vm1, %v3382_v25 }
 0x5cd   :  { %9034 = vmatmul.mubr.msk.f32.vlgmr.msra.gmra.mxu1 %vm1596_vm1, %v3384_v54  ;;  %v11225_v56 = vpop.permute.xlu1 %4944  ;;  %v12381_v54 = vld [vmem:[#allocation86_spill] sm:$0xff] }
 0x5ce   :  { %9057 = vmatpush3.bf16.msra.mxu1 %v9422_v2  ;;  %9060 = vmatprep.mubr.msk.bf16.mxu1 %vm867_vm0, %v12371_v3  ;;  %v12374_v2 = vpack.c.bf16 %v10810_v9, %v12373_v51  ;;  %v12377_v9 = vpack.c.bf16 %v12375_v18, %v12376_v45  ;;  %v12385_v3 = vld [vmem:[#allocation88_spill] sm:$0xff]  ;;  %v12387_v45 = vld [vmem:[#allocation66_spill] sm:$0xff] }
 0x5cf   :  { %v4484_v6 = vpop.permute.xlu0 %4483  ;;  %9058 = vmatprep.subr.bf16.mxu1 %v9423_v47 }
 0x5d1   :  { %v5036_v26 = vpop.permute.xlu1 %5035 }
 0x5d2   :  { %9059 = vmatpush3.bf16.msra.mxu1 %v9423_v47  ;;  %v12384_v47 = vld [vmem:[#allocation83_spill] sm:$0xff] }
 0x5d3   :  { %9083 = vmatprep.subr.msk.mxu1 %vm867_vm0, %v4490_v30  ;;  %v4486_v35 = vpop.permute.xlu0 %4485 }
 0x5d5   :  { %9061 = vmatmul.mubr.msk.bf16.vlgmr.msra.gmra.mxu1 %vm867_vm0, %v12372_v61  ;;  %v5034_v25 = vpop.permute.xlu1 %5033  ;;  %v12386_v61 = vpack.c.bf16 %v12384_v47, %v12385_v3 }
 0x5d6   :  { %9064 = vmatprep.mubr.msk.bf16.mxu1 %vm867_vm0, %v12374_v2  ;;  %9084 = vmatpush3.xpose.msk.msra.mxu1 %vm867_vm0, %v4490_v30  ;;  %v12379_v30 = vld [vmem:[#allocation87_spill] sm:$0xff] }
 0x5d7   :  { %9085 = vmatprep.subr.msk.mxu1 %vm867_vm0, %v4488_v60  ;;  %v11223_v16 = vpop.permute.xlu0 %4578  ;;  %v12380_v55 = vpack.c.bf16 %v12378_v36, %v12379_v30 }
 0x5d9   :  { %v11252_v18 = vpop.permute.xlu1 %4940 }
 0x5da   :  { %9086 = vmatpush3.xpose.msk.msra.mxu1 %vm867_vm0, %v4488_v60  ;;  %v12382_v60 = vld [vmem:[#allocation90_spill] sm:$0xff] }
 0x5db   :  { %9097 = vmatprep.subr.msk.mxu1 %vm867_vm0, %v11183_v37  ;;  %v11230_v22 = vpop.permute.xlu0 %4574  ;;  %v12383_v33 = vpack.c.bf16 %v12381_v54, %v12382_v60 }
 0x5dd   :  { %9065 = vmatmul.mubr.msk.bf16.gmra.mxu1 %vm867_vm0, %v12377_v9  ;;  %v12388_v9 = vld [vmem:[#allocation67_spill] sm:$0xff] }
 0x5de   :  { %9068 = vmatprep.mubr.msk.bf16.mxu1 %vm867_vm0, %v12380_v55  ;;  %v12389_v36 = vpack.c.bf16 %v12387_v45, %v12388_v9  ;;  %v5032_v55 = vpop.permute.xlu1 %5031 }
 0x5df   :  { %v4666_v17 = vpop.permute.xlu0 %4665 }
 0x5e2   :  { %v11265_v60 = vpop.permute.xlu1 %5347 }
 0x5e3   :  { %v4668_v48 = vpop.permute.xlu0 %4667 }
 0x5e5   :  { %9069 = vmatmul.mubr.msk.bf16.gmra.mxu1 %vm867_vm0, %v12383_v33 }
 0x5e6   :  { %9072 = vmatprep.mubr.msk.bf16.mxu1 %vm867_vm0, %v12386_v61 }
 0x5e7   :  { %v11248_v51 = vpop.permute.xlu0 %4760 }
 0x5eb   :  { %v11250_v2 = vpop.permute.xlu0 %4756 }
 0x5ed   :  { %9073 = vmatmul.mubr.msk.bf16.gmra.mxu1 %vm867_vm0, %v12389_v36 }
 0x5ee   :  { %9087 = vmatprep.mubr.msk.f32.mxu1 %vm867_vm0, %v4484_v6  ;;  %v11273_v6 = vpop.permute.xlu1 %5345 }
 0x5ef   :  { %v4848_v30 = vpop.permute.xlu0 %4847 }
 0x5f3   :  { %v4850_v54 = vpop.permute.xlu0 %4849 }
 0x5f5   :  { %9088 = vmatmul.mubr.msk.f32.vlgmr.msra.gmra.mxu1 %vm867_vm0, %v4486_v35 }
 0x5f6   :  { %9098 = vmatpush3.xpose.msk.msra.mxu1 %vm867_vm0, %v11183_v37  ;;  %9101 = vmatprep.mubr.msk.f32.mxu1 %vm867_vm0, %v4666_v17  ;;  %v5433_v37 = vpop.permute.xlu1 %5432 }
 0x5f7   :  { %9099 = vmatprep.subr.msk.mxu1 %vm867_vm0, %v11185_v31  ;;  %v11267_v33 = vpop.permute.xlu0 %4942 }
 0x5fa   :  { %9100 = vmatpush3.xpose.msk.msra.mxu1 %vm867_vm0, %v11185_v31  ;;  %v11286_v17 = vpop.permute.xlu1 %5521 }
 0x5fb   :  { %9111 = vmatprep.subr.msk.mxu1 %vm867_vm0, %v4854_v14  ;;  %v11275_v35 = vpop.permute.xlu0 %4938 }
 0x5fd   :  { %9102 = vmatmul.mubr.msk.f32.vlgmr.msra.gmra.mxu1 %vm867_vm0, %v4668_v48 }
 0x5fe   :  { %9112 = vmatpush3.xpose.msk.msra.mxu1 %vm867_vm0, %v4854_v14  ;;  %9115 = vmatprep.mubr.msk.f32.mxu1 %vm867_vm0, %v4848_v30 }
 0x5ff   :  { %9113 = vmatprep.subr.msk.mxu1 %vm867_vm0, %v4852_v11  ;;  %v5030_v31 = vpop.permute.xlu0 %5029 }
 0x602   :  { %9114 = vmatpush3.xpose.msk.msra.mxu1 %vm867_vm0, %v4852_v11  ;;  %v11290_v11 = vpop.permute.xlu1 %5608 }
 0x603   :  { %9125 = vmatprep.subr.msk.mxu1 %vm867_vm0, %v5036_v26  ;;  %v5435_v14 = vpop.permute.xlu0 %5434 }
 0x605   :  { %9116 = vmatmul.mubr.msk.f32.vlgmr.msra.gmra.mxu1 %vm867_vm0, %v4850_v54 }
 0x606   :  { %9126 = vmatpush3.xpose.msk.msra.mxu1 %vm867_vm0, %v5036_v26  ;;  %9129 = vmatprep.mubr.msk.f32.mxu1 %vm867_vm0, %v5030_v31 }
 0x607   :  { %9127 = vmatprep.subr.msk.mxu1 %vm867_vm0, %v5034_v25 }
 0x60a   :  { %9128 = vmatpush3.xpose.msk.msra.mxu1 %vm867_vm0, %v5034_v25 }
 0x60b   :  { %9139 = vmatprep.subr.mxu1 %v5435_v14 }
 0x60d   :  { %9130 = vmatmul.mubr.msk.f32.vlgmr.msra.gmra.mxu1 %vm867_vm0, %v5032_v55 }
 0x60e   :  { %9140 = vmatpush3.msra.mxu1 %v5435_v14 }
 0x60f   :  { %9141 = vmatprep.subr.mxu1 %v5433_v37 }
 0x610   :  { %9142 = vmatpush3.msra.mxu1 %v5433_v37 }
 0x611   :  { %9153 = vmatprep.subr.mxu1 %v11290_v11 }
 0x638   :  { %v8986_v26 = vpop.f32.mrf.mxu0 }
 0x63a   :  { %v3482_v48 = vpop.f32.mrf.mxu0 }
 0x63b   :  { %v4114_v47 = vpack.c.bf16 %v8986_v26, %v3482_v48 }
 0x63d   :  { %9040 = vmatprep.mubr.msk.bf16.mxu0 %vm867_vm0, %v4114_v47 }
 0x640   :  { %v9000_v3 = vpop.f32.mrf.mxu0 }
 0x642   :  { %v3660_v45 = vpop.f32.mrf.mxu0 }
 0x643   :  { %v4116_v36 = vpack.c.bf16 %v9000_v3, %v3660_v45 }
 0x649   :  { %v8993_v61 = vpop.f32.mrf.mxu1 }
 0x64b   :  { %v3571_v9 = vpop.f32.mrf.mxu1 }
 0x64c   :  { %v4115_v25 = vpack.c.bf16 %v8993_v61, %v3571_v9 }
 0x64e   :  { %v9014_v30 = vpop.f32.mrf.mxu0  ;;  %9041 = vmatmul.mubr.msk.bf16.vlgmr.msra.gmra.mxu0 %vm867_vm0, %v4115_v25 }
 0x64f   :  { %9077 = vmatpush3.xpose.msk.msra.mxu0 %vm867_vm0, %v11192_v59  ;;  %9044 = vmatprep.mubr.msk.bf16.mxu0 %vm867_vm0, %v4116_v36 }
 0x650   :  { %9078 = vmatprep.subr.msk.mxu0 %vm867_vm0, %v11195_v34  ;;  %v3838_v54 = vpop.f32.mrf.mxu0 }
 0x651   :  { %v9007_v55 = vpop.f32.mrf.mxu1  ;;  %v4118_v14 = vpack.c.bf16 %v9014_v30, %v3838_v54 }
 0x653   :  { %9079 = vmatpush3.xpose.msk.msra.mxu0 %vm867_vm0, %v11195_v34  ;;  %v3749_v37 = vpop.f32.mrf.mxu1 }
 0x654   :  { %v4117_v31 = vpack.c.bf16 %v9007_v55, %v3749_v37  ;;  %9090 = vmatprep.subr.msk.mxu0 %vm867_vm0, %v11181_v44 }
 0x656   :  { %9045 = vmatmul.mubr.msk.bf16.gmra.mxu0 %vm867_vm0, %v4117_v31  ;;  %v11384_v31 = vld [vmem:[#allocation8 + $0x18] sm:$0xff] }
 0x657   :  { %9048 = vmatprep.mubr.msk.bf16.mxu0 %vm867_vm0, %v4118_v14 }
 0x659   :  { %v9021_v59 = vpop.f32.mrf.mxu1 }
 0x65b   :  { %v3927_v26 = vpop.f32.mrf.mxu1 }
 0x65c   :  { %v4119_v48 = vpack.c.bf16 %v9021_v59, %v3927_v26  ;;  %v11387_v26 = vld [vmem:[#allocation8 + $0x10] sm:$0xff] }
 0x65d   :  { %12406 = vst [vmem:[#allocation35_spill] sm:$0xff] %v11387_v26 }
 0x65e   :  { %9049 = vmatmul.mubr.msk.bf16.gmra.mxu0 %vm867_vm0, %v4119_v48 }
 0x682   :  { %v9028_v47 = vpop.f32.mrf.mxu0 }
 0x684   :  { %v4016_v3 = vpop.f32.mrf.mxu0 }
 0x685   :  { %v4120_v61 = vpack.c.bf16 %v9028_v47, %v4016_v3 }
 0x687   :  { %9052 = vmatprep.mubr.msk.bf16.mxu0 %vm867_vm0, %v4120_v61  ;;  %v9686_v61 = vld [vmem:[#allocation8 + $0x38] sm:$0xff] }
 0x68d   :  { %v9035_v34 = vpop.f32.mrf.mxu1 }
 0x68f   :  { %v4105_v45 = vpop.f32.mrf.mxu1 }
 0x690   :  { %v4121_v9 = vpack.c.bf16 %v9035_v34, %v4105_v45 }
 0x692   :  { %9053 = vmatmul.mubr.msk.bf16.gmra.mxu0 %vm867_vm0, %v4121_v9  ;;  %v9687_v9 = vld [vmem:[#allocation8 + $0x30] sm:$0xff] }
 0x693   :  { %9080 = vmatprep.mubr.msk.f32.mxu0 %vm867_vm0, %v11201_v7 }
 0x695   :  { %v11311_v25 = vpop.f32.mrf.mxu1 }
 0x696   :  { %12390 = vst [vmem:[#allocation70_spill] sm:$0xff] %v11311_v25 }
 0x697   :  { %v11313_v36 = vpop.f32.mrf.mxu1 }
 0x698   :  { %12391 = vst [vmem:[#allocation71_spill] sm:$0xff] %v11313_v36 }
 0x699   :  { %v11315_v30 = vpop.f32.mrf.mxu1 }
 0x69a   :  { %12392 = vst [vmem:[#allocation68_spill] sm:$0xff] %v11315_v30  ;;  %9081 = vmatmul.mubr.msk.f32.vlgmr.msra.gmra.mxu0 %vm867_vm0, %v11179_v1 }
 0x69b   :  { %v11319_v55 = vpop.f32.mrf.mxu1  ;;  %9091 = vmatpush3.xpose.msk.msra.mxu0 %vm867_vm0, %v11181_v44  ;;  %9094 = vmatprep.mubr.msk.f32.mxu0 %vm867_vm0, %v11230_v22 }
 0x69c   :  { %12393 = vst [vmem:[#allocation69_spill] sm:$0xff] %v11319_v55  ;;  %9092 = vmatprep.subr.msk.mxu0 %vm867_vm0, %v11223_v16 }
 0x69d   :  { %v11327_v7 = vpop.f32.mrf.mxu1 }
 0x69e   :  { %12394 = vst [vmem:[#allocation72_spill] sm:$0xff] %v11327_v7 }
 0x69f   :  { %v11329_v54 = vpop.f32.mrf.mxu1  ;;  %9093 = vmatpush3.xpose.msk.msra.mxu0 %vm867_vm0, %v11223_v16 }
 0x6a0   :  { %12395 = vst [vmem:[#allocation74_spill] sm:$0xff] %v11329_v54  ;;  %9104 = vmatprep.subr.msk.mxu0 %vm867_vm0, %v11189_v41 }
 0x6a1   :  { %v11335_v1 = vpop.f32.mrf.mxu1 }
 0x6a2   :  { %12396 = vst [vmem:[#allocation73_spill] sm:$0xff] %v11335_v1  ;;  %9095 = vmatmul.mubr.msk.f32.vlgmr.msra.gmra.mxu0 %vm867_vm0, %v11187_v57 }
 0x6a3   :  { %v11339_v44 = vpop.f32.mrf.mxu1  ;;  %9105 = vmatpush3.xpose.msk.msra.mxu0 %vm867_vm0, %v11189_v41  ;;  %9108 = vmatprep.mubr.msk.f32.mxu0 %vm867_vm0, %v11250_v2 }
 0x6a4   :  { %12397 = vst [vmem:[#allocation75_spill] sm:$0xff] %v11339_v44  ;;  %9106 = vmatprep.subr.msk.mxu0 %vm867_vm0, %v11248_v51 }
 0x6a5   :  { %v11347_v16 = vpop.f32.mrf.mxu1 }
 0x6a6   :  { %12398 = vst [vmem:[#allocation76_spill] sm:$0xff] %v11347_v16 }
 0x6a7   :  { %v11349_v22 = vpop.f32.mrf.mxu1  ;;  %9107 = vmatpush3.xpose.msk.msra.mxu0 %vm867_vm0, %v11248_v51 }
 0x6a8   :  { %12399 = vst [vmem:[#allocation78_spill] sm:$0xff] %v11349_v22  ;;  %9118 = vmatprep.subr.msk.mxu0 %vm867_vm0, %v11225_v56 }
 0x6a9   :  { %v11355_v57 = vpop.f32.mrf.mxu1 }
 0x6aa   :  { %12400 = vst [vmem:[#allocation77_spill] sm:$0xff] %v11355_v57  ;;  %9109 = vmatmul.mubr.msk.f32.vlgmr.msra.gmra.mxu0 %vm867_vm0, %v11211_v13 }
 0x6ab   :  { %v11359_v41 = vpop.f32.mrf.mxu1  ;;  %9119 = vmatpush3.xpose.msk.msra.mxu0 %vm867_vm0, %v11225_v56  ;;  %9122 = vmatprep.mubr.msk.f32.mxu0 %vm867_vm0, %v11275_v35 }
 0x6ac   :  { %12401 = vst [vmem:[#allocation79_spill] sm:$0xff] %v11359_v41  ;;  %9120 = vmatprep.subr.msk.mxu0 %vm867_vm0, %v11267_v33 }
 0x6ad   :  { %v11367_v51 = vpop.f32.mrf.mxu1 }
 0x6ae   :  { %12402 = vst [vmem:[#allocation80_spill] sm:$0xff] %v11367_v51 }
 0x6af   :  { %v11369_v2 = vpop.f32.mrf.mxu1  ;;  %9121 = vmatpush3.xpose.msk.msra.mxu0 %vm867_vm0, %v11267_v33 }
 0x6b0   :  { %12403 = vst [vmem:[#allocation81_spill] sm:$0xff] %v11369_v2  ;;  %9132 = vmatprep.subr.mxu0 %v11265_v60 }
 0x6b1   :  { %v11374_v13 = vpop.f32.mrf.mxu1 }
 0x6b2   :  { %12404 = vst [vmem:[#allocation32_spill] sm:$0xff] %v11374_v13  ;;  %9123 = vmatmul.mubr.msk.f32.vlgmr.msra.gmra.mxu0 %vm867_vm0, %v11252_v18 }
 0x6b3   :  { %v11378_v56 = vpop.f32.mrf.mxu1  ;;  %9133 = vmatpush3.msra.mxu0 %v11265_v60 }
 0x6b4   :  { %12405 = vst [vmem:[#allocation27_spill] sm:$0xff] %v11378_v56  ;;  %9134 = vmatprep.subr.mxu0 %v11273_v6  ;;  %v9689_v56 = vld [vmem:[#allocation8 + $0x50] sm:$0xff] }
 0x6b5   :  { %v9089_v35 = vpop.f32.mrf.mxu1  ;;  %9135 = vmatpush3.msra.mxu0 %v11273_v6 }
 0x6b6   :  { %v5123_v37 = vmul.f32 0.17677669, %v9089_v35  ;;  %9146 = vmatprep.subr.mxu0 %v11286_v17 }
 0x6b7   :  { %v4565_v33 = vpop.f32.mrf.mxu1 }
 0x6b8   :  { %v5139_v14 = vadd.f32 %v11384_v31, %v5123_v37  ;;  %v5122_v59 = vmul.f32 0.17677669, %v4565_v33 }
 0x6ba   :  { %v5138_v18 = vadd.f32 %v11387_v26, %v5122_v59  ;;  %v5161_v60 = vsel %vm1596_vm1, %v5139_v14, -inf }
 0x6bb   :  { %5162 = vmax.xlane.f32.xlu0 %v5161_v60 }
 0x6bc   :  { %v5158_v6 = vsel %vm1596_vm1, %v5138_v18, -inf }
 0x6bd   :  { %v9103_v48 = vpop.f32.mrf.mxu1 }
 0x6be   :  { %v5127_v47 = vmul.f32 0.17677669, %v9103_v48 }
 0x6bf   :  { %v4747_v3 = vpop.f32.mrf.mxu1  ;;  %5159 = vmax.xlane.f32.xlu0 %v5158_v6 }
 0x6c0   :  { %v5143_v34 = vadd.f32 %v9686_v61, %v5127_v47  ;;  %v5126_v45 = vmul.f32 0.17677669, %v4747_v3 }
 0x6c2   :  { %v5142_v35 = vadd.f32 %v9687_v9, %v5126_v45  ;;  %v5173_v37 = vsel %vm1596_vm1, %v5143_v34, -inf  ;;  %v9690_v9 = vld [vmem:[#allocation8 + $0x78] sm:$0xff] }
 0x6c3   :  { %5174 = vmax.xlane.f32.xlu1 %v5173_v37 }
 0x6c4   :  { %v5170_v33 = vsel %vm1596_vm1, %v5142_v35, -inf }
 0x6c5   :  { %5171 = vmax.xlane.f32.xlu0 %v5170_v33  ;;  %v9117_v59 = vpop.f32.mrf.mxu1 }
 0x6c6   :  { %v5131_v0 = vmul.f32 0.17677669, %v9117_v59  ;;  %v9691_v59 = vld [vmem:[#allocation8 + $0x70] sm:$0xff] }
 0x6c7   :  { %v4929_v60 = vpop.f32.mrf.mxu1 }
 0x6c8   :  { %v5147_v48 = vadd.f32 %v9688_v27, %v5131_v0  ;;  %v5130_v10 = vmul.f32 0.17677669, %v4929_v60 }
 0x6ca   :  { %v5146_v13 = vadd.f32 %v9689_v56, %v5130_v10  ;;  %v5185_v6 = vsel %vm1596_vm1, %v5147_v48, -inf }
 0x6cb   :  { %5186 = vmax.xlane.f32.xlu1 %v5185_v6 }
 0x6cc   :  { %v5182_v47 = vsel %vm1596_vm1, %v5146_v13, -inf }
 0x6cd   :  { %5183 = vmax.xlane.f32.xlu0 %v5182_v47  ;;  %v9131_v3 = vpop.f32.mrf.mxu1 }
 0x6ce   :  { %v5135_v61 = vmul.f32 0.17677669, %v9131_v3 }
 0x6cf   :  { %v5111_v45 = vpop.f32.mrf.mxu1 }
 0x6d0   :  { %v11396_v37 = vadd.f32 %v9690_v9, %v5135_v61  ;;  %v5134_v33 = vmul.f32 0.17677669, %v5111_v45  ;;  %v11416_v61 = vpop.permute.xlu0 %5519 }
 0x6d2   :  { %v11398_v2 = vadd.f32 %v9691_v59, %v5134_v33  ;;  %v5197_v0 = vsel %vm1596_vm1, %v11396_v37, -inf  ;;  %v11424_v59 = vpop.permute.xlu1 %5606 }
 0x6d3   :  { %5198 = vmax.xlane.f32.xlu1 %v5197_v0 }
 0x6d4   :  { %v5194_v27 = vsel %vm1596_vm1, %v11398_v2, -inf  ;;  %v11420_v9 = vpop.permute.xlu0 %5695 }
 0x6d5   :  { %5195 = vmax.xlane.f32.xlu0 %v5194_v27 }
 0x6d6   :  { %v11428_v41 = vpop.permute.xlu1 %5782 }
 0x70e   :  { %v11404_v10 = vpop.f32.mrf.mxu0 }
 0x70f   :  { %12407 = vst [vmem:[#allocation34_spill] sm:$0xff] %v11404_v10  ;;  %v9699_v10 = vld [vmem:[#allocation8 + $0x60] sm:$0xff] }
 0x710   :  { %v11406_v56 = vpop.f32.mrf.mxu0 }
 0x711   :  { %12408 = vst [vmem:[#allocation43_spill] sm:$0xff] %v11406_v56  ;;  %v9698_v56 = vld [vmem:[#allocation8 + $0x68] sm:$0xff] }
 0x712   :  { %v11408_v60 = vpop.f32.mrf.mxu0 }
 0x713   :  { %12409 = vst [vmem:[#allocation39_spill] sm:$0xff] %v11408_v60  ;;  %v9697_v60 = vld [vmem:[#allocation8 + $0x40] sm:$0xff] }
 0x714   :  { %v11410_v6 = vpop.f32.mrf.mxu0 }
 0x715   :  { %12410 = vst [vmem:[#allocation36_spill] sm:$0xff] %v11410_v6 }
 0x716   :  { %v11412_v47 = vpop.f32.mrf.mxu0 }
 0x717   :  { %12411 = vst [vmem:[#allocation31_spill] sm:$0xff] %v11412_v47 }
 0x718   :  { %v11414_v3 = vpop.f32.mrf.mxu0 }
 0x719   :  { %12412 = vst [vmem:[#allocation29_spill] sm:$0xff] %v11414_v3 }
 0x71a   :  { %v11418_v45 = vpop.f32.mrf.mxu0 }
 0x71b   :  { %12413 = vst [vmem:[#allocation28_spill] sm:$0xff] %v11418_v45 }
 0x71c   :  { %v11422_v33 = vpop.f32.mrf.mxu0 }
 0x71d   :  { %12414 = vst [vmem:[#allocation26_spill] sm:$0xff] %v11422_v33 }
 0x71e   :  { %v11426_v0 = vpop.f32.mrf.mxu0 }
 0x71f   :  { %12415 = vst [vmem:[#allocation30_spill] sm:$0xff] %v11426_v0 }
 0x720   :  { %v11430_v22 = vpop.f32.mrf.mxu0 }
 0x721   :  { %12416 = vst [vmem:[#allocation37_spill] sm:$0xff] %v11430_v22 }
 0x722   :  { %v11432_v45 = vpop.f32.mrf.mxu0 }
 0x723   :  { %12417 = vst [vmem:[#allocation38_spill] sm:$0xff] %v11432_v45 }
 0x724   :  { %v11434_v0 = vpop.f32.mrf.mxu0 }
 0x725   :  { %12418 = vst [vmem:[#allocation41_spill] sm:$0xff] %v11434_v0  ;;  %v9696_v0 = vld [vmem:[#allocation8 + $0x48] sm:$0xff] }
 0x744   :  { %v5163_v27 = vpop.xlane.xlu0 %5162 }
 0x745   :  { %v5203_v51 = vsub.f32 %v5139_v14, %v5163_v27 }
 0x747   :  { %v5222_v57 = vmul.f32 1.442695, %v5203_v51 }
 0x748   :  { %v5160_v16 = vpop.xlane.xlu0 %5159 }
 0x749   :  { %9556 = vpow2.f32 %v5222_v57  ;;  %v5202_v44 = vsub.f32 %v5138_v18, %v5160_v16 }
 0x74b   :  { %v5220_v1 = vmul.f32 1.442695, %v5202_v44 }
 0x74c   :  { %v5175_v54 = vpop.xlane.xlu1 %5174 }
 0x74d   :  { %9558 = vpow2.f32 %v5220_v1  ;;  %v5207_v33 = vsub.f32 %v5143_v34, %v5175_v54 }
 0x74e   :  { %v5172_v3 = vpop.xlane.xlu0 %5171 }
 0x74f   :  { %v5230_v7 = vmul.f32 1.442695, %v5207_v33  ;;  %v5206_v47 = vsub.f32 %v5142_v35, %v5172_v3 }
 0x751   :  { %9560 = vpow2.f32 %v5230_v7  ;;  %v5228_v14 = vmul.f32 1.442695, %v5206_v47 }
 0x752   :  { %v11436_v27 = vpop.f32.mrf.mxu0 }
 0x753   :  { %12419 = vst [vmem:[#allocation45_spill] sm:$0xff] %v11436_v27  ;;  %9562 = vpow2.f32 %v5228_v14 }
 0x754   :  { %v5187_v51 = vpop.xlane.xlu1 %5186  ;;  %v11438_v22 = vpop.f32.mrf.mxu0 }
 0x755   :  { %12420 = vst [vmem:[#allocation42_spill] sm:$0xff] %v11438_v22  ;;  %v5211_v16 = vsub.f32 %v5147_v48, %v5187_v51 }
 0x756   :  { %v11440_v44 = vpop.eup %9556  ;;  %v5184_v57 = vpop.xlane.xlu0 %5183 }
 0x757   :  { %v11442_v18 = vpop.f32.mrf.mxu0  ;;  %v5238_v54 = vmul.f32 1.442695, %v5211_v16  ;;  %v5210_v1 = vsub.f32 %v5146_v13, %v5184_v57  ;;  %v5257_v34 = vsel %vm1596_vm1, %v11440_v44, 0.0 }
 0x758   :  { %12421 = vst [vmem:[#allocation49_spill] sm:$0xff] %v11442_v18  ;;  %5258 = vadd.xlane.f32.xlu1 %v5257_v34 }
 0x759   :  { %v11446_v7 = vpop.f32.mrf.mxu0  ;;  %9564 = vpow2.f32 %v5238_v54  ;;  %v5236_v35 = vmul.f32 1.442695, %v5210_v1 }
 0x75a   :  { %12422 = vst [vmem:[#allocation84_spill] sm:$0xff] %v11446_v7  ;;  %v11448_v47 = vpop.eup %9558  ;;  %v11455_v7 = vld [vmem:[#allocation8 + $0x8] sm:$0xff] }
 0x75b   :  { %v9082_v3 = vpop.f32.mrf.mxu0  ;;  %9566 = vpow2.f32 %v5236_v35  ;;  %v5254_v33 = vsel %vm1596_vm1, %v11448_v47, 0.0 }
 0x75c   :  { %v5121_v48 = vmul.f32 0.17677669, %v9082_v3  ;;  %v5199_v14 = vpop.xlane.xlu1 %5198  ;;  %5255 = vadd.xlane.f32.xlu0 %v5254_v33 }
 0x75d   :  { %v4474_v51 = vpop.f32.mrf.mxu0  ;;  %v5215_v13 = vsub.f32 %v11396_v37, %v5199_v14  ;;  %v11465_v37 = vld [vmem:[#allocation8] sm:$0xff] }
 0x75e   :  { %v5120_v16 = vmul.f32 0.17677669, %v4474_v51  ;;  %v11453_v57 = vpop.eup %9560  ;;  %v5196_v34 = vpop.xlane.xlu0 %5195  ;;  %v11458_v54 = vadd.f32 %v11455_v7, %v5121_v48 }
 0x75f   :  { %v5246_v1 = vmul.f32 1.442695, %v5215_v13  ;;  %v5214_v35 = vsub.f32 %v11398_v2, %v5196_v34  ;;  %v5269_v3 = vsel %vm1596_vm1, %v11453_v57, 0.0 }
 0x760   :  { %v11463_v18 = vpop.eup %9562  ;;  %5270 = vadd.xlane.f32.xlu1 %v5269_v3  ;;  %v11468_v33 = vadd.f32 %v11465_v37, %v5120_v16  ;;  %v5155_v2 = vsel %vm1596_vm1, %v11458_v54, -inf  ;;  %v11478_v16 = vld [vmem:[#allocation8 + $0x28] sm:$0xff] }
 0x761   :  { %9568 = vpow2.f32 %v5246_v1  ;;  %v5244_v14 = vmul.f32 1.442695, %v5214_v35  ;;  %v5266_v48 = vsel %vm1596_vm1, %v11463_v18, 0.0  ;;  %12423 = vst [vmem:[#allocation85_spill] sm:$0xff] %v11478_v16 }
 0x762   :  { %5267 = vadd.xlane.f32.xlu0 %v5266_v48  ;;  %v9096_v51 = vpop.f32.mrf.mxu0  ;;  %v5152_v1 = vsel %vm1596_vm1, %v11468_v33, -inf }
 0x763   :  { %v5125_v13 = vmul.f32 0.17677669, %v9096_v51  ;;  %9570 = vpow2.f32 %v5244_v14 }
 0x764   :  { %5156 = vmax.xlane.f32.xlu1 %v5155_v2  ;;  %v4656_v34 = vpop.f32.mrf.mxu0  ;;  %v11487_v2 = vld [vmem:[#allocation8 + $0x20] sm:$0xff] }
 0x765   :  { %v5124_v3 = vmul.f32 0.17677669, %v4656_v34  ;;  %v11481_v35 = vadd.f32 %v11478_v16, %v5125_v13  ;;  %12424 = vst [vmem:[#allocation82_spill] sm:$0xff] %v11487_v2 }
 0x766   :  { %v11476_v22 = vpop.eup %9564  ;;  %5153 = vmax.xlane.f32.xlu0 %v5152_v1 }
 0x767   :  { %v5281_v48 = vsel %vm1596_vm1, %v11476_v22, 0.0  ;;  %v11490_v14 = vadd.f32 %v11487_v2, %v5124_v3  ;;  %v5167_v13 = vsel %vm1596_vm1, %v11481_v35, -inf }
 0x768   :  { %v11485_v51 = vpop.eup %9566  ;;  %5282 = vadd.xlane.f32.xlu1 %v5281_v48 }
 0x769   :  { %v5278_v34 = vsel %vm1596_vm1, %v11485_v51, 0.0  ;;  %v5164_v48 = vsel %vm1596_vm1, %v11490_v14, -inf }
 0x76a   :  { %5279 = vadd.xlane.f32.xlu0 %v5278_v34  ;;  %v9110_v1 = vpop.f32.mrf.mxu0 }
 0x76b   :  { %v5129_v27 = vmul.f32 0.17677669, %v9110_v1 }
 0x76c   :  { %5168 = vmax.xlane.f32.xlu1 %v5167_v13  ;;  %v4838_v3 = vpop.f32.mrf.mxu0 }
 0x76d   :  { %v11496_v45 = vadd.f32 %v9696_v0, %v5129_v27  ;;  %v5128_v34 = vmul.f32 0.17677669, %v4838_v3 }
 0x76e   :  { %v11500_v55 = vpop.eup %9568  ;;  %5165 = vmax.xlane.f32.xlu0 %v5164_v48 }
 0x76f   :  { %v5179_v6 = vsel %vm1596_vm1, %v11496_v45, -inf  ;;  %v5293_v1 = vsel %vm1596_vm1, %v11500_v55, 0.0  ;;  %v11508_v36 = vadd.f32 %v9697_v60, %v5128_v34  ;;  %v12425_v60 = vld [vmem:[#allocation52_spill] sm:$0xff]  ;;  %v12426_v34 = vld [vmem:[#allocation53_spill] sm:$0xff] }
 0x770   :  { %5180 = vmax.xlane.f32.xlu1 %v5179_v6  ;;  %v11506_v30 = vpop.eup %9570 }
 0x771   :  { %v5290_v6 = vsel %vm1596_vm1, %v11506_v30, 0.0 }
 0x772   :  { %5294 = vadd.xlane.f32.xlu0 %v5293_v1  ;;  %v9124_v0 = vpop.f32.mrf.mxu0 }
 0x773   :  { %v5133_v27 = vmul.f32 0.17677669, %v9124_v0  ;;  %v5176_v0 = vsel %vm1596_vm1, %v11508_v36, -inf }
 0x774   :  { %v5020_v13 = vpop.f32.mrf.mxu0 }
 0x775   :  { %v11510_v25 = vadd.f32 %v9698_v56, %v5133_v27  ;;  %v5132_v48 = vmul.f32 0.17677669, %v5020_v13 }
 0x776   :  { %5291 = vadd.xlane.f32.xlu0 %v5290_v6 }
 0x777   :  { %v5191_v3 = vsel %vm1596_vm1, %v11510_v25, -inf  ;;  %v11516_v1 = vadd.f32 %v9699_v10, %v5132_v48 }
 0x778   :  { %5192 = vmax.xlane.f32.xlu1 %v5191_v3 }
 0x779   :  { %v5188_v56 = vsel %vm1596_vm1, %v11516_v1, -inf }
 0x77a   :  { %5177 = vmax.xlane.f32.xlu0 %v5176_v0 }
 0x77e   :  { %5189 = vmax.xlane.f32.xlu0 %v5188_v56 }
 0x789   :  { %5780 = vrot.lane.b32.xlu1 %v12425_v60, %s9926_s30 }
 0x794   :  { %5693 = vrot.lane.b32.xlu0 %v12426_v34, %s9926_s30 }
 0x7e1   :  { %v5259_v27 = vpop.xlane.xlu1 %5258 }
 0x7e2   :  { %9572 = vrcp.f32 %v5259_v27 }
 0x7e5   :  { %v5256_v13 = vpop.xlane.xlu0 %5255 }
 0x7e6   :  { %9574 = vrcp.f32 %v5256_v13 }
 0x7e9   :  { %v5271_v10 = vpop.xlane.xlu1 %5270 }
 0x7ea   :  { %9576 = vrcp.f32 %v5271_v10 }
 0x7eb   :  { %v5268_v48 = vpop.xlane.xlu0 %5267 }
 0x7ec   :  { %9578 = vrcp.f32 %v5268_v48 }
 0x7ed   :  { %v5157_v6 = vpop.xlane.xlu1 %5156 }
 0x7ee   :  { %v5201_v3 = vsub.f32 %v11458_v54, %v5157_v6 }
 0x7ef   :  { %v9573_v0 = vpop.eup %9572  ;;  %v5154_v2 = vpop.xlane.xlu0 %5153 }
 0x7f0   :  { %v5218_v56 = vmul.f32 1.442695, %v5201_v3  ;;  %v5200_v16 = vsub.f32 %v11468_v33, %v5154_v2  ;;  %v5303_v60 = vmul.f32 %v9573_v0, %v11440_v44 }
 0x7f1   :  { %v5283_v26 = vpop.xlane.xlu1 %5282 }
 0x7f2   :  { %9580 = vpow2.f32 %v5218_v56  ;;  %v5216_v34 = vmul.f32 1.442695, %v5200_v16  ;;  %5332 = vst.msk [vmem:[#allocation17 + $0x68] sm:$0xff] %vm1596_vm1, %v5303_v60 }
 0x7f3   :  { %v9575_v27 = vpop.eup %9574  ;;  %9582 = vrcp.f32 %v5283_v26  ;;  %v5280_v13 = vpop.xlane.xlu0 %5279 }
 0x7f4   :  { %9584 = vpow2.f32 %v5216_v34  ;;  %v5301_v10 = vmul.f32 %v9575_v27, %v11448_v47 }
 0x7f5   :  { %9586 = vrcp.f32 %v5280_v13  ;;  %v5169_v54 = vpop.xlane.xlu1 %5168 }
 0x7f6   :  { %v5205_v48 = vsub.f32 %v11481_v35, %v5169_v54  ;;  %5331 = vst.msk [vmem:[#allocation17 + $0x60] sm:$0xff] %vm1596_vm1, %v5301_v10  ;;  %9143 = vmatprep.mubr.msk.f32.mxu1 %vm1596_vm1, %v5301_v10 }
 0x7f7   :  { %v9577_v44 = vpop.eup %9576  ;;  %v5166_v33 = vpop.xlane.xlu0 %5165  ;;  %9144 = vmatmul.mubr.msk.f32.vlgmr.msra.gmra.mxu1 %vm1596_vm1, %v5303_v60 }
 0x7f8   :  { %v5226_v16 = vmul.f32 1.442695, %v5205_v48  ;;  %v5204_v2 = vsub.f32 %v11490_v14, %v5166_v33  ;;  %9154 = vmatpush3.msra.mxu1 %v11290_v11  ;;  %v5311_v26 = vmul.f32 %v9577_v44, %v11453_v57 }
 0x7f9   :  { %v9579_v47 = vpop.eup %9578  ;;  %9155 = vmatprep.subr.mxu1 %v11424_v59  ;;  %v5181_v11 = vpop.xlane.xlu1 %5180 }
 0x7fa   :  { %9588 = vpow2.f32 %v5226_v16  ;;  %v5224_v35 = vmul.f32 1.442695, %v5204_v2  ;;  %9156 = vmatpush3.msra.mxu1 %v11424_v59  ;;  %v5309_v34 = vmul.f32 %v9579_v47, %v11463_v18  ;;  %5336 = vst.msk [vmem:[#allocation17 + $0xe8] sm:$0xff] %vm1596_vm1, %v5311_v26  ;;  %v12427_v2 = vld [vmem:[#allocation57_spill] sm:$0xff] }
 0x7fb   :  { %9167 = vmatprep.subr.mxu1 %v11428_v41  ;;  %v5295_v60 = vpop.xlane.xlu0 %5294 }
 0x7fc   :  { %9590 = vpow2.f32 %v5224_v35  ;;  %5335 = vst.msk [vmem:[#allocation17 + $0xe0] sm:$0xff] %vm1596_vm1, %v5309_v34  ;;  %9157 = vmatprep.mubr.msk.f32.mxu1 %vm1596_vm1, %v5309_v34 }
 0x7fd   :  { %9592 = vrcp.f32 %v5295_v60  ;;  %9158 = vmatmul.mubr.msk.f32.vlgmr.msra.gmra.mxu1 %vm1596_vm1, %v5311_v26  ;;  %v12428_v26 = vld [vmem:[#allocation89_spill] sm:$0xff] }
 0x7fe   :  { %9168 = vmatpush3.msra.mxu1 %v11428_v41 }
 0x7ff   :  { %v11547_v57 = vpop.eup %9580  ;;  %v5292_v59 = vpop.xlane.xlu0 %5291 }
 0x800   :  { %v9583_v18 = vpop.eup %9582  ;;  %9594 = vrcp.f32 %v5292_v59  ;;  %v5251_v14 = vsel %vm1596_vm1, %v11547_v57, 0.0 }
 0x801   :  { %v11551_v6 = vpop.eup %9584  ;;  %5252 = vadd.xlane.f32.xlu1 %v5251_v14  ;;  %v5193_v3 = vpop.xlane.xlu1 %5192  ;;  %v5319_v0 = vmul.f32 %v9583_v18, %v11476_v22 }
 0x802   :  { %v9587_v56 = vpop.eup %9586  ;;  %v5248_v27 = vsel %vm1596_vm1, %v11551_v6, 0.0  ;;  %v5213_v59 = vsub.f32 %v11510_v25, %v5193_v3 }
 0x803   :  { %5249 = vadd.xlane.f32.xlu0 %v5248_v27  ;;  %v5317_v41 = vmul.f32 %v9587_v56, %v11485_v51  ;;  %5340 = vst.msk [vmem:[#allocation17 + $0x168] sm:$0xff] %vm1596_vm1, %v5319_v0  ;;  %v5178_v47 = vpop.xlane.xlu0 %5177 }
 0x804   :  { %v5208_v35 = vsub.f32 %v11508_v36, %v5178_v47  ;;  %v5242_v14 = vmul.f32 1.442695, %v5213_v59  ;;  %v9425_v59 = vld [vmem:[#allocation14 + $0x20] sm:$0xff]  }
 0x805   :  { %5339 = vst.msk [vmem:[#allocation17 + $0x160] sm:$0xff] %vm1596_vm1, %v5317_v41  ;;  %9171 = vmatprep.mubr.msk.f32.mxu1 %vm1596_vm1, %v5317_v41  ;;  %v5781_v13 = vpop.permute.xlu1 %5780 }
 0x806   :  { %9169 = vmatprep.subr.mxu1 %v5781_v13 }
 0x807   :  { %v11560_v10 = vpop.eup %9588  ;;  %9170 = vmatpush3.msra.mxu1 %v5781_v13  ;;  %v5190_v34 = vpop.xlane.xlu0 %5189 }
 0x808   :  { %v5263_v22 = vsel %vm1596_vm1, %v11560_v10, 0.0  ;;  %9172 = vmatmul.mubr.msk.f32.vlgmr.msra.gmra.mxu1 %vm1596_vm1, %v5319_v0  ;;  %v5212_v18 = vsub.f32 %v11516_v1, %v5190_v34  ;;  %v9424_v34 = vld [vmem:[#allocation14 + $0x28] sm:$0xff]  }
 0x809   :  { %v11565_v54 = vpop.eup %9590  ;;  %5264 = vadd.xlane.f32.xlu1 %v5263_v22 }
 0x80a   :  { %v9593_v51 = vpop.eup %9592  ;;  %v5260_v48 = vsel %vm1596_vm1, %v11565_v54, 0.0  ;;  %v5240_v0 = vmul.f32 1.442695, %v5212_v18 }
 0x80b   :  { %5261 = vadd.xlane.f32.xlu0 %v5260_v48  ;;  %v11570_v44 = vmul.f32 %v9593_v51, %v11500_v55  ;;  %v5209_v55 = vsub.f32 %v11496_v45, %v5181_v11 }
 0x80d   :  { %v9595_v33 = vpop.eup %9594  ;;  %5344 = vst.msk [vmem:[#allocation17 + $0x1e8] sm:$0xff] %vm1596_vm1, %v11570_v44  ;;  %v5234_v60 = vmul.f32 1.442695, %v5209_v55 }
 0x80e   :  { %v5325_v16 = vmul.f32 %v9595_v33, %v11506_v30  ;;  %v5232_v30 = vmul.f32 1.442695, %v5208_v35 }
 0x80f   :  { %9596 = vpow2.f32 %v5234_v60 }
 0x810   :  { %5343 = vst.msk [vmem:[#allocation17 + $0x1e0] sm:$0xff] %vm1596_vm1, %v5325_v16  ;;  %9185 = vmatprep.mubr.msk.f32.mxu1 %vm1596_vm1, %v5325_v16  ;;  %9598 = vpow2.f32 %v5232_v30 }
 0x811   :  { %9600 = vpow2.f32 %v5242_v14 }
 0x812   :  { %9602 = vpow2.f32 %v5240_v0 }
 0x81a   :  { %5956 = vrot.lane.b32.xlu1 %v12427_v2, %s9926_s30 }
 0x81c   :  { %v11585_v56 = vpop.eup %9596 }
 0x81d   :  { %v11587_v27 = vpop.eup %9598  ;;  %v5275_v36 = vsel %vm1596_vm1, %v11585_v56, 0.0 }
 0x81e   :  { %v11591_v45 = vpop.eup %9600  ;;  %v5272_v25 = vsel %vm1596_vm1, %v11587_v27, 0.0 }
 0x81f   :  { %v11595_v1 = vpop.eup %9602  ;;  %v5287_v11 = vsel %vm1596_vm1, %v11591_v45, 0.0 }
 0x820   :  { %v5284_v3 = vsel %vm1596_vm1, %v11595_v1, 0.0 }
 0x821   :  { %5869 = vrot.lane.b32.xlu0 %v12428_v26, %s9926_s30 }
 0x83e   :  { %5276 = vadd.xlane.f32.xlu1 %v5275_v36 }
 0x840   :  { %5273 = vadd.xlane.f32.xlu0 %v5272_v25 }
 0x842   :  { %5288 = vadd.xlane.f32.xlu1 %v5287_v11 }
 0x844   :  { %5285 = vadd.xlane.f32.xlu0 %v5284_v3 }
 0x853   :  { %5954 = vrot.lane.b32.xlu1 %v12317_v28, %s9926_s30 }
 0x857   :  { %6206 = vrot.lane.b32.xlu1 %v12360_v8, %s9937_s10  ;;  %v12429_v8 = vld [vmem:[#allocation33_spill] sm:$0xff] }
 0x85a   :  { %5867 = vrot.lane.b32.xlu0 %v10307_v5, %s9926_s30 }
 0x85b   :  { %6299 = vrot.lane.b32.xlu1 %v12351_v20, %s9937_s10  ;;  %v12434_v20 = vld [vmem:[#allocation50_spill] sm:$0xff] }
 0x85e   :  { %6208 = vrot.lane.b32.xlu0 %v12359_v53, %s9937_s10 }
 0x85f   :  { %6297 = vrot.lane.b32.xlu1 %v12352_v12, %s9937_s10 }
 0x862   :  { %6202 = vrot.lane.b32.xlu0 %v12361_v49, %s9937_s10 }
 0x863   :  { %6390 = vrot.lane.b32.xlu1 %v12354_v40, %s9937_s10 }
 0x866   :  { %6204 = vrot.lane.b32.xlu0 %v12429_v8, %s9937_s10 }
 0x867   :  { %6388 = vrot.lane.b32.xlu1 %v12364_v52, %s9937_s10  ;;  %v12430_v52 = vld [vmem:[#allocation46_spill] sm:$0xff] }
 0x86a   :  { %6293 = vrot.lane.b32.xlu0 %v12362_v38, %s9937_s10 }
 0x86b   :  { %6481 = vrot.lane.b32.xlu1 %v12355_v62, %s9937_s10 }
 0x86e   :  { %6295 = vrot.lane.b32.xlu0 %v12363_v19, %s9937_s10  ;;  %v12432_v19 = vld [vmem:[#allocation40_spill] sm:$0xff] }
 0x86f   :  { %6479 = vrot.lane.b32.xlu1 %v12356_v58, %s9937_s10 }
 0x872   :  { %6384 = vrot.lane.b32.xlu0 %v12365_v50, %s9937_s10  ;;  %v12431_v50 = vld [vmem:[#allocation44_spill] sm:$0xff] }
 0x873   :  { %6572 = vrot.lane.b32.xlu1 %v12358_v23, %s9937_s10 }
 0x876   :  { %6386 = vrot.lane.b32.xlu0 %v12357_v21, %s9937_s10  ;;  %v12436_v21 = vld [vmem:[#allocation51_spill] sm:$0xff] }
 0x877   :  { %6663 = vrot.lane.b32.xlu1 %v10221_v39, %s9937_s10  ;;  %v12433_v39 = vld [vmem:[#allocation48_spill] sm:$0xff] }
 0x87a   :  { %6475 = vrot.lane.b32.xlu0 %v12366_v29, %s9937_s10  ;;  %v5694_v29 = vpop.permute.xlu0 %5693 }
 0x87b   :  { %6661 = vrot.lane.b32.xlu1 %v10240_v43, %s9937_s10 }
 0x87e   :  { %6477 = vrot.lane.b32.xlu0 %v12430_v52, %s9937_s10 }
 0x87f   :  { %6568 = vrot.lane.b32.xlu1 %v12431_v50, %s9937_s10 }
 0x882   :  { %6570 = vrot.lane.b32.xlu0 %v10158_v24, %s9937_s10  ;;  %v12435_v24 = vld [vmem:[#allocation47_spill] sm:$0xff] }
 0x883   :  { %6754 = vrot.lane.b32.xlu1 %v12432_v19, %s9937_s10 }
 0x886   :  { %6566 = vrot.lane.b32.xlu0 %v10134_v15, %s9937_s10 }
 0x887   :  { %6845 = vrot.lane.b32.xlu1 %v12433_v39, %s9937_s10 }
 0x88a   :  { %v5253_v43 = vpop.xlane.xlu1 %5252  ;;  %6657 = vrot.lane.b32.xlu0 %v10234_v42, %s9937_s10 }
 0x88b   :  { %9604 = vrcp.f32 %v5253_v43  ;;  %6843 = vrot.lane.b32.xlu1 %v12434_v20, %s9937_s10 }
 0x88c   :  { %v5250_v12 = vpop.xlane.xlu0 %5249 }
 0x88d   :  { %9606 = vrcp.f32 %v5250_v12 }
 0x88e   :  { %6659 = vrot.lane.b32.xlu0 %v10261_v46, %s9937_s10 }
 0x88f   :  { %6750 = vrot.lane.b32.xlu1 %v12435_v24, %s9937_s10 }
 0x892   :  { %v5265_v15 = vpop.xlane.xlu1 %5264  ;;  %6752 = vrot.lane.b32.xlu0 %v12367_v4, %s9937_s10 }
 0x893   :  { %9608 = vrcp.f32 %v5265_v15  ;;  %6841 = vrot.lane.b32.xlu1 %v12436_v21, %s9937_s10 }
 0x894   :  { %v5262_v42 = vpop.xlane.xlu0 %5261 }
 0x895   :  { %9610 = vrcp.f32 %v5262_v42 }
 0x896   :  { %v5957_v40 = vpop.permute.xlu1 %5956  ;;  %6748 = vrot.lane.b32.xlu0 %v12368_v32, %s9937_s10 }
 0x897   :  { %9181 = vmatprep.subr.mxu1 %v5957_v40 }
 0x898   :  { %v9605_v62 = vpop.eup %9604  ;;  %9182 = vmatpush3.msra.mxu1 %v5957_v40  ;;  %v5870_v32 = vpop.permute.xlu0 %5869 }
 0x899   :  { %v5299_v46 = vmul.f32 %v9605_v62, %v11547_v57 }
 0x89a   :  { %v9607_v58 = vpop.eup %9606  ;;  %6839 = vrot.lane.b32.xlu0 %v12369_v63, %s9937_s10 }
 0x89b   :  { %v5297_v23 = vmul.f32 %v9607_v58, %v11551_v6  ;;  %5330 = vst.msk [vmem:[#allocation17 + $0x28] sm:$0xff] %vm1596_vm1, %v5299_v46 }
 0x89d   :  { %5329 = vst.msk [vmem:[#allocation17 + $0x20] sm:$0xff] %vm1596_vm1, %v5297_v23  ;;  %9136 = vmatprep.mubr.msk.f32.mxu0 %vm1596_vm1, %v5297_v23 }
 0x89e   :  { %9137 = vmatmul.mubr.msk.f32.vlgmr.msra.gmra.mxu0 %vm1596_vm1, %v5299_v46 }
 0x89f   :  { %9147 = vmatpush3.msra.mxu0 %v11286_v17 }
 0x8a0   :  { %v9609_v53 = vpop.eup %9608  ;;  %9148 = vmatprep.subr.mxu0 %v11416_v61 }
 0x8a1   :  { %9149 = vmatpush3.msra.mxu0 %v11416_v61  ;;  %v5307_v49 = vmul.f32 %v9609_v53, %v11560_v10 }
 0x8a2   :  { %v9611_v38 = vpop.eup %9610  ;;  %9160 = vmatprep.subr.mxu0 %v11420_v9 }
 0x8a3   :  { %v5305_v4 = vmul.f32 %v9611_v38, %v11565_v54  ;;  %5334 = vst.msk [vmem:[#allocation17 + $0xa8] sm:$0xff] %vm1596_vm1, %v5307_v49 }
 0x8a5   :  { %5333 = vst.msk [vmem:[#allocation17 + $0xa0] sm:$0xff] %vm1596_vm1, %v5305_v4  ;;  %9150 = vmatprep.mubr.msk.f32.mxu0 %vm1596_vm1, %v5305_v4 }
 0x8a6   :  { %9151 = vmatmul.mubr.msk.f32.vlgmr.msra.gmra.mxu0 %vm1596_vm1, %v5307_v49 }
 0x8a7   :  { %9161 = vmatpush3.msra.mxu0 %v11420_v9 }
 0x8a8   :  { %9162 = vmatprep.subr.mxu0 %v5694_v29 }
 0x8a9   :  { %9163 = vmatpush3.msra.mxu0 %v5694_v29 }
 0x8aa   :  { %9174 = vmatprep.subr.mxu0 %v5870_v32 }
 0x8b7   :  { %v9145_v62 = vpop.f32.mrf.mxu1 }
 0x8b9   :  { %v5510_v58 = vpop.f32.mrf.mxu1 }
 0x8ba   :  { %v6042_v49 = vpack.c.bf16 %v9145_v62, %v5510_v58 }
 0x8bd   :  { %v9159_v38 = vpop.f32.mrf.mxu1 }
 0x8c7   :  { %v5277_v63 = vpop.xlane.xlu1 %5276 }
 0x8c8   :  { %9612 = vrcp.f32 %v5277_v63 }
 0x8c9   :  { %v5274_v17 = vpop.xlane.xlu0 %5273 }
 0x8ca   :  { %9614 = vrcp.f32 %v5274_v17 }
 0x8cb   :  { %v5289_v61 = vpop.xlane.xlu1 %5288 }
 0x8cc   :  { %9616 = vrcp.f32 %v5289_v61 }
 0x8cd   :  { %v5286_v57 = vpop.xlane.xlu0 %5285 }
 0x8ce   :  { %9618 = vrcp.f32 %v5286_v57 }
 0x8cf   :  { %v5955_v6 = vpop.permute.xlu1 %5954 }
 0x8d0   :  { %9183 = vmatprep.subr.mxu1 %v5955_v6 }
 0x8d1   :  { %9184 = vmatpush3.msra.mxu1 %v5955_v6  ;;  %v5868_v41 = vpop.permute.xlu0 %5867 }
 0x8d2   :  { %9186 = vmatmul.mubr.msk.f32.vlgmr.msra.gmra.mxu1 %vm1596_vm1, %v11570_v44 }
 0x8d3   :  { %v6207_v9 = vpop.permute.xlu1 %6206 }
 0x8d5   :  { %v9613_v13 = vpop.eup %9612  ;;  %v6209_v10 = vpop.permute.xlu0 %6208 }
 0x8d6   :  { %9208 = vmatprep.subr.msk.mxu1 %vm867_vm0, %v6209_v10  ;;  %v5315_v22 = vmul.f32 %v9613_v13, %v11585_v56 }
 0x8d7   :  { %v9615_v54 = vpop.eup %9614  ;;  %v6300_v51 = vpop.permute.xlu1 %6299  ;;  %9209 = vmatpush3.xpose.msk.msra.mxu1 %vm867_vm0, %v6209_v10 }
 0x8d8   :  { %9210 = vmatprep.subr.msk.mxu1 %vm867_vm0, %v6207_v9  ;;  %v5313_v48 = vmul.f32 %v9615_v54, %v11587_v27  ;;  %5338 = vst.msk [vmem:[#allocation17 + $0x128] sm:$0xff] %vm1596_vm1, %v5315_v22 }
 0x8d9   :  { %v9617_v33 = vpop.eup %9616  ;;  %v6203_v16 = vpop.permute.xlu0 %6202 }
 0x8da   :  { %5337 = vst.msk [vmem:[#allocation17 + $0x120] sm:$0xff] %vm1596_vm1, %v5313_v48  ;;  %9164 = vmatprep.mubr.msk.f32.mxu0 %vm1596_vm1, %v5313_v48  ;;  %9212 = vmatprep.mubr.msk.f32.mxu1 %vm867_vm0, %v6203_v16  ;;  %v5323_v44 = vmul.f32 %v9617_v33, %v11591_v45 }
 0x8db   :  { %v9619_v47 = vpop.eup %9618  ;;  %v6298_v55 = vpop.permute.xlu1 %6297  ;;  %9165 = vmatmul.mubr.msk.f32.vlgmr.msra.gmra.mxu0 %vm1596_vm1, %v5315_v22  ;;  %9211 = vmatpush3.xpose.msk.msra.mxu1 %vm867_vm0, %v6207_v9 }
 0x8dc   :  { %9175 = vmatpush3.msra.mxu0 %v5870_v32  ;;  %9215 = vmatprep.subr.msk.mxu1 %vm867_vm0, %v6300_v51  ;;  %v5321_v35 = vmul.f32 %v9619_v47, %v11595_v1  ;;  %5342 = vst.msk [vmem:[#allocation17 + $0x1a8] sm:$0xff] %vm1596_vm1, %v5323_v44  ;;  %v5684_v32 = vpop.f32.mrf.mxu1 }
 0x8dd   :  { %9176 = vmatprep.subr.mxu0 %v5868_v41  ;;  %v6205_v60 = vpop.permute.xlu0 %6204  ;;  %v6044_v61 = vpack.c.bf16 %v9159_v38, %v5684_v32 }
 0x8de   :  { %9177 = vmatpush3.msra.mxu0 %v5868_v41  ;;  %5341 = vst.msk [vmem:[#allocation17 + $0x1a0] sm:$0xff] %vm1596_vm1, %v5321_v35  ;;  %9178 = vmatprep.mubr.msk.f32.mxu0 %vm1596_vm1, %v5321_v35  ;;  %v9173_v57 = vpop.f32.mrf.mxu1 }
 0x8df   :  { %9213 = vmatmul.mubr.msk.f32.vlgmr.msra.gmra.mxu1 %vm867_vm0, %v6205_v60  ;;  %v6391_v30 = vpop.permute.xlu1 %6390  ;;  %9179 = vmatmul.mubr.msk.f32.vlgmr.msra.gmra.mxu0 %vm1596_vm1, %v5323_v44 }
 0x8e0   :  { %9216 = vmatpush3.xpose.msk.msra.mxu1 %vm867_vm0, %v6300_v51  ;;  %9188 = vmatprep.subr.bf16.mxu0 %v9424_v34  ;;  %v5858_v6 = vpop.f32.mrf.mxu1 }
 0x8e1   :  { %9217 = vmatprep.subr.msk.mxu1 %vm867_vm0, %v6298_v55  ;;  %v6294_v18 = vpop.permute.xlu0 %6293  ;;  %9189 = vmatpush3.bf16.msra.mxu0 %v9424_v34  ;;  %v6046_v54 = vpack.c.bf16 %v9173_v57, %v5858_v6 }
 0x8e2   :  { %9219 = vmatprep.mubr.msk.f32.mxu1 %vm867_vm0, %v6294_v18  ;;  %9190 = vmatprep.subr.bf16.mxu0 %v9425_v59 }
 0x8e3   :  { %v6389_v14 = vpop.permute.xlu1 %6388 }
 0x8e4   :  { %9218 = vmatpush3.xpose.msk.msra.mxu1 %vm867_vm0, %v6298_v55 }
 0x8e5   :  { %9222 = vmatprep.subr.msk.mxu1 %vm867_vm0, %v6391_v30  ;;  %v6296_v0 = vpop.permute.xlu0 %6295  ;;  %9191 = vmatpush3.bf16.msra.mxu0 %v9425_v59 }
 0x8e7   :  { %9220 = vmatmul.mubr.msk.f32.vlgmr.msra.gmra.mxu1 %vm867_vm0, %v6296_v0  ;;  %v6482_v56 = vpop.permute.xlu1 %6481 }
 0x8e8   :  { %9223 = vmatpush3.xpose.msk.msra.mxu1 %vm867_vm0, %v6391_v30 }
 0x8e9   :  { %9224 = vmatprep.subr.msk.mxu1 %vm867_vm0, %v6389_v14  ;;  %v6385_v27 = vpop.permute.xlu0 %6384 }
 0x8ea   :  { %9226 = vmatprep.mubr.msk.f32.mxu1 %vm867_vm0, %v6385_v27 }
 0x8eb   :  { %v6480_v36 = vpop.permute.xlu1 %6479 }
 0x8ec   :  { %9225 = vmatpush3.xpose.msk.msra.mxu1 %vm867_vm0, %v6389_v14 }
 0x8ed   :  { %9229 = vmatprep.subr.msk.mxu1 %vm867_vm0, %v6482_v56  ;;  %v6387_v45 = vpop.permute.xlu0 %6386 }
 0x8ef   :  { %9227 = vmatmul.mubr.msk.f32.vlgmr.msra.gmra.mxu1 %vm867_vm0, %v6387_v45  ;;  %v6573_v25 = vpop.permute.xlu1 %6572 }
 0x8f0   :  { %9230 = vmatpush3.xpose.msk.msra.mxu1 %vm867_vm0, %v6482_v56  ;;  %9236 = vmatprep.subr.msk.mxu0 %vm867_vm0, %v6573_v25  ;;  %v12437_v56 = vld [vmem:[#allocation35_spill] sm:$0xff] }
 0x8f1   :  { %9231 = vmatprep.subr.msk.mxu1 %vm867_vm0, %v6480_v36  ;;  %v6476_v1 = vpop.permute.xlu0 %6475 }
 0x8f2   :  { %9233 = vmatprep.mubr.msk.f32.mxu1 %vm867_vm0, %v6476_v1 }
 0x8f3   :  { %v6664_v11 = vpop.permute.xlu1 %6663 }
 0x8f4   :  { %9232 = vmatpush3.xpose.msk.msra.mxu1 %vm867_vm0, %v6480_v36 }
 0x8f5   :  { %9243 = vmatprep.subr.msk.mxu1 %vm867_vm0, %v6664_v11  ;;  %v6478_v3 = vpop.permute.xlu0 %6477 }
 0x8f7   :  { %9234 = vmatmul.mubr.msk.f32.vlgmr.msra.gmra.mxu1 %vm867_vm0, %v6478_v3  ;;  %v6662_v8 = vpop.permute.xlu1 %6661 }
 0x8f8   :  { %9244 = vmatpush3.xpose.msk.msra.mxu1 %vm867_vm0, %v6664_v11 }
 0x8f9   :  { %9245 = vmatprep.subr.msk.mxu1 %vm867_vm0, %v6662_v8  ;;  %v6571_v52 = vpop.permute.xlu0 %6570 }
 0x8fb   :  { %v11728_v50 = vpop.permute.xlu1 %6568 }
 0x8fc   :  { %9246 = vmatpush3.xpose.msk.msra.mxu1 %vm867_vm0, %v6662_v8 }
 0x8fd   :  { %v11731_v19 = vpop.permute.xlu0 %6566 }
 0x8ff   :  { %v11733_v39 = vpop.permute.xlu1 %6754 }
 0x901   :  { %v6658_v29 = vpop.permute.xlu0 %6657 }
 0x902   :  { %9247 = vmatprep.mubr.msk.f32.mxu1 %vm867_vm0, %v6658_v29 }
 0x903   :  { %v6846_v43 = vpop.permute.xlu1 %6845 }
 0x904   :  { %9257 = vmatprep.subr.msk.mxu1 %vm867_vm0, %v6846_v43 }
 0x905   :  { %v6660_v20 = vpop.permute.xlu0 %6659 }
 0x906   :  { %9248 = vmatmul.mubr.msk.f32.vlgmr.msra.gmra.mxu1 %vm867_vm0, %v6660_v20 }
 0x907   :  { %9258 = vmatpush3.xpose.msk.msra.mxu1 %vm867_vm0, %v6846_v43  ;;  %v6844_v12 = vpop.permute.xlu1 %6843 }
 0x908   :  { %9259 = vmatprep.subr.msk.mxu1 %vm867_vm0, %v6844_v12 }
 0x909   :  { %v11740_v24 = vpop.permute.xlu0 %6752 }
 0x90b   :  { %9260 = vmatpush3.xpose.msk.msra.mxu1 %vm867_vm0, %v6844_v12  ;;  %v11743_v15 = vpop.permute.xlu1 %6750  ;;  %v9700_v12 = vld [vmem:[#allocation8 + $0x38] sm:$0xff] }
 0x90d   :  { %v11745_v21 = vpop.permute.xlu0 %6748 }
 0x90f   :  { %v6842_v40 = vpop.permute.xlu1 %6841 }
 0x911   :  { %v6840_v42 = vpop.permute.xlu0 %6839 }
 0x912   :  { %9261 = vmatprep.mubr.msk.f32.mxu1 %vm867_vm0, %v6840_v42 }
 0x913   :  { %9262 = vmatmul.mubr.msk.f32.vlgmr.msra.gmra.mxu1 %vm867_vm0, %v6842_v40  ;;  %v9701_v40 = vld [vmem:[#allocation8 + $0x30] sm:$0xff] }
 0x95e   :  { %v9138_v46 = vpop.f32.mrf.mxu0 }
 0x960   :  { %v5423_v23 = vpop.f32.mrf.mxu0 }
 0x961   :  { %v6041_v53 = vpack.c.bf16 %v9138_v46, %v5423_v23 }
 0x963   :  { %9192 = vmatprep.mubr.msk.bf16.mxu0 %vm867_vm0, %v6041_v53 }
 0x964   :  { %9193 = vmatmul.mubr.msk.bf16.vlgmr.msra.gmra.mxu0 %vm867_vm0, %v6042_v49  ;;  %v9702_v49 = vld [vmem:[#allocation8 + $0x58] sm:$0xff] }
 0x965   :  { %9237 = vmatpush3.xpose.msk.msra.mxu0 %vm867_vm0, %v6573_v25 }
 0x966   :  { %9238 = vmatprep.subr.msk.mxu0 %vm867_vm0, %v6571_v52  ;;  %v9152_v4 = vpop.f32.mrf.mxu0 }
 0x968   :  { %v5597_v63 = vpop.f32.mrf.mxu0 }
 0x969   :  { %v6043_v17 = vpack.c.bf16 %v9152_v4, %v5597_v63  ;;  %9239 = vmatpush3.xpose.msk.msra.mxu0 %vm867_vm0, %v6571_v52  ;;  %v12439_v52 = vld [vmem:[#allocation82_spill] sm:$0xff]  ;;  %v9703_v4 = vld [vmem:[#allocation8 + $0x50] sm:$0xff] }
 0x96a   :  { %9250 = vmatprep.subr.msk.mxu0 %vm867_vm0, %v11733_v39 }
 0x96b   :  { %9196 = vmatprep.mubr.msk.bf16.mxu0 %vm867_vm0, %v6043_v17 }
 0x96c   :  { %9197 = vmatmul.mubr.msk.bf16.gmra.mxu0 %vm867_vm0, %v6044_v61 }
 0x992   :  { %v9187_v41 = vpop.f32.mrf.mxu1 }
 0x994   :  { %v6032_v13 = vpop.f32.mrf.mxu1 }
 0x995   :  { %v6048_v30 = vpack.c.bf16 %v9187_v41, %v6032_v13  ;;  %v9704_v41 = vld [vmem:[#allocation8 + $0x78] sm:$0xff] }
 0x99b   :  { %v9166_v9 = vpop.f32.mrf.mxu0 }
 0x99d   :  { %v5771_v10 = vpop.f32.mrf.mxu0 }
 0x99e   :  { %v6045_v22 = vpack.c.bf16 %v9166_v9, %v5771_v10  ;;  %v9705_v10 = vld [vmem:[#allocation8 + $0x70] sm:$0xff] }
 0x99f   :  { %v9214_v51 = vpop.f32.mrf.mxu1  ;;  %v9180_v48 = vpop.f32.mrf.mxu0 }
 0x9a0   :  { %v6931_v33 = vmul.f32 0.17677669, %v9214_v51  ;;  %9200 = vmatprep.mubr.msk.bf16.mxu0 %vm867_vm0, %v6045_v22 }
 0x9a1   :  { %v6284_v16 = vpop.f32.mrf.mxu1  ;;  %v5945_v44 = vpop.f32.mrf.mxu0  ;;  %9201 = vmatmul.mubr.msk.bf16.gmra.mxu0 %vm867_vm0, %v6046_v54 }
 0x9a2   :  { %v11761_v47 = vadd.f32 %v11455_v7, %v6931_v33  ;;  %v6930_v55 = vmul.f32 0.17677669, %v6284_v16  ;;  %v6047_v35 = vpack.c.bf16 %v9180_v48, %v5945_v44  ;;  %v12440_v48 = vld [vmem:[#allocation34_spill] sm:$0xff] }
 0x9a3   :  { %v12441_v33 = vld [vmem:[#allocation70_spill] sm:$0xff] }
 0x9a4   :  { %v11764_v34 = vadd.f32 %v11465_v37, %v6930_v55  ;;  %9204 = vmatprep.mubr.msk.bf16.mxu0 %vm867_vm0, %v6047_v35  ;;  %v6965_v60 = vsel %vm1596_vm1, %v11761_v47, -inf  ;;  %v4338_v16 = vadd.f32 %v12441_v33, %v12440_v48  ;;  %v12442_v55 = vld [vmem:[#allocation43_spill] sm:$0xff] }
 0x9a5   :  { %6966 = vmax.xlane.f32.xlu1 %v6965_v60  ;;  %v12443_v35 = vld [vmem:[#allocation71_spill] sm:$0xff] }
 0x9a6   :  { %v6962_v59 = vsel %vm1596_vm1, %v11764_v34, -inf  ;;  %v4330_v60 = vadd.f32 %v12443_v35, %v12442_v55 }
 0x9a7   :  { %6963 = vmax.xlane.f32.xlu0 %v6962_v59  ;;  %v9221_v18 = vpop.f32.mrf.mxu1 }
 0x9a8   :  { %v6933_v14 = vmul.f32 0.17677669, %v9221_v18  ;;  %v12444_v18 = vld [vmem:[#allocation39_spill] sm:$0xff] }
 0x9a9   :  { %v6375_v7 = vpop.f32.mrf.mxu1  ;;  %9205 = vmatmul.mubr.msk.bf16.gmra.mxu0 %vm867_vm0, %v6048_v30 }
 0x9aa   :  { %v11773_v0 = vadd.f32 %v11384_v31, %v6933_v14  ;;  %v6932_v37 = vmul.f32 0.17677669, %v6375_v7  ;;  %9240 = vmatprep.mubr.msk.f32.mxu0 %vm867_vm0, %v11731_v19  ;;  %v12438_v31 = vld [vmem:[#allocation85_spill] sm:$0xff]  ;;  %v12445_v14 = vld [vmem:[#allocation68_spill] sm:$0xff] }
 0x9ab   :  { %v4341_v7 = vadd.f32 %v12445_v14, %v12444_v18 }
 0x9ac   :  { %v11778_v27 = vadd.f32 %v12437_v56, %v6932_v37  ;;  %v6971_v36 = vsel %vm1596_vm1, %v11773_v0, -inf }
 0x9ad   :  { %6972 = vmax.xlane.f32.xlu0 %v6971_v36  ;;  %v12446_v36 = vld [vmem:[#allocation36_spill] sm:$0xff] }
 0x9ae   :  { %v6968_v1 = vsel %vm1596_vm1, %v11778_v27, -inf }
 0x9af   :  { %v9228_v45 = vpop.f32.mrf.mxu1 }
 0x9b0   :  { %v6935_v25 = vmul.f32 0.17677669, %v9228_v45  ;;  %v12447_v45 = vld [vmem:[#allocation69_spill] sm:$0xff] }
 0x9b1   :  { %6969 = vmax.xlane.f32.xlu0 %v6968_v1  ;;  %v6466_v11 = vpop.f32.mrf.mxu1  ;;  %9241 = vmatmul.mubr.msk.f32.vlgmr.msra.gmra.mxu0 %vm867_vm0, %v11728_v50 }
 0x9b2   :  { %v11787_v3 = vadd.f32 %v12438_v31, %v6935_v25  ;;  %v6934_v8 = vmul.f32 0.17677669, %v6466_v11  ;;  %9251 = vmatpush3.xpose.msk.msra.mxu0 %vm867_vm0, %v11733_v39  ;;  %9254 = vmatprep.mubr.msk.f32.mxu0 %vm867_vm0, %v11745_v21  ;;  %v4333_v25 = vadd.f32 %v12447_v45, %v12446_v36  ;;  %v12448_v31 = vld [vmem:[#allocation31_spill] sm:$0xff] }
 0x9b3   :  { %9252 = vmatprep.subr.msk.mxu0 %vm867_vm0, %v11740_v24 }
 0x9b4   :  { %v11796_v19 = vadd.f32 %v12439_v52, %v6934_v8  ;;  %v6977_v29 = vsel %vm1596_vm1, %v11787_v3, -inf  ;;  %v12449_v8 = vld [vmem:[#allocation72_spill] sm:$0xff] }
 0x9b5   :  { %6978 = vmax.xlane.f32.xlu1 %v6977_v29  ;;  %v4354_v52 = vadd.f32 %v12449_v8, %v12448_v31  ;;  %v12456_v8 = vld [vmem:[#allocation30_spill] sm:$0xff] }
 0x9b6   :  { %9253 = vmatpush3.xpose.msk.msra.mxu0 %vm867_vm0, %v11740_v24  ;;  %v6974_v50 = vsel %vm1596_vm1, %v11796_v19, -inf }
 0x9b7   :  { %6975 = vmax.xlane.f32.xlu0 %v6974_v50  ;;  %v9235_v39 = vpop.f32.mrf.mxu1 }
 0x9b8   :  { %v6937_v43 = vmul.f32 0.17677669, %v9235_v39  ;;  %v12450_v39 = vld [vmem:[#allocation29_spill] sm:$0xff] }
 0x9b9   :  { %v6557_v20 = vpop.f32.mrf.mxu1  ;;  %9255 = vmatmul.mubr.msk.f32.vlgmr.msra.gmra.mxu0 %vm867_vm0, %v11743_v15 }
 0x9ba   :  { %v11806_v21 = vadd.f32 %v9700_v12, %v6937_v43  ;;  %v6936_v42 = vmul.f32 0.17677669, %v6557_v20  ;;  %v12451_v43 = vld [vmem:[#allocation74_spill] sm:$0xff] }
 0x9bb   :  { %v4346_v20 = vadd.f32 %v12451_v43, %v12450_v39 }
 0x9bc   :  { %v11808_v62 = vadd.f32 %v9701_v40, %v6936_v42  ;;  %v6983_v24 = vsel %vm1596_vm1, %v11806_v21, -inf }
 0x9bd   :  { %6984 = vmax.xlane.f32.xlu1 %v6983_v24  ;;  %v12452_v24 = vld [vmem:[#allocation28_spill] sm:$0xff] }
 0x9be   :  { %v6980_v46 = vsel %vm1596_vm1, %v11808_v62, -inf }
 0x9bf   :  { %6981 = vmax.xlane.f32.xlu0 %v6980_v46  ;;  %v12453_v46 = vld [vmem:[#allocation73_spill] sm:$0xff] }
 0x9c6   :  { %v9249_v58 = vpop.f32.mrf.mxu1 }
 0x9c7   :  { %v6941_v23 = vmul.f32 0.17677669, %v9249_v58  ;;  %v4357_v58 = vadd.f32 %v12453_v46, %v12452_v24 }
 0x9c8   :  { %v6739_v53 = vpop.f32.mrf.mxu1 }
 0x9c9   :  { %v11814_v15 = vadd.f32 %v9702_v49, %v6941_v23  ;;  %v6940_v38 = vmul.f32 0.17677669, %v6739_v53 }
 0x9cb   :  { %v11816_v32 = vadd.f32 %v9703_v4, %v6940_v38  ;;  %v6995_v63 = vsel %vm1596_vm1, %v11814_v15, -inf  ;;  %v12454_v4 = vld [vmem:[#allocation26_spill] sm:$0xff] }
 0x9cc   :  { %6996 = vmax.xlane.f32.xlu1 %v6995_v63  ;;  %v12455_v63 = vld [vmem:[#allocation75_spill] sm:$0xff] }
 0x9cd   :  { %v6992_v17 = vsel %vm1596_vm1, %v11816_v32, -inf }
 0x9ce   :  { %6993 = vmax.xlane.f32.xlu0 %v6992_v17  ;;  %v4349_v17 = vadd.f32 %v12455_v63, %v12454_v4 }
 0x9d3   :  { %v9263_v61 = vpop.f32.mrf.mxu1 }
 0x9d4   :  { %v6945_v57 = vmul.f32 0.17677669, %v9263_v61 }
 0x9d5   :  { %v6921_v6 = vpop.f32.mrf.mxu1 }
 0x9d6   :  { %v11822_v9 = vadd.f32 %v9704_v41, %v6945_v57  ;;  %v6944_v13 = vmul.f32 0.17677669, %v6921_v6 }
 0x9d8   :  { %v11824_v22 = vadd.f32 %v9705_v10, %v6944_v13  ;;  %v7007_v54 = vsel %vm1596_vm1, %v11822_v9, -inf }
 0x9d9   :  { %7008 = vmax.xlane.f32.xlu1 %v7007_v54 }
 0x9da   :  { %v7004_v51 = vsel %vm1596_vm1, %v11824_v22, -inf }
 0x9db   :  { %7005 = vmax.xlane.f32.xlu0 %v7004_v51 }
 0xa24   :  { %v9194_v44 = vpop.f32.mrf.mxu0 }
 0xa25   :  { %v11834_v59 = vadd.f32 %v9194_v44, %v4338_v16 }
 0xa26   :  { %v6123_v30 = vpop.f32.mrf.mxu0 }
 0xa27   :  { %v11838_v37 = vadd.f32 %v6123_v30, %v4330_v60 }
 0xa28   :  { %v9195_v56 = vpop.f32.mrf.mxu0 }
 0xa29   :  { %v11842_v1 = vadd.f32 %v9195_v56, %v4341_v7 }
 0xa2a   :  { %v6126_v11 = vpop.f32.mrf.mxu0 }
 0xa2b   :  { %v11846_v29 = vadd.f32 %v6126_v11, %v4333_v25 }
 0xa2c   :  { %v9198_v50 = vpop.f32.mrf.mxu0 }
 0xa2d   :  { %v11850_v12 = vadd.f32 %v9198_v50, %v4354_v52  ;;  %v12457_v52 = vld [vmem:[#allocation76_spill] sm:$0xff] }
 0xa2e   :  { %v6967_v42 = vpop.xlane.xlu1 %6966  ;;  %v6139_v40 = vpop.f32.mrf.mxu0  ;;  %v4370_v50 = vadd.f32 %v12457_v52, %v12456_v8 }
 0xa2f   :  { %v7011_v23 = vsub.f32 %v11761_v47, %v6967_v42  ;;  %v11855_v53 = vadd.f32 %v6139_v40, %v4346_v20  ;;  %v12458_v20 = vld [vmem:[#allocation37_spill] sm:$0xff]  ;;  %v12459_v42 = vld [vmem:[#allocation78_spill] sm:$0xff] }
 0xa30   :  { %v6964_v49 = vpop.xlane.xlu0 %6963  ;;  %v9199_v38 = vpop.f32.mrf.mxu0  ;;  %v4362_v40 = vadd.f32 %v12459_v42, %v12458_v20 }
 0xa31   :  { %v7028_v61 = vmul.f32 1.442695, %v7011_v23  ;;  %v7010_v57 = vsub.f32 %v11764_v34, %v6964_v49  ;;  %v11860_v6 = vadd.f32 %v9199_v38, %v4357_v58  ;;  %v12460_v23 = vld [vmem:[#allocation38_spill] sm:$0xff]  ;;  %v12461_v49 = vld [vmem:[#allocation77_spill] sm:$0xff] }
 0xa32   :  { %v6142_v41 = vpop.f32.mrf.mxu0  ;;  %v4373_v38 = vadd.f32 %v12461_v49, %v12460_v23 }
 0xa33   :  { %9620 = vpow2.f32 %v7028_v61  ;;  %v7026_v13 = vmul.f32 1.442695, %v7010_v57  ;;  %v11862_v10 = vadd.f32 %v6142_v41, %v4349_v17  ;;  %v12462_v61 = vld [vmem:[#allocation41_spill] sm:$0xff]  ;;  %v12463_v57 = vld [vmem:[#allocation79_spill] sm:$0xff] }
 0xa34   :  { %v4365_v41 = vadd.f32 %v12463_v57, %v12462_v61  ;;  %v9706_v61 = vld [vmem:[#allocation8 + $0x48] sm:$0xff] }
 0xa35   :  { %9622 = vpow2.f32 %v7026_v13 }
 0xa36   :  { %v6973_v54 = vpop.xlane.xlu0 %6972 }
 0xa37   :  { %v7013_v47 = vsub.f32 %v11773_v0, %v6973_v54 }
 0xa39   :  { %v7032_v51 = vmul.f32 1.442695, %v7013_v47 }
 0xa3a   :  { %v6970_v48 = vpop.xlane.xlu0 %6969 }
 0xa3b   :  { %9624 = vpow2.f32 %v7032_v51  ;;  %v7012_v33 = vsub.f32 %v11778_v27, %v6970_v48  ;;  %v12465_v48 = vld [vmem:[#allocation80_spill] sm:$0xff] }
 0xa3d   :  { %v7030_v16 = vmul.f32 1.442695, %v7012_v33 }
 0xa3e   :  { %v6979_v44 = vpop.xlane.xlu1 %6978 }
 0xa3f   :  { %9626 = vpow2.f32 %v7030_v16  ;;  %v7015_v34 = vsub.f32 %v11787_v3, %v6979_v44 }
 0xa40   :  { %v11867_v55 = vpop.eup %9620  ;;  %v6976_v35 = vpop.xlane.xlu0 %6975 }
 0xa41   :  { %v7036_v60 = vmul.f32 1.442695, %v7015_v34  ;;  %v7014_v30 = vsub.f32 %v11796_v19, %v6976_v35  ;;  %v7061_v18 = vsel %vm1596_vm1, %v11867_v55, 0.0 }
 0xa42   :  { %v11872_v0 = vpop.eup %9622  ;;  %7062 = vadd.xlane.f32.xlu1 %v7061_v18 }
 0xa43   :  { %9628 = vpow2.f32 %v7036_v60  ;;  %v7034_v14 = vmul.f32 1.442695, %v7014_v30  ;;  %v7058_v27 = vsel %vm1596_vm1, %v11872_v0, 0.0  ;;  %v12467_v60 = vld [vmem:[#allocation81_spill] sm:$0xff] }
 0xa44   :  { %7059 = vadd.xlane.f32.xlu0 %v7058_v27 }
 0xa45   :  { %9630 = vpow2.f32 %v7034_v14 }
 0xa46   :  { %v6985_v31 = vpop.xlane.xlu1 %6984 }
 0xa47   :  { %v7017_v24 = vsub.f32 %v11806_v21, %v6985_v31  ;;  %v12464_v21 = vld [vmem:[#allocation45_spill] sm:$0xff] }
 0xa48   :  { %v11876_v3 = vpop.eup %9624  ;;  %v6982_v39 = vpop.xlane.xlu0 %6981  ;;  %v4386_v33 = vadd.f32 %v12465_v48, %v12464_v21 }
 0xa49   :  { %v7067_v7 = vsel %vm1596_vm1, %v11876_v3, 0.0  ;;  %v7016_v4 = vsub.f32 %v11808_v62, %v6982_v39  ;;  %v7040_v13 = vmul.f32 1.442695, %v7017_v24  ;;  %v12466_v62 = vld [vmem:[#allocation42_spill] sm:$0xff]  ;;  %v12471_v39 = vld [vmem:[#allocation27_spill] sm:$0xff] }
 0xa4a   :  { %7068 = vadd.xlane.f32.xlu1 %v7067_v7  ;;  %v4378_v30 = vadd.f32 %v12467_v60, %v12466_v62  ;;  %v9708_v62 = vld [vmem:[#allocation8 + $0x68] sm:$0xff] }
 0xa4b   :  { %v7038_v16 = vmul.f32 1.442695, %v7016_v4  ;;  %9632 = vpow2.f32 %v7040_v13  ;;  %v9707_v13 = vld [vmem:[#allocation8 + $0x40] sm:$0xff] }
 0xa4c   :  { %v11880_v19 = vpop.eup %9626 }
 0xa4d   :  { %v7064_v56 = vsel %vm1596_vm1, %v11880_v19, 0.0  ;;  %9634 = vpow2.f32 %v7038_v16 }
 0xa4e   :  { %7065 = vadd.xlane.f32.xlu0 %v7064_v56  ;;  %v12468_v56 = vld [vmem:[#allocation49_spill] sm:$0xff] }
 0xa50   :  { %v11884_v36 = vpop.eup %9628 }
 0xa51   :  { %v7073_v45 = vsel %vm1596_vm1, %v11884_v36, 0.0 }
 0xa52   :  { %v11888_v25 = vpop.eup %9630  ;;  %7074 = vadd.xlane.f32.xlu1 %v7073_v45  ;;  %v12469_v45 = vld [vmem:[#allocation32_spill] sm:$0xff] }
 0xa53   :  { %v7070_v11 = vsel %vm1596_vm1, %v11888_v25, 0.0 }
 0xa54   :  { %7071 = vadd.xlane.f32.xlu0 %v7070_v11  ;;  %v4389_v11 = vadd.f32 %v12469_v45, %v12468_v56 }
 0xa55   :  { %v6997_v47 = vpop.xlane.xlu1 %6996 }
 0xa56   :  { %v7021_v18 = vsub.f32 %v11814_v15, %v6997_v47 }
 0xa57   :  { %v6994_v44 = vpop.xlane.xlu0 %6993 }
 0xa58   :  { %v7020_v27 = vsub.f32 %v11816_v32, %v6994_v44  ;;  %v7048_v20 = vmul.f32 1.442695, %v7021_v18 }
 0xa5a   :  { %v7046_v15 = vmul.f32 1.442695, %v7020_v27  ;;  %9636 = vpow2.f32 %v7048_v20  ;;  %v9709_v27 = vld [vmem:[#allocation8 + $0x60] sm:$0xff] }
 0xa5c   :  { %9638 = vpow2.f32 %v7046_v15 }
 0xa61   :  { %v9202_v43 = vpop.f32.mrf.mxu0 }
 0xa62   :  { %v11897_v46 = vadd.f32 %v9202_v43, %v4370_v50  ;;  %v12470_v50 = vld [vmem:[#allocation84_spill] sm:$0xff] }
 0xa63   :  { %v6155_v58 = vpop.f32.mrf.mxu0  ;;  %v4381_v43 = vadd.f32 %v12471_v39, %v12470_v50 }
 0xa64   :  { %v11902_v63 = vadd.f32 %v6155_v58, %v4362_v40  ;;  %v7006_v8 = vpop.xlane.xlu0 %7005  ;;  %v7009_v58 = vpop.xlane.xlu1 %7008 }
 0xa65   :  { %v9203_v17 = vpop.f32.mrf.mxu0  ;;  %v7024_v24 = vsub.f32 %v11824_v22, %v7006_v8  ;;  %v7025_v4 = vsub.f32 %v11822_v9, %v7009_v58  ;;  %v12474_v58 = vld [vmem:[#allocation58_spill] sm:$0xff] }
 0xa66   :  { %v11906_v54 = vadd.f32 %v9203_v17, %v4373_v38 }
 0xa67   :  { %v6158_v51 = vpop.f32.mrf.mxu0  ;;  %v7054_v17 = vmul.f32 1.442695, %v7024_v24  ;;  %v7056_v21 = vmul.f32 1.442695, %v7025_v4  ;;  %v12473_v24 = vld [vmem:[#allocation60_spill] sm:$0xff]  ;;  %v12478_v4 = vld [vmem:[#allocation63_spill] sm:$0xff] }
 0xa68   :  { %v11910_v34 = vadd.f32 %v6158_v51, %v4365_v41  ;;  %v11936_v51 = vpop.eup %9632 }
 0xa69   :  { %v9206_v35 = vpop.f32.mrf.mxu0  ;;  %9640 = vpow2.f32 %v7054_v17  ;;  %v11940_v9 = vpop.eup %9634  ;;  %v7079_v44 = vsel %vm1596_vm1, %v11936_v51, 0.0  ;;  %v12479_v17 = vld [vmem:[#allocation62_spill] sm:$0xff] }
 0xa6a   :  { %v11915_v14 = vadd.f32 %v9206_v35, %v4386_v33  ;;  %9642 = vpow2.f32 %v7056_v21  ;;  %v7076_v18 = vsel %vm1596_vm1, %v11940_v9, 0.0  ;;  %v11952_v45 = vpop.eup %9636 }
 0xa6b   :  { %v6171_v7 = vpop.f32.mrf.mxu0 }
 0xa6c   :  { %v11920_v31 = vadd.f32 %v6171_v7, %v4378_v30 }
 0xa6d   :  { %v9207_v52 = vpop.f32.mrf.mxu0 }
 0xa6e   :  { %v11924_v42 = vadd.f32 %v9207_v52, %v4389_v11  ;;  %v11954_v11 = vpop.eup %9638  ;;  %v7091_v52 = vsel %vm1596_vm1, %v11952_v45, 0.0 }
 0xa6f   :  { %v6174_v40 = vpop.f32.mrf.mxu0  ;;  %v7088_v50 = vsel %vm1596_vm1, %v11954_v11, 0.0 }
 0xa70   :  { %v11927_v32 = vadd.f32 %v6174_v40, %v4381_v43  ;;  %v12472_v40 = vld [vmem:[#allocation61_spill] sm:$0xff] }
 0xa71   :  { %v9242_v23 = vpop.f32.mrf.mxu0 }
 0xa72   :  { %v6939_v49 = vmul.f32 0.17677669, %v9242_v23  ;;  %v12475_v23 = vld [vmem:[#allocation65_spill] sm:$0xff] }
 0xa73   :  { %v6648_v38 = vpop.f32.mrf.mxu0 }
 0xa74   :  { %v11930_v57 = vadd.f32 %v9706_v61, %v6939_v49  ;;  %v6938_v41 = vmul.f32 0.17677669, %v6648_v38  ;;  %v12476_v49 = vld [vmem:[#allocation59_spill] sm:$0xff]  ;;  %v12477_v38 = vld [vmem:[#allocation64_spill] sm:$0xff] }
 0xa75   :  { %v12480_v61 = vld [vmem:[#allocation55_spill] sm:$0xff] }
 0xa76   :  { %v11932_v47 = vadd.f32 %v9707_v13, %v6938_v41  ;;  %v6989_v22 = vsel %vm1596_vm1, %v11930_v57, -inf  ;;  %v11962_v39 = vpop.eup %9640  ;;  %v12481_v41 = vld [vmem:[#allocation54_spill] sm:$0xff]  ;;  %v12482_v13 = vld [vmem:[#allocation53_spill] sm:$0xff] }
 0xa77   :  { %6990 = vmax.xlane.f32.xlu1 %v6989_v22  ;;  %v7100_v43 = vsel %vm1596_vm1, %v11962_v39, 0.0  ;;  %v11966_v20 = vpop.eup %9642  ;;  %v12483_v22 = vld [vmem:[#allocation52_spill] sm:$0xff] }
 0xa78   :  { %v6986_v48 = vsel %vm1596_vm1, %v11932_v47, -inf  ;;  %v7103_v15 = vsel %vm1596_vm1, %v11966_v20, 0.0 }
 0xa79   :  { %v9256_v33 = vpop.f32.mrf.mxu0  ;;  %6987 = vmax.xlane.f32.xlu0 %v6986_v48 }
 0xa7a   :  { %v6943_v16 = vmul.f32 0.17677669, %v9256_v33 }
 0xa7b   :  { %v6830_v35 = vpop.f32.mrf.mxu0  ;;  %7080 = vadd.xlane.f32.xlu1 %v7079_v44 }
 0xa7c   :  { %v11944_v60 = vadd.f32 %v9708_v62, %v6943_v16  ;;  %v6942_v30 = vmul.f32 0.17677669, %v6830_v35 }
 0xa7d   :  { %7077 = vadd.xlane.f32.xlu0 %v7076_v18 }
 0xa7e   :  { %v11948_v7 = vadd.f32 %v9709_v27, %v6942_v30  ;;  %v7001_v56 = vsel %vm1596_vm1, %v11944_v60, -inf }
 0xa7f   :  { %7002 = vmax.xlane.f32.xlu1 %v7001_v56 }
 0xa80   :  { %v6998_v8 = vsel %vm1596_vm1, %v11948_v7, -inf }
 0xa81   :  { %6999 = vmax.xlane.f32.xlu0 %v6998_v8 }
 0xa83   :  { %7092 = vadd.xlane.f32.xlu1 %v7091_v52 }
 0xa85   :  { %7089 = vadd.xlane.f32.xlu0 %v7088_v50 }
 0xa89   :  { %7101 = vadd.xlane.f32.xlu0 %v7100_v43 }
 0xa8d   :  { %7104 = vadd.xlane.f32.xlu0 %v7103_v15 }
 0xa94   :  { %7157 = vrot.lane.b32.xlu1 %v12472_v40, %s9937_s10 }
 0xa98   :  { %7155 = vrot.lane.b32.xlu1 %v12473_v24, %s9937_s10 }
 0xa9c   :  { %7242 = vrot.lane.b32.xlu1 %v12474_v58, %s9937_s10 }
 0xaa0   :  { %7331 = vrot.lane.b32.xlu1 %v12475_v23, %s9937_s10 }
 0xaa3   :  { %7244 = vrot.lane.b32.xlu0 %v12476_v49, %s9937_s10 }
 0xaa4   :  { %7418 = vrot.lane.b32.xlu1 %v12477_v38, %s9937_s10 }
 0xaa7   :  { %7329 = vrot.lane.b32.xlu0 %v12478_v4, %s9937_s10 }
 0xaa8   :  { %7416 = vrot.lane.b32.xlu1 %v12479_v17, %s9937_s10 }
 0xaab   :  { %7505 = vrot.lane.b32.xlu0 %v12480_v61, %s9937_s10 }
 0xaac   :  { %7592 = vrot.lane.b32.xlu1 %v12481_v41, %s9937_s10 }
 0xaaf   :  { %7503 = vrot.lane.b32.xlu0 %v12482_v13, %s9937_s10 }
 0xab0   :  { %7590 = vrot.lane.b32.xlu1 %v12483_v22, %s9937_s10 }
 0xab3   :  { %7679 = vrot.lane.b32.xlu0 %v12428_v26, %s9937_s10 }
 0xab4   :  { %7766 = vrot.lane.b32.xlu1 %v12427_v2, %s9937_s10 }
 0xacb   :  { %v7063_v21 = vpop.xlane.xlu1 %7062 }
 0xacc   :  { %9644 = vrcp.f32 %v7063_v21 }
 0xacd   :  { %v7060_v48 = vpop.xlane.xlu0 %7059 }
 0xace   :  { %9646 = vrcp.f32 %v7060_v48 }
 0xad3   :  { %v7069_v33 = vpop.xlane.xlu1 %7068 }
 0xad4   :  { %9648 = vrcp.f32 %v7069_v33 }
 0xad7   :  { %v7066_v16 = vpop.xlane.xlu0 %7065 }
 0xad8   :  { %9650 = vrcp.f32 %v7066_v16 }
 0xad9   :  { %v9645_v44 = vpop.eup %9644 }
 0xada   :  { %v11999_v35 = vmul.f32 %v9645_v44, %v11867_v55 }
 0xadb   :  { %v9647_v62 = vpop.eup %9646  ;;  %v7075_v30 = vpop.xlane.xlu1 %7074 }
 0xadc   :  { %9652 = vrcp.f32 %v7075_v30  ;;  %v7107_v26 = vmul.f32 %v9647_v62, %v11872_v0  ;;  %7140 = vst.msk [vmem:[#allocation17 + $0x38] sm:$0xff] %vm1596_vm1, %v11999_v35 }
 0xadd   :  { %v7072_v2 = vpop.xlane.xlu0 %7071 }
 0xade   :  { %9654 = vrcp.f32 %v7072_v2  ;;  %7139 = vst.msk [vmem:[#allocation17 + $0x30] sm:$0xff] %vm1596_vm1, %v7107_v26  ;;  %9268 = vmatprep.mubr.msk.f32.mxu0 %vm1596_vm1, %v7107_v26 }
 0xae1   :  { %v9649_v18 = vpop.eup %9648 }
 0xae2   :  { %v12007_v27 = vmul.f32 %v9649_v18, %v11876_v3 }
 0xae4   :  { %7142 = vst.msk [vmem:[#allocation17 + $0x78] sm:$0xff] %vm1596_vm1, %v12007_v27 }
 0xae5   :  { %v9651_v55 = vpop.eup %9650 }
 0xae6   :  { %v7111_v56 = vmul.f32 %v9651_v55, %v11880_v19 }
 0xae8   :  { %7141 = vst.msk [vmem:[#allocation17 + $0x70] sm:$0xff] %vm1596_vm1, %v7111_v56  ;;  %9275 = vmatprep.mubr.msk.f32.mxu1 %vm1596_vm1, %v7111_v56 }
 0xae9   :  { %v9653_v0 = vpop.eup %9652 }
 0xaea   :  { %v12015_v8 = vmul.f32 %v9653_v0, %v11884_v36 }
 0xaeb   :  { %v9655_v52 = vpop.eup %9654 }
 0xaec   :  { %v7115_v50 = vmul.f32 %v9655_v52, %v11888_v25  ;;  %7144 = vst.msk [vmem:[#allocation17 + $0xb8] sm:$0xff] %vm1596_vm1, %v12015_v8 }
 0xaee   :  { %7143 = vst.msk [vmem:[#allocation17 + $0xb0] sm:$0xff] %vm1596_vm1, %v7115_v50 }
 0xb00   :  { %v6991_v3 = vpop.xlane.xlu1 %6990 }
 0xb01   :  { %v7019_v43 = vsub.f32 %v11930_v57, %v6991_v3 }
 0xb02   :  { %v6988_v19 = vpop.xlane.xlu0 %6987 }
 0xb03   :  { %v7044_v15 = vmul.f32 1.442695, %v7019_v43  ;;  %v7018_v40 = vsub.f32 %v11932_v47, %v6988_v19 }
 0xb04   :  { %v7081_v24 = vpop.xlane.xlu1 %7080 }
 0xb05   :  { %9656 = vpow2.f32 %v7044_v15  ;;  %v7042_v58 = vmul.f32 1.442695, %v7018_v40 }
 0xb06   :  { %9658 = vrcp.f32 %v7081_v24  ;;  %v7078_v36 = vpop.xlane.xlu0 %7077 }
 0xb07   :  { %9660 = vpow2.f32 %v7042_v58 }
 0xb08   :  { %9662 = vrcp.f32 %v7078_v36  ;;  %v7003_v25 = vpop.xlane.xlu1 %7002 }
 0xb09   :  { %v7023_v23 = vsub.f32 %v11944_v60, %v7003_v25 }
 0xb0a   :  { %v7000_v49 = vpop.xlane.xlu0 %6999 }
 0xb0b   :  { %v7052_v38 = vmul.f32 1.442695, %v7023_v23  ;;  %v7022_v4 = vsub.f32 %v11948_v7, %v7000_v49 }
 0xb0c   :  { %v7093_v17 = vpop.xlane.xlu1 %7092 }
 0xb0d   :  { %9664 = vpow2.f32 %v7052_v38  ;;  %v7050_v57 = vmul.f32 1.442695, %v7022_v4 }
 0xb0e   :  { %9666 = vrcp.f32 %v7093_v17  ;;  %v7090_v61 = vpop.xlane.xlu0 %7089 }
 0xb0f   :  { %9668 = vpow2.f32 %v7050_v57 }
 0xb10   :  { %9670 = vrcp.f32 %v7090_v61  ;;  %v7158_v47 = vpop.permute.xlu1 %7157 }
 0xb11   :  { %9264 = vmatprep.subr.mxu0 %v7158_v47 }
 0xb12   :  { %v12025_v41 = vpop.eup %9656  ;;  %9265 = vmatpush3.msra.mxu0 %v7158_v47  ;;  %v7102_v13 = vpop.xlane.xlu0 %7101 }
 0xb13   :  { %v9659_v22 = vpop.eup %9658  ;;  %9672 = vrcp.f32 %v7102_v13  ;;  %v7085_v60 = vsel %vm1596_vm1, %v12025_v41, 0.0 }
 0xb14   :  { %v12029_v21 = vpop.eup %9660  ;;  %7086 = vadd.xlane.f32.xlu1 %v7085_v60  ;;  %v7156_v7 = vpop.permute.xlu1 %7155  ;;  %v7121_v48 = vmul.f32 %v9659_v22, %v11936_v51  ;;  %v9427_v22 = vld [vmem:[#allocation14 + $0x30] sm:$0xff]  }
 0xb15   :  { %v9663_v33 = vpop.eup %9662  ;;  %9266 = vmatprep.subr.mxu0 %v7156_v7  ;;  %v7082_v16 = vsel %vm1596_vm1, %v12029_v21, 0.0 }
 0xb16   :  { %9267 = vmatpush3.msra.mxu0 %v7156_v7  ;;  %7083 = vadd.xlane.f32.xlu0 %v7082_v16  ;;  %v7105_v44 = vpop.xlane.xlu0 %7104  ;;  %v7119_v62 = vmul.f32 %v9663_v33, %v11940_v9  ;;  %7146 = vst.msk [vmem:[#allocation17 + $0xf8] sm:$0xff] %vm1596_vm1, %v7121_v48 }
 0xb17   :  { %9674 = vrcp.f32 %v7105_v44  ;;  %9269 = vmatmul.mubr.msk.f32.vlgmr.msra.gmra.mxu0 %vm1596_vm1, %v11999_v35 }
 0xb18   :  { %v7243_v30 = vpop.permute.xlu1 %7242  ;;  %9282 = vmatprep.mubr.msk.f32.mxu0 %vm1596_vm1, %v7115_v50  ;;  %7145 = vst.msk [vmem:[#allocation17 + $0xf0] sm:$0xff] %vm1596_vm1, %v7119_v62 }
 0xb1a   :  { %v12040_v51 = vpop.eup %9664  ;;  %v7245_v26 = vpop.permute.xlu0 %7244 }
 0xb1b   :  { %v9667_v2 = vpop.eup %9666  ;;  %9271 = vmatprep.subr.mxu1 %v7245_v26  ;;  %v7097_v18 = vsel %vm1596_vm1, %v12040_v51, 0.0 }
 0xb1c   :  { %v12044_v9 = vpop.eup %9668  ;;  %7098 = vadd.xlane.f32.xlu1 %v7097_v18  ;;  %v7332_v55 = vpop.permute.xlu1 %7331  ;;  %9272 = vmatpush3.msra.mxu1 %v7245_v26  ;;  %v7129_v35 = vmul.f32 %v9667_v2, %v11952_v45 }
 0xb1d   :  { %v9671_v56 = vpop.eup %9670  ;;  %9273 = vmatprep.subr.mxu1 %v7243_v30  ;;  %9278 = vmatprep.subr.mxu0 %v7332_v55  ;;  %v7094_v0 = vsel %vm1596_vm1, %v12044_v9, 0.0 }
 0xb1e   :  { %9279 = vmatpush3.msra.mxu0 %v7332_v55  ;;  %7095 = vadd.xlane.f32.xlu0 %v7094_v0  ;;  %v7330_v52 = vpop.permute.xlu0 %7329  ;;  %v7127_v50 = vmul.f32 %v9671_v56, %v11954_v11  ;;  %7150 = vst.msk [vmem:[#allocation17 + $0x178] sm:$0xff] %vm1596_vm1, %v7129_v35 }
 0xb1f   :  { %9274 = vmatpush3.msra.mxu1 %v7243_v30  ;;  %9280 = vmatprep.subr.mxu0 %v7330_v52 }
 0xb20   :  { %v9673_v3 = vpop.eup %9672  ;;  %9276 = vmatmul.mubr.msk.f32.vlgmr.msra.gmra.mxu1 %vm1596_vm1, %v12007_v27  ;;  %v7419_v45 = vpop.permute.xlu1 %7418  ;;  %9281 = vmatpush3.msra.mxu0 %v7330_v52  ;;  %7149 = vst.msk [vmem:[#allocation17 + $0x170] sm:$0xff] %vm1596_vm1, %v7127_v50 }
 0xb21   :  { %9289 = vmatprep.mubr.msk.f32.mxu1 %vm1596_vm1, %v7119_v62  ;;  %9283 = vmatmul.mubr.msk.f32.vlgmr.msra.gmra.mxu0 %vm1596_vm1, %v12015_v8  ;;  %v7135_v43 = vmul.f32 %v9673_v3, %v11962_v39 }
 0xb22   :  { %9285 = vmatprep.subr.mxu1 %v7419_v45  ;;  %v7506_v11 = vpop.permute.xlu0 %7505 }
 0xb23   :  { %9286 = vmatpush3.msra.mxu1 %v7419_v45  ;;  %9292 = vmatprep.subr.mxu0 %v7506_v11  ;;  %7153 = vst.msk [vmem:[#allocation17 + $0x1f0] sm:$0xff] %vm1596_vm1, %v7135_v43 }
 0xb24   :  { %v9675_v19 = vpop.eup %9674  ;;  %v7417_v15 = vpop.permute.xlu1 %7416  ;;  %9293 = vmatpush3.msra.mxu0 %v7506_v11 }
 0xb25   :  { %9287 = vmatprep.subr.mxu1 %v7417_v15  ;;  %v7137_v27 = vmul.f32 %v9675_v19, %v11966_v20 }
 0xb26   :  { %9288 = vmatpush3.msra.mxu1 %v7417_v15  ;;  %v7504_v40 = vpop.permute.xlu0 %7503  ;;  %v12093_v15 = vld [vmem:[%s12150_s11] ss:$0 sm:$0xff]  ;;  %s9938_s11 = smov [#allocation17]  }
 0xb27   :  { %9290 = vmatmul.mubr.msk.f32.vlgmr.msra.gmra.mxu1 %vm1596_vm1, %v7121_v48  ;;  %9294 = vmatprep.subr.mxu0 %v7504_v40  ;;  %7154 = vst.msk [vmem:[#allocation17 + $0x1f8] sm:$0xff] %vm1596_vm1, %v7137_v27  ;;  %s8068_s5 = sshll.u32 %s9938_s11, 4  ;;  %s8069_s5 = int_to_ptr.vmem [resolvable:$true] %s8068_s5 }
 0xb28   :  { %v7593_v39 = vpop.permute.xlu1 %7592  ;;  %9295 = vmatpush3.msra.mxu0 %v7504_v40  ;;  %9303 = vmatprep.mubr.msk.f32.mxu1 %vm1596_vm1, %v7127_v50  ;;  %s9870_s21 = scalar_lea.vmem %s8069_s5, 8192  ;;  %p9875_p13 = scmp.lt.s32.totalorder %s8069_s5, %s8069_s5 }
 0xb29   :  { %9299 = vmatprep.subr.mxu1 %v7593_v39  ;;  %p9871_p12 = scmp.ne.s32.totalorder %s8069_s5, %s9870_s21  ;;  %p9876_p0 = scmp.lt.s32.totalorder %s9870_s21, %s9870_s21 }
 0xb2a   :  { %9300 = vmatpush3.msra.mxu1 %v7593_v39  ;;  %v7680_v8 = vpop.permute.xlu0 %7679 }
 0xb2b   :  { %9306 = vmatprep.subr.mxu0 %v7680_v8  ;;  %p9877_p1 = por %p9876_p0, %p9875_p13 }
 0xb2c   :  { %v7591_v24 = vpop.permute.xlu1 %7590 }
 0xb2d   :  { %7764 = vrot.lane.b32.xlu1 %v12317_v28, %s9937_s10  ;;  %9301 = vmatprep.subr.mxu1 %v7591_v24  ;;  %p9878_p2 = pnand %p9877_p1, %p9871_p12 }
 0xb2e   :  { %9302 = vmatpush3.msra.mxu1 %v7591_v24 }
 0xb2f   :  { %9304 = vmatmul.mubr.msk.f32.vlgmr.msra.gmra.mxu1 %vm1596_vm1, %v7129_v35 }
 0xb30   :  { %v7767_v20 = vpop.permute.xlu1 %7766  ;;  %9317 = vmatprep.mubr.msk.f32.mxu1 %vm1596_vm1, %v7135_v43 }
 0xb31   :  { %9313 = vmatprep.subr.mxu1 %v7767_v20 }
 0xb32   :  { %9314 = vmatpush3.msra.mxu1 %v7767_v20 }
 0xb34   :  { %7677 = vrot.lane.b32.xlu0 %v10307_v5, %s9937_s10  ;;  %v9426_v5 = vld [vmem:[#allocation14 + $0x38] sm:$0xff]  }
 0xb9d   :  { %v7087_v58 = vpop.xlane.xlu1 %7086 }
 0xb9e   :  { %9676 = vrcp.f32 %v7087_v58 }
 0xb9f   :  { %v7084_v36 = vpop.xlane.xlu0 %7083 }
 0xba0   :  { %9678 = vrcp.f32 %v7084_v36 }
 0xba5   :  { %v7099_v25 = vpop.xlane.xlu1 %7098 }
 0xba6   :  { %9680 = vrcp.f32 %v7099_v25 }
 0xba7   :  { %v7096_v23 = vpop.xlane.xlu0 %7095 }
 0xba8   :  { %9682 = vrcp.f32 %v7096_v23 }
 0xba9   :  { %v7765_v28 = vpop.permute.xlu1 %7764 }
 0xbaa   :  { %9315 = vmatprep.subr.mxu1 %v7765_v28 }
 0xbab   :  { %v9677_v49 = vpop.eup %9676  ;;  %9316 = vmatpush3.msra.mxu1 %v7765_v28  ;;  %v7678_v57 = vpop.permute.xlu0 %7677 }
 0xbac   :  { %9318 = vmatmul.mubr.msk.f32.vlgmr.msra.gmra.mxu1 %vm1596_vm1, %v7137_v27  ;;  %v7125_v38 = vmul.f32 %v9677_v49, %v12025_v41 }
 0xbad   :  { %v9679_v4 = vpop.eup %9678 }
 0xbae   :  { %v7123_v17 = vmul.f32 %v9679_v4, %v12029_v21  ;;  %7148 = vst.msk [vmem:[#allocation17 + $0x138] sm:$0xff] %vm1596_vm1, %v7125_v38 }
 0xbb0   :  { %7147 = vst.msk [vmem:[#allocation17 + $0x130] sm:$0xff] %vm1596_vm1, %v7123_v17  ;;  %9296 = vmatprep.mubr.msk.f32.mxu0 %vm1596_vm1, %v7123_v17 }
 0xbb1   :  { %9297 = vmatmul.mubr.msk.f32.vlgmr.msra.gmra.mxu0 %vm1596_vm1, %v7125_v38 }
 0xbb2   :  { %9307 = vmatpush3.msra.mxu0 %v7680_v8 }
 0xbb3   :  { %v9681_v61 = vpop.eup %9680  ;;  %9308 = vmatprep.subr.mxu0 %v7678_v57 }
 0xbb4   :  { %9309 = vmatpush3.msra.mxu0 %v7678_v57  ;;  %v7133_v47 = vmul.f32 %v9681_v61, %v12040_v51 }
 0xbb5   :  { %v9683_v41 = vpop.eup %9682  ;;  %9320 = vmatprep.subr.bf16.mxu0 %v9426_v5 }
 0xbb6   :  { %v7131_v13 = vmul.f32 %v9683_v41, %v12044_v9  ;;  %7152 = vst.msk [vmem:[#allocation17 + $0x1b8] sm:$0xff] %vm1596_vm1, %v7133_v47 }
 0xbb8   :  { %7151 = vst.msk [vmem:[#allocation17 + $0x1b0] sm:$0xff] %vm1596_vm1, %v7131_v13  ;;  %9310 = vmatprep.mubr.msk.f32.mxu0 %vm1596_vm1, %v7131_v13 }
 0xbb9   :  { %9311 = vmatmul.mubr.msk.f32.vlgmr.msra.gmra.mxu0 %vm1596_vm1, %v7133_v47 }
 0xbba   :  { %9321 = vmatpush3.bf16.msra.mxu0 %v9426_v5 }
 0xbbb   :  { %9322 = vmatprep.subr.bf16.mxu0 %v9427_v22 }
 0xbbe   :  { %9323 = vmatpush3.bf16.msra.mxu0 %v9427_v22 }
 0xbd7   :  { %v9270_v60 = vpop.f32.mrf.mxu0 }
 0xbd9   :  { %v7233_v21 = vpop.f32.mrf.mxu0 }
 0xbda   :  { %v7851_v7 = vpack.c.bf16 %v9270_v60, %v7233_v21 }
 0xbdc   :  { %9324 = vmatprep.mubr.msk.bf16.mxu0 %vm867_vm0, %v7851_v7 }
 0xbe0   :  { %v9277_v48 = vpop.f32.mrf.mxu1 }
 0xbe1   :  { %v9284_v33 = vpop.f32.mrf.mxu0 }
 0xbe2   :  { %v7320_v16 = vpop.f32.mrf.mxu1 }
 0xbe3   :  { %v7852_v44 = vpack.c.bf16 %v9277_v48, %v7320_v16  ;;  %v7407_v62 = vpop.f32.mrf.mxu0 }
 0xbe4   :  { %v7853_v30 = vpack.c.bf16 %v9284_v33, %v7407_v62 }
 0xbe5   :  { %9325 = vmatmul.mubr.msk.bf16.vlgmr.msra.gmra.mxu0 %vm867_vm0, %v7852_v44 }
 0xbe6   :  { %9328 = vmatprep.mubr.msk.bf16.mxu0 %vm867_vm0, %v7853_v30 }
 0xbe7   :  { %v9291_v51 = vpop.f32.mrf.mxu1 }
 0xbe9   :  { %v7494_v26 = vpop.f32.mrf.mxu1 }
 0xbea   :  { %v7854_v2 = vpack.c.bf16 %v9291_v51, %v7494_v26 }
 0xbed   :  { %9329 = vmatmul.mubr.msk.bf16.gmra.mxu0 %vm867_vm0, %v7854_v2 }
 0xbef   :  { %v9305_v18 = vpop.f32.mrf.mxu1 }
 0xbf1   :  { %v7668_v55 = vpop.f32.mrf.mxu1 }
 0xbf2   :  { %v7856_v0 = vpack.c.bf16 %v9305_v18, %v7668_v55 }
 0xc6c   :  { %v9319_v52 = vpop.f32.mrf.mxu1 }
 0xc6e   :  { %v7842_v3 = vpop.f32.mrf.mxu1 }
 0xc6f   :  { %v7858_v11 = vpack.c.bf16 %v9319_v52, %v7842_v3 }
 0xc71   :  { %v9298_v9 = vpop.f32.mrf.mxu0 }
 0xc73   :  { %v7581_v35 = vpop.f32.mrf.mxu0 }
 0xc74   :  { %v7855_v56 = vpack.c.bf16 %v9298_v9, %v7581_v35 }
 0xc76   :  { %9332 = vmatprep.mubr.msk.bf16.mxu0 %vm867_vm0, %v7855_v56 }
 0xc77   :  { %9333 = vmatmul.mubr.msk.bf16.gmra.mxu0 %vm867_vm0, %v7856_v0 }
 0xc79   :  { %v9312_v50 = vpop.f32.mrf.mxu0 }
 0xc7b   :  { %v7755_v45 = vpop.f32.mrf.mxu0 }
 0xc7c   :  { %v7857_v43 = vpack.c.bf16 %v9312_v50, %v7755_v45 }
 0xc7e   :  { %9336 = vmatprep.mubr.msk.bf16.mxu0 %vm867_vm0, %v7857_v43 }
 0xc7f   :  { %9337 = vmatmul.mubr.msk.bf16.gmra.mxu0 %vm867_vm0, %v7858_v11 }
 0xca5   :  { %v9326_v19 = vpop.f32.mrf.mxu0 }
 0xca6   :  { %v7998_v27 = vadd.f32 %v9326_v19, %v11834_v59 }
 0xca7   :  { %v7933_v40 = vpop.f32.mrf.mxu0 }
 0xca8   :  { %v8021_v39 = vadd.f32 %v12093_v15, %v7998_v27  ;;  %v7996_v8 = vadd.f32 %v7933_v40, %v11838_v37 }
 0xca9   :  { %v9327_v24 = vpop.f32.mrf.mxu0 }
 0xcaa   :  { %8037 = vst [vmem:[#allocation16 + $0x10] sm:$0xff] %v8021_v39  ;;  %v8019_v20 = vadd.f32 %v12093_v15, %v7996_v8  ;;  %v7999_v58 = vadd.f32 %v9327_v24, %v11842_v1 }
 0xcab   :  { %v7936_v36 = vpop.f32.mrf.mxu0 }
 0xcac   :  { %8035 = vst [vmem:[#allocation16] sm:$0xff] %v8019_v20  ;;  %v8022_v25 = vadd.f32 %v12093_v15, %v7999_v58  ;;  %v7997_v23 = vadd.f32 %v7936_v36, %v11846_v29 }
 0xcad   :  { %v9330_v28 = vpop.f32.mrf.mxu0 }
 0xcae   :  { %8038 = vst [vmem:[#allocation16 + $0x18] sm:$0xff] %v8022_v25  ;;  %v8020_v59 = vadd.f32 %v12093_v15, %v7997_v23  ;;  %v8002_v49 = vadd.f32 %v9330_v28, %v11850_v12 }
 0xcaf   :  { %v7949_v38 = vpop.f32.mrf.mxu0 }
 0xcb0   :  { %8036 = vst [vmem:[#allocation16 + $0x8] sm:$0xff] %v8020_v59  ;;  %v8025_v37 = vadd.f32 %v12093_v15, %v8002_v49  ;;  %v8000_v4 = vadd.f32 %v7949_v38, %v11855_v53 }
 0xcb1   :  { %v9331_v17 = vpop.f32.mrf.mxu0 }
 0xcb2   :  { %8041 = vst [vmem:[#allocation16 + $0x30] sm:$0xff] %v8025_v37  ;;  %v8023_v1 = vadd.f32 %v12093_v15, %v8000_v4  ;;  %v8003_v5 = vadd.f32 %v9331_v17, %v11860_v6 }
 0xcb3   :  { %v7952_v57 = vpop.f32.mrf.mxu0 }
 0xcb4   :  { %8039 = vst [vmem:[#allocation16 + $0x20] sm:$0xff] %v8023_v1  ;;  %v8026_v29 = vadd.f32 %v12093_v15, %v8003_v5  ;;  %v8001_v61 = vadd.f32 %v7952_v57, %v11862_v10 }
 0xcb6   :  { %8042 = vst [vmem:[#allocation16 + $0x38] sm:$0xff] %v8026_v29  ;;  %v8024_v12 = vadd.f32 %v12093_v15, %v8001_v61 }
 0xcb8   :  { %8040 = vst [vmem:[#allocation16 + $0x28] sm:$0xff] %v8024_v12 }
 0xcb9   :  { %9881 = shalt.err (!%p9878_p2)
}
 0xcba   :  { %8074 = dma.vmem_to_hbm [thread:$0]  %s8069_s5, 8192, %s12152_s13, [#allocation18], %s9928_s18, %s9928_s18, %s9929_s19  }
 0xcbb   :  { %s9939_s13 = smov [#allocation16]  }
 0xcbc   :  { %s8056_s23 = sshll.u32 %s9939_s13, 4  ;;  %s8057_s23 = int_to_ptr.vmem [resolvable:$true] %s8056_s23 }
 0xcbd   :  { %s9890_s24 = scalar_lea.vmem %s8057_s23, 2048  ;;  %p9895_p4 = scmp.lt.s32.totalorder %s8057_s23, %s8057_s23 }
 0xcbe   :  { %p9891_p3 = scmp.ne.s32.totalorder %s8057_s23, %s9890_s24  ;;  %p9896_p5 = scmp.lt.s32.totalorder %s9890_s24, %s9890_s24 }
 0xcc0   :  { %p9897_p6 = por %p9896_p5, %p9895_p4 }
 0xcc2   :  { %p9898_p7 = pnand %p9897_p6, %p9891_p3 }
 0xd37   :  { %v9334_v53 = vpop.f32.mrf.mxu0 }
 0xd38   :  { %v8006_v6 = vadd.f32 %v9334_v53, %v11897_v46 }
 0xd39   :  { %v7965_v10 = vpop.f32.mrf.mxu0 }
 0xd3a   :  { %v8029_v47 = vadd.f32 %v12093_v15, %v8006_v6  ;;  %v8004_v41 = vadd.f32 %v7965_v10, %v11902_v63 }
 0xd3b   :  { %v9335_v13 = vpop.f32.mrf.mxu0 }
 0xd3c   :  { %8045 = vst [vmem:[#allocation16 + $0x50] sm:$0xff] %v8029_v47  ;;  %v8027_v22 = vadd.f32 %v12093_v15, %v8004_v41  ;;  %v8007_v60 = vadd.f32 %v9335_v13, %v11906_v54 }
 0xd3d   :  { %v7968_v21 = vpop.f32.mrf.mxu0 }
 0xd3e   :  { %8043 = vst [vmem:[#allocation16 + $0x40] sm:$0xff] %v8027_v22  ;;  %v8030_v7 = vadd.f32 %v12093_v15, %v8007_v60  ;;  %v8005_v48 = vadd.f32 %v7968_v21, %v11910_v34 }
 0xd3f   :  { %v9338_v33 = vpop.f32.mrf.mxu0 }
 0xd40   :  { %8046 = vst [vmem:[#allocation16 + $0x58] sm:$0xff] %v8030_v7  ;;  %v8028_v46 = vadd.f32 %v12093_v15, %v8005_v48  ;;  %v8010_v16 = vadd.f32 %v9338_v33, %v11915_v14 }
 0xd41   :  { %v7981_v44 = vpop.f32.mrf.mxu0 }
 0xd42   :  { %8044 = vst [vmem:[#allocation16 + $0x48] sm:$0xff] %v8028_v46  ;;  %v8033_v63 = vadd.f32 %v12093_v15, %v8010_v16  ;;  %v8008_v62 = vadd.f32 %v7981_v44, %v11920_v31 }
 0xd43   :  { %v9339_v30 = vpop.f32.mrf.mxu0 }
 0xd44   :  { %8049 = vst [vmem:[#allocation16 + $0x70] sm:$0xff] %v8033_v63  ;;  %v8031_v54 = vadd.f32 %v12093_v15, %v8008_v62  ;;  %v8011_v51 = vadd.f32 %v9339_v30, %v11924_v42 }
 0xd45   :  { %v7984_v26 = vpop.f32.mrf.mxu0 }
 0xd46   :  { %8047 = vst [vmem:[#allocation16 + $0x60] sm:$0xff] %v8031_v54  ;;  %v8034_v34 = vadd.f32 %v12093_v15, %v8011_v51  ;;  %v8009_v14 = vadd.f32 %v7984_v26, %v11927_v32 }
 0xd48   :  { %8050 = vst [vmem:[#allocation16 + $0x78] sm:$0xff] %v8034_v34  ;;  %v8032_v2 = vadd.f32 %v12093_v15, %v8009_v14 }
 0xd4a   :  { %8048 = vst [vmem:[#allocation16 + $0x68] sm:$0xff] %v8032_v2 }
 0xd4b   :  { %9901 = shalt.err (!%p9898_p7)
}
 0xd4c   :  { %8062 = dma.vmem_to_hbm [thread:$0]  %s8057_s23, 2048, %s12151_s12, [#allocation4], %s9928_s18, %s9928_s18, %s9929_s19  }
 0xd4d   :  { %9920 = dma.done.wait [#allocation4], 2048  }
 0xd4e   :  { %9921 = vsyncadd [#allocation4], 4294965248 }
 0xd4f   :  { %9922 = dma.done.wait [#allocation18], 8192  }
 0xd50   :  { %9923 = vsyncadd [#allocation18], 4294959104 }
 0xd51   :  { %8081 = vsyncpa [#allocation3], 1 }
 0xd52   :  { %8082 = vsyncpa [#allocation6], 1 }
 0xd53   :  { %8083 = vsyncpa [#allocation9], 1 }
 0xd54   :  { %8084 = vsyncpa [#allocation12], 1 }
 0xd55   :  { %8085 = vsyncpa [#allocation15], 1 }
 0xd56   :  { %8086 = vsyncpa [#allocation4], 1 }
 0xd57   :  { %8087 = vsyncpa [#allocation18], 1 }

</bundles_post_ra>
